<compile_context>
chip_gen: v6e
topology: v6e:2x2x1
jax: 0.10.0
libtpu: 0.0.40
codegen_flags: <defaults>
</compile_context>

<pallas_src>
import functools
import math

import jax
import jax.numpy as jnp
from jax import lax
from jax.experimental import pallas as pl
from jax.experimental.pallas import tpu as pltpu


# ----------------------------------------------------------------------------- constants

EMB_DIM = 32        # stand-in for wav2vec hidden_size
EMO_DIM = 128       # hparams['emotion_embedding_dim'] (must be 128 so the speaker add works)
HQ = 128            # token embedding dim (hidden_dim_q)
HIDDEN = 256        # CrossAttentionModel inter_dim * num_heads
HEADS = 4
HEAD_DIM = HIDDEN // HEADS
CONV_K = 5          # encoder conv kernel size
REG_K = 3           # regression-head conv kernel size
LN_EPS = 1e-6       # nn.LayerNorm(..., eps=1e-06) in the reference module


# ----------------------------------------------------------------------------- in-kernel helpers

def _layernorm(x, g, b, eps):
    mean = jnp.mean(x, axis=-1, keepdims=True)
    var = jnp.mean(jnp.square(x - mean), axis=-1, keepdims=True)
    return (x - mean) * lax.rsqrt(var + eps) * g + b


# ----------------------------------------------------------------------------- kernel 1: encoder

def _encoder_kernel(x_ref, spk_ref, w13_ref, b13_ref, w2_ref, b2_ref,
                    w4_ref, b4_ref, spkw_ref, spkb_ref, wh_ref, bh_ref,
                    kv_ref, heads_ref, xpad_ref, ypad_ref, *, T, K):
    f32 = jnp.float32
    pad = (K - 1) // 2
    C2 = b13_ref.shape[-1]          # 256 = conv1|conv3 fused output channels
    C = C2 // 2                     # 128

    # ---- conv1 & conv3 fused (Cout = 2*C), 'same' padding via zeroed scratch, per-tap MXU accumulate
    xpad_ref[...] = jnp.zeros_like(xpad_ref)
    xpad_ref[pl.ds(pad, T), :] = x_ref[0]
    acc = jnp.zeros((T, C2), f32)
    for k in range(K):                                        # K=5, small static unroll
        acc += jnp.dot(xpad_ref[pl.ds(k, T), :], w13_ref[k],
                       preferred_element_type=f32)
    y = jnp.maximum(acc + b13_ref[...], 0.0)                  # [:, :C]=relu(conv1), [:, C:]=relu(conv3)

    # ---- conv2 & conv4 as a grouped conv: one im2col slab per channel half, single K*C=640 dot each
    ypad_ref[...] = jnp.zeros_like(ypad_ref)
    ypad_ref[pl.ds(pad, T), :] = y
    slab_e = jnp.concatenate([ypad_ref[pl.ds(k, T), pl.ds(0, C)] for k in range(K)], axis=-1)
    slab_s = jnp.concatenate([ypad_ref[pl.ds(k, T), pl.ds(C, C)] for k in range(K)], axis=-1)
    emo = jnp.maximum(jnp.dot(slab_e, w2_ref[...], preferred_element_type=f32) + b2_ref[...], 0.0)
    spkf = jnp.maximum(jnp.dot(slab_s, w4_ref[...], preferred_element_type=f32) + b4_ref[...], 0.0)

    # ---- time-mean pooling on the MXU + packed emo(5)/speaker(10) heads in one lane-dense matmul
    ones_row = jnp.full((1, T), 1.0 / T, dtype=f32)
    pooled = jnp.dot(ones_row, jnp.concatenate([emo, spkf], axis=-1),
                     preferred_element_type=f32)              # (1, 2*C)
    heads_ref[0] = jnp.dot(pooled, wh_ref[...], preferred_element_type=f32) + bh_ref[...]

    # ---- speaker conditioning: emo_embedded + Linear(speaker), broadcast over time
    spk_vec = jnp.dot(spk_ref[0], spkw_ref[...], preferred_element_type=f32) + spkb_ref[...]
    kv_ref[0] = emo + spk_vec


def encoder_forward(fp, aud, speaker):
    """aud: (B, T_a, EMB_DIM), speaker: (B, 128) -> kv (B, T_a, 128), heads (B, 1, 128)."""
    B, T, Cin = aud.shape
    K = CONV_K
    C2 = fp["b13"].shape[-1]
    C = C2 // 2
    spk3 = speaker.reshape(B, 1, C)
    full2 = lambda b: (0, 0)
    full3 = lambda b: (0, 0, 0)

    kv, heads = pl.pallas_call(
        functools.partial(_encoder_kernel, T=T, K=K),
        out_shape=(jax.ShapeDtypeStruct((B, T, C), jnp.float32),
                   jax.ShapeDtypeStruct((B, 1, HQ), jnp.float32)),
        grid=(B,),
        in_specs=[
            pl.BlockSpec((1, T, Cin), lambda b: (b, 0, 0)),      # aud features
            pl.BlockSpec((1, 1, C), lambda b: (b, 0, 0)),        # speaker
            pl.BlockSpec(fp["w13"].shape, full3),
            pl.BlockSpec(fp["b13"].shape, full2),
            pl.BlockSpec(fp["w2"].shape, full2),
            pl.BlockSpec(fp["b2"].shape, full2),
            pl.BlockSpec(fp["w4"].shape, full2),
            pl.BlockSpec(fp["b4"].shape, full2),
            pl.BlockSpec(fp["spk_w"].shape, full2),
            pl.BlockSpec(fp["spk_b"].shape, full2),
            pl.BlockSpec(fp["whead"].shape, full2),
            pl.BlockSpec(fp["bhead"].shape, full2),
        ],
        out_specs=(pl.BlockSpec((1, T, C), lambda b: (b, 0, 0)),
                   pl.BlockSpec((1, 1, HQ), lambda b: (b, 0, 0))),
        scratch_shapes=[pltpu.VMEM((T + K - 1, Cin), jnp.float32),
                        pltpu.VMEM((T + K - 1, C2), jnp.float32)],
        compiler_params=pltpu.CompilerParams(dimension_semantics=("parallel",)),
    )(aud, spk3, fp["w13"], fp["b13"], fp["w2"], fp["b2"], fp["w4"], fp["b4"],
      fp["spk_w"], fp["spk_b"], fp["whead"], fp["bhead"])
    return kv, heads


# ----------------------------------------------------------------------------- kernel 2: fusion + regression

def _fusion_kernel(hid_ref, kv_ref, wq_ref, bq_ref, wkv_ref, bkv_ref, wo_ref, bo_ref,
                   fcw_ref, fcb_ref, fc1w_ref, fc1b_ref,
                   lng_ref, lnb_ref, ln1g_ref, ln1b_ref,
                   r1w_ref, r1b_ref, r2w_ref, r2b_ref,
                   pitch_ref, pad_ref, *, heads, eps):
    f32 = jnp.float32
    Tq = hid_ref.shape[1]
    D = wq_ref.shape[-1]            # 256
    hd = D // heads                 # 64

    hid = hid_ref[0]                # (Tq, 128)  == query_i (residual)
    kvin = kv_ref[0]                # (Tk, 128)

    # pre-composed projections: Q has fc_q∘Wq_in and 1/sqrt(hd) folded in; K|V fused to 512 lanes
    q = jnp.dot(hid, wq_ref[...], preferred_element_type=f32) + bq_ref[...]        # (Tq, 256)
    kvp = jnp.dot(kvin, wkv_ref[...], preferred_element_type=f32) + bkv_ref[...]   # (Tk, 512)

    # all heads in one body; output projection accumulated per head (no ctx concat needed)
    cross = None
    for h in range(heads):
        qh = q[:, h * hd:(h + 1) * hd]
        kh = kvp[:, h * hd:(h + 1) * hd]
        vh = kvp[:, D + h * hd:D + (h + 1) * hd]
        s = jnp.einsum('qd,kd->qk', qh, kh, preferred_element_type=f32)            # (Tq, Tk)
        s = s - jnp.max(s, axis=-1, keepdims=True)
        pm = jnp.exp(s)
        pm = pm * pl.reciprocal(jnp.sum(pm, axis=-1, keepdims=True), approx=True)
        ctx_h = jnp.dot(pm, vh, preferred_element_type=f32)                         # (Tq, hd)
        part = jnp.dot(ctx_h, wo_ref[h], preferred_element_type=f32)                # (Tq, 256)
        cross = part if cross is None else cross + part
    cross = cross + bo_ref[...]

    # fc -> +query_i -> ReLU -> LayerNorm ; fc_1 -> +skip -> ReLU -> LayerNorm_1
    skip = jnp.dot(cross, fcw_ref[...], preferred_element_type=f32) + fcb_ref[...]
    skip = _layernorm(jnp.maximum(skip + hid, 0.0), lng_ref[...], lnb_ref[...], eps)
    new = jnp.dot(skip, fc1w_ref[...], preferred_element_type=f32) + fc1b_ref[...]
    fused = _layernorm(jnp.maximum(new + skip, 0.0), ln1g_ref[...], ln1b_ref[...], eps)

    # regression head: k=3 'same' conv via im2col + LeakyReLU + 1x1 conv
    pad_ref[...] = jnp.zeros_like(pad_ref)
    pad_ref[pl.ds(1, Tq), :] = fused
    slab = jnp.concatenate([pad_ref[pl.ds(k, Tq), :] for k in range(REG_K)], axis=-1)  # (Tq, 384)
    reg = jnp.dot(slab, r1w_ref[...], preferred_element_type=f32) + r1b_ref[...]
    reg = jnp.where(reg >= 0.0, reg, 0.01 * reg)
    pitch_ref[0] = jnp.dot(reg, r2w_ref[...], preferred_element_type=f32) + r2b_ref[...]


def fusion_forward(fp, hidden, kv):
    """hidden: (B, T_tok, 128), kv: (B, T_a, 128) -> pred_pitch (B, T_tok, 1)."""
    B, Tq, Dq = hidden.shape
    Tk, Dk = kv.shape[1], kv.shape[2]
    full2 = lambda b: (0, 0)
    full3 = lambda b: (0, 0, 0)

    return pl.pallas_call(
        functools.partial(_fusion_kernel, heads=HEADS, eps=LN_EPS),
        out_shape=jax.ShapeDtypeStruct((B, Tq, 1), jnp.float32),
        grid=(B,),
        in_specs=[
            pl.BlockSpec((1, Tq, Dq), lambda b: (b, 0, 0)),
            pl.BlockSpec((1, Tk, Dk), lambda b: (b, 0, 0)),
            pl.BlockSpec(fp["wq"].shape, full2),
            pl.BlockSpec(fp["bq"].shape, full2),
            pl.BlockSpec(fp["wkv"].shape, full2),
            pl.BlockSpec(fp["bkv"].shape, full2),
            pl.BlockSpec(fp["wo"].shape, full3),
            pl.BlockSpec(fp["bo"].shape, full2),
            pl.BlockSpec(fp["fc_w"].shape, full2),
            pl.BlockSpec(fp["fc_b"].shape, full2),
            pl.BlockSpec(fp["fc1_w"].shape, full2),
            pl.BlockSpec(fp["fc1_b"].shape, full2),
            pl.BlockSpec(fp["ln_g"].shape, full2),
            pl.BlockSpec(fp["ln_b"].shape, full2),
            pl.BlockSpec(fp["ln1_g"].shape, full2),
            pl.BlockSpec(fp["ln1_b"].shape, full2),
            pl.BlockSpec(fp["reg1_w"].shape, full2),
            pl.BlockSpec(fp["reg1_b"].shape, full2),
            pl.BlockSpec(fp["reg2_w"].shape, full2),
            pl.BlockSpec(fp["reg2_b"].shape, full2),
        ],
        out_specs=pl.BlockSpec((1, Tq, 1), lambda b: (b, 0, 0)),
        scratch_shapes=[pltpu.VMEM((Tq + REG_K - 1, Dq), jnp.float32)],
        compiler_params=pltpu.CompilerParams(dimension_semantics=("parallel",)),
    )(hidden, kv, fp["wq"], fp["bq"], fp["wkv"], fp["bkv"], fp["wo"], fp["bo"],
      fp["fc_w"], fp["fc_b"], fp["fc1_w"], fp["fc1_b"],
      fp["ln_g"], fp["ln_b"], fp["ln1_g"], fp["ln1_b"],
      fp["reg1_w"], fp["reg1_b"], fp["reg2_w"], fp["reg2_b"])


# ----------------------------------------------------------------------------- params

def init_params(key):
    ks = iter(jax.random.split(key, 64))

    def w(shape, scale=0.02):
        return scale * jax.random.normal(next(ks), shape, dtype=jnp.float32)

    def z(shape):
        return jnp.zeros(shape, dtype=jnp.float32)

    emb = w((101, HQ))
    emb = emb.at[100].set(0.0)                     # padding_idx=100

    return {
        "embedding": emb,
        # WAV2VECModel encoder
        "conv1_w": w((CONV_K, EMB_DIM, EMO_DIM)), "conv1_b": z((EMO_DIM,)),
        "conv2_w": w((CONV_K, EMO_DIM, EMO_DIM)), "conv2_b": z((EMO_DIM,)),
        "conv3_w": w((CONV_K, EMB_DIM, EMO_DIM)), "conv3_b": z((EMO_DIM,)),
        "conv4_w": w((CONV_K, EMO_DIM, EMO_DIM)), "conv4_b": z((EMO_DIM,)),
        "out_w": w((EMO_DIM, 5)), "out_b": z((5,)),
        "out_spkr_w": w((EMO_DIM, 10)), "out_spkr_b": z((10,)),
        # speaker linear
        "spk_w": w((128, 128)), "spk_b": z((128,)),
        # CrossAttentionModel
        "fc_q_w": w((HQ, HIDDEN)), "fc_q_b": z((HIDDEN,)),
        "fc_k_w": w((128, HIDDEN)), "fc_k_b": z((HIDDEN,)),
        "fc_v_w": w((128, HIDDEN)), "fc_v_b": z((HIDDEN,)),
        "mha_wq": w((HIDDEN, HIDDEN)), "mha_bq": z((HIDDEN,)),
        "mha_wk": w((HIDDEN, HIDDEN)), "mha_bk": z((HIDDEN,)),
        "mha_wv": w((HIDDEN, HIDDEN)), "mha_bv": z((HIDDEN,)),
        "mha_wo": w((HIDDEN, HIDDEN)), "mha_bo": z((HIDDEN,)),
        "fc_w": w((HIDDEN, HQ)), "fc_b": z((HQ,)),
        "fc1_w": w((HQ, HQ)), "fc1_b": z((HQ,)),
        "ln_g": jnp.ones((HQ,), jnp.float32), "ln_b": z((HQ,)),
        "ln1_g": jnp.ones((HQ,), jnp.float32), "ln1_b": z((HQ,)),
        # pitch regression head
        "cnn1_w": w((REG_K, 128, 128)), "cnn1_b": z((128,)),
        "cnn2_w": w((128, 1)), "cnn2_b": z((1,)),
    }


def fuse_params(p):
    """Host-side, one-time algebraic pre-composition / packing of weights for the fused kernels."""
    scale = 1.0 / math.sqrt(HEAD_DIM)
    # fc_q/fc_k/fc_v composed with the MHA in-projections (exact affine composition);
    # 1/sqrt(head_dim) folded into Q; K and V concatenated into one 512-wide matmul.
    wq = (p["fc_q_w"] @ p["mha_wq"]) * scale
    bq = (p["fc_q_b"] @ p["mha_wq"] + p["mha_bq"]) * scale
    wk = p["fc_k_w"] @ p["mha_wk"]
    bk = p["fc_k_b"] @ p["mha_wk"] + p["mha_bk"]
    wv = p["fc_v_w"] @ p["mha_wv"]
    bv = p["fc_v_b"] @ p["mha_wv"] + p["mha_bv"]

    # conv1 & conv3 share the same input -> concat output channels (Cout=256).
    w13 = jnp.concatenate([p["conv1_w"], p["conv3_w"]], axis=-1)          # (K, 32, 256)
    b13 = jnp.concatenate([p["conv1_b"], p["conv3_b"]]).reshape(1, 2 * EMO_DIM)

    # emo(5) and speaker(10) heads packed into one lane-dense (256,128) matmul.
    whead = jnp.zeros((2 * EMO_DIM, HQ), jnp.float32)
    whead = whead.at[:EMO_DIM, 0:5].set(p["out_w"]).at[EMO_DIM:, 8:18].set(p["out_spkr_w"])
    bhead = jnp.zeros((HQ,), jnp.float32).at[0:5].set(p["out_b"]).at[8:18].set(p["out_spkr_b"])

    return {
        "embedding": p["embedding"],
        "w13": w13, "b13": b13,
        "w2": p["conv2_w"].reshape(CONV_K * EMO_DIM, EMO_DIM), "b2": p["conv2_b"].reshape(1, EMO_DIM),
        "w4": p["conv4_w"].reshape(CONV_K * EMO_DIM, EMO_DIM), "b4": p["conv4_b"].reshape(1, EMO_DIM),
        "whead": whead, "bhead": bhead.reshape(1, HQ),
        "spk_w": p["spk_w"], "spk_b": p["spk_b"].reshape(1, 128),
        "wq": wq, "bq": bq.reshape(1, HIDDEN),
        "wkv": jnp.concatenate([wk, wv], axis=-1),                         # (128, 512)
        "bkv": jnp.concatenate([bk, bv]).reshape(1, 2 * HIDDEN),
        "wo": p["mha_wo"].reshape(HEADS, HEAD_DIM, HIDDEN),                # per-head row blocks
        "bo": p["mha_bo"].reshape(1, HIDDEN),
        "fc_w": p["fc_w"], "fc_b": p["fc_b"].reshape(1, HQ),
        "fc1_w": p["fc1_w"], "fc1_b": p["fc1_b"].reshape(1, HQ),
        "ln_g": p["ln_g"].reshape(1, HQ), "ln_b": p["ln_b"].reshape(1, HQ),
        "ln1_g": p["ln1_g"].reshape(1, HQ), "ln1_b": p["ln1_b"].reshape(1, HQ),
        "reg1_w": p["cnn1_w"].reshape(REG_K * 128, 128), "reg1_b": p["cnn1_b"].reshape(1, 128),
        "reg2_w": p["cnn2_w"], "reg2_b": p["cnn2_b"].reshape(1, 1),
    }


# ----------------------------------------------------------------------------- forward

def pitch_model_forward(fp, aud_feats, tokens, speaker, lengths, alpha=1.0):
    # alpha only affects the gradient-reversal backward pass; forward is identity.
    B, T_tok = tokens.shape

    # embedding lookup (glue: single XLA gather)
    hidden = jnp.take(fp["embedding"], tokens.astype(jnp.int32), axis=0)   # (B, T_tok, 128)

    # fused encoder: conv stack + pooling + emo/speaker heads + speaker conditioning
    kv, heads = encoder_forward(fp, aud_feats, speaker)                    # (B, T_a, 128), (B, 1, 128)
    emo_out = heads[:, 0, 0:5]
    spkr_out = heads[:, 0, 8:18]

    # fused cross-attention block + pitch regression head
    pred_pitch = fusion_forward(fp, hidden, kv)[..., 0]                    # (B, T_tok)

    # length masking
    mask = jnp.arange(T_tok)[None, :] < lengths[:, None]
    pred_pitch = jnp.where(mask, pred_pitch, 0.0)
    return pred_pitch, emo_out, spkr_out, mask.astype(jnp.int32)


# ----------------------------------------------------------------------------- main

if __name__ == "__main__":
    B, T_TOK, T_A = 2, 8, 16

    key = jax.random.PRNGKey(0)
    kp, ka, kt, ksp = jax.random.split(key, 4)

    params = init_params(kp)
    fused_params = fuse_params(params)          # one-time host-side weight pre-composition

    aud_feats = jax.random.normal(ka, (B, T_A, EMB_DIM), dtype=jnp.float32)
    tokens = jax.random.randint(kt, (B, T_TOK), 0, 101, dtype=jnp.int32)
    tokens = tokens.at[1, 6:].set(100)          # some padding tokens
    speaker = jax.random.normal(ksp, (B, 128), dtype=jnp.float32)
    lengths = jnp.array([8, 6], dtype=jnp.int32)

    fwd = jax.jit(pitch_model_forward)
    pred_pitch, emo_out, spkr_out, mask = fwd(fused_params, aud_feats, tokens, speaker, lengths)
    jax.block_until_ready((pred_pitch, emo_out, spkr_out, mask))

    assert pred_pitch.shape == (B, T_TOK)
    assert emo_out.shape == (B, 5)
    assert spkr_out.shape == (B, 10)
    assert mask.shape == (B, T_TOK)
    assert bool(jnp.all(jnp.isfinite(pred_pitch)))
    assert bool(jnp.all(pred_pitch[1, 6:] == 0.0))   # masked positions zeroed
    print("KERNEL_OK")
</pallas_src>

<mosaic_0001>
module attributes {stable_mosaic.version = 11 : i64} {
  func.func @_encoder_kernel(%arg0: i32, %arg1: memref<1x16x32xf32, #tpu.memory_space<vmem>>, %arg2: memref<1x1x128xf32, #tpu.memory_space<vmem>>, %arg3: memref<5x32x256xf32, #tpu.memory_space<vmem>>, %arg4: memref<1x256xf32, #tpu.memory_space<vmem>>, %arg5: memref<640x128xf32, #tpu.memory_space<vmem>>, %arg6: memref<1x128xf32, #tpu.memory_space<vmem>>, %arg7: memref<640x128xf32, #tpu.memory_space<vmem>>, %arg8: memref<1x128xf32, #tpu.memory_space<vmem>>, %arg9: memref<128x128xf32, #tpu.memory_space<vmem>>, %arg10: memref<1x128xf32, #tpu.memory_space<vmem>>, %arg11: memref<256x128xf32, #tpu.memory_space<vmem>>, %arg12: memref<1x128xf32, #tpu.memory_space<vmem>>, %arg13: memref<1x16x128xf32, #tpu.memory_space<vmem>>, %arg14: memref<1x1x128xf32, #tpu.memory_space<vmem>>, %arg15: memref<20x32xf32, #tpu.memory_space<vmem>>, %arg16: memref<20x256xf32, #tpu.memory_space<vmem>>) attributes {dimension_semantics = [#tpu.dimension_semantics<parallel>], iteration_bounds = array<i64: 2>, scalar_prefetch = 0 : i64, scratch_operands = 2 : i64, tpu.core_type = #tpu.core_type<tc>, window_params = [{transform_indices = @transform_0, window_bounds = array<i64: 1, 16, 32>}, {transform_indices = @transform_1, window_bounds = array<i64: 1, 1, 128>}, {pipeline_mode = #tpu.pipeline_mode<synchronous>, transform_indices = @transform_2, window_bounds = array<i64: 5, 32, 256>}, {pipeline_mode = #tpu.pipeline_mode<synchronous>, transform_indices = @transform_3, window_bounds = array<i64: 1, 256>}, {pipeline_mode = #tpu.pipeline_mode<synchronous>, transform_indices = @transform_4, window_bounds = array<i64: 640, 128>}, {pipeline_mode = #tpu.pipeline_mode<synchronous>, transform_indices = @transform_5, window_bounds = array<i64: 1, 128>}, {pipeline_mode = #tpu.pipeline_mode<synchronous>, transform_indices = @transform_6, window_bounds = array<i64: 640, 128>}, {pipeline_mode = #tpu.pipeline_mode<synchronous>, transform_indices = @transform_7, window_bounds = array<i64: 1, 128>}, {pipeline_mode = #tpu.pipeline_mode<synchronous>, transform_indices = @transform_8, window_bounds = array<i64: 128, 128>}, {pipeline_mode = #tpu.pipeline_mode<synchronous>, transform_indices = @transform_9, window_bounds = array<i64: 1, 128>}, {pipeline_mode = #tpu.pipeline_mode<synchronous>, transform_indices = @transform_10, window_bounds = array<i64: 256, 128>}, {pipeline_mode = #tpu.pipeline_mode<synchronous>, transform_indices = @transform_11, window_bounds = array<i64: 1, 128>}, {transform_indices = @transform_12, window_bounds = array<i64: 1, 16, 128>}, {transform_indices = @transform_13, window_bounds = array<i64: 1, 1, 128>}]} {
    %cst = arith.constant 0.000000e+00 : f32
    %0 = vector.broadcast %cst : f32 to vector<20x32xf32>
    %c0 = arith.constant 0 : index
    %c0_0 = arith.constant 0 : index
    %1 = vector.load %arg15[%c0, %c0_0] : memref<20x32xf32, #tpu.memory_space<vmem>>, vector<20x32xf32>
    tpu.vector_store %arg15[%c0, %c0_0], %0 {strides = array<i32>} : memref<20x32xf32, #tpu.memory_space<vmem>>, vector<20x32xf32>,
    %c0_1 = arith.constant 0 : index
    %c0_2 = arith.constant 0 : index
    %c0_3 = arith.constant 0 : index
    %2 = vector.load %arg1[%c0_1, %c0_2, %c0_3] : memref<1x16x32xf32, #tpu.memory_space<vmem>>, vector<1x16x32xf32>
    %3 = vector.shape_cast %2 : vector<1x16x32xf32> to vector<16x32xf32>
    %c2 = arith.constant 2 : index
    %c0_4 = arith.constant 0 : index
    %4 = vector.load %arg15[%c2, %c0_4] : memref<20x32xf32, #tpu.memory_space<vmem>>, vector<16x32xf32>
    tpu.vector_store %arg15[%c2, %c0_4], %3 {strides = array<i32>} : memref<20x32xf32, #tpu.memory_space<vmem>>, vector<16x32xf32>,
    %cst_5 = arith.constant 0.000000e+00 : f32
    %5 = vector.broadcast %cst_5 : f32 to vector<16x256xf32>
    %c0_6 = arith.constant 0 : index
    %c0_7 = arith.constant 0 : index
    %6 = vector.load %arg15[%c0_6, %c0_7] : memref<20x32xf32, #tpu.memory_space<vmem>>, vector<16x32xf32>
    %c0_8 = arith.constant 0 : index
    %c0_9 = arith.constant 0 : index
    %c0_10 = arith.constant 0 : index
    %7 = vector.load %arg3[%c0_8, %c0_9, %c0_10] : memref<5x32x256xf32, #tpu.memory_space<vmem>>, vector<1x32x256xf32>
    %8 = vector.shape_cast %7 : vector<1x32x256xf32> to vector<32x256xf32>
    %cst_11 = arith.constant dense<0.000000e+00> : vector<16x256xf32>
    %9 = tpu.matmul %6, %8, %cst_11 {dimension_numbers = #tpu.dot_dimension_numbers<[1], [0], [0], [1], [0, 0, 1, 1], [], []>} : vector<16x32xf32>, vector<32x256xf32>, vector<16x256xf32> -> vector<16x256xf32>
    %10 = arith.addf %5, %9 : vector<16x256xf32>
    %c1 = arith.constant 1 : index
    %c0_12 = arith.constant 0 : index
    %11 = vector.load %arg15[%c1, %c0_12] : memref<20x32xf32, #tpu.memory_space<vmem>>, vector<16x32xf32>
    %c1_13 = arith.constant 1 : index
    %c0_14 = arith.constant 0 : index
    %c0_15 = arith.constant 0 : index
    %12 = vector.load %arg3[%c1_13, %c0_14, %c0_15] : memref<5x32x256xf32, #tpu.memory_space<vmem>>, vector<1x32x256xf32>
    %13 = vector.shape_cast %12 : vector<1x32x256xf32> to vector<32x256xf32>
    %cst_16 = arith.constant dense<0.000000e+00> : vector<16x256xf32>
    %14 = tpu.matmul %11, %13, %cst_16 {dimension_numbers = #tpu.dot_dimension_numbers<[1], [0], [0], [1], [0, 0, 1, 1], [], []>} : vector<16x32xf32>, vector<32x256xf32>, vector<16x256xf32> -> vector<16x256xf32>
    %15 = arith.addf %10, %14 : vector<16x256xf32>
    %c2_17 = arith.constant 2 : index
    %c0_18 = arith.constant 0 : index
    %16 = vector.load %arg15[%c2_17, %c0_18] : memref<20x32xf32, #tpu.memory_space<vmem>>, vector<16x32xf32>
    %c2_19 = arith.constant 2 : index
    %c0_20 = arith.constant 0 : index
    %c0_21 = arith.constant 0 : index
    %17 = vector.load %arg3[%c2_19, %c0_20, %c0_21] : memref<5x32x256xf32, #tpu.memory_space<vmem>>, vector<1x32x256xf32>
    %18 = vector.shape_cast %17 : vector<1x32x256xf32> to vector<32x256xf32>
    %cst_22 = arith.constant dense<0.000000e+00> : vector<16x256xf32>
    %19 = tpu.matmul %16, %18, %cst_22 {dimension_numbers = #tpu.dot_dimension_numbers<[1], [0], [0], [1], [0, 0, 1, 1], [], []>} : vector<16x32xf32>, vector<32x256xf32>, vector<16x256xf32> -> vector<16x256xf32>
    %20 = arith.addf %15, %19 : vector<16x256xf32>
    %c3 = arith.constant 3 : index
    %c0_23 = arith.constant 0 : index
    %21 = vector.load %arg15[%c3, %c0_23] : memref<20x32xf32, #tpu.memory_space<vmem>>, vector<16x32xf32>
    %c3_24 = arith.constant 3 : index
    %c0_25 = arith.constant 0 : index
    %c0_26 = arith.constant 0 : index
    %22 = vector.load %arg3[%c3_24, %c0_25, %c0_26] : memref<5x32x256xf32, #tpu.memory_space<vmem>>, vector<1x32x256xf32>
    %23 = vector.shape_cast %22 : vector<1x32x256xf32> to vector<32x256xf32>
    %cst_27 = arith.constant dense<0.000000e+00> : vector<16x256xf32>
    %24 = tpu.matmul %21, %23, %cst_27 {dimension_numbers = #tpu.dot_dimension_numbers<[1], [0], [0], [1], [0, 0, 1, 1], [], []>} : vector<16x32xf32>, vector<32x256xf32>, vector<16x256xf32> -> vector<16x256xf32>
    %25 = arith.addf %20, %24 : vector<16x256xf32>
    %c4 = arith.constant 4 : index
    %c0_28 = arith.constant 0 : index
    %26 = vector.load %arg15[%c4, %c0_28] : memref<20x32xf32, #tpu.memory_space<vmem>>, vector<16x32xf32>
    %c4_29 = arith.constant 4 : index
    %c0_30 = arith.constant 0 : index
    %c0_31 = arith.constant 0 : index
    %27 = vector.load %arg3[%c4_29, %c0_30, %c0_31] : memref<5x32x256xf32, #tpu.memory_space<vmem>>, vector<1x32x256xf32>
    %28 = vector.shape_cast %27 : vector<1x32x256xf32> to vector<32x256xf32>
    %cst_32 = arith.constant dense<0.000000e+00> : vector<16x256xf32>
    %29 = tpu.matmul %26, %28, %cst_32 {dimension_numbers = #tpu.dot_dimension_numbers<[1], [0], [0], [1], [0, 0, 1, 1], [], []>} : vector<16x32xf32>, vector<32x256xf32>, vector<16x256xf32> -> vector<16x256xf32>
    %30 = arith.addf %25, %29 : vector<16x256xf32>
    %c0_33 = arith.constant 0 : index
    %c0_34 = arith.constant 0 : index
    %31 = vector.load %arg4[%c0_33, %c0_34] : memref<1x256xf32, #tpu.memory_space<vmem>>, vector<1x256xf32>
    %32 = vector.broadcast %31 : vector<1x256xf32> to vector<16x256xf32>
    %33 = arith.addf %30, %32 : vector<16x256xf32>
    %cst_35 = arith.constant 0.000000e+00 : f32
    %34 = vector.broadcast %cst_35 : f32 to vector<16x256xf32>
    %35 = arith.maximumf %33, %34 : vector<16x256xf32>
    %cst_36 = arith.constant 0.000000e+00 : f32
    %36 = vector.broadcast %cst_36 : f32 to vector<20x256xf32>
    %c0_37 = arith.constant 0 : index
    %c0_38 = arith.constant 0 : index
    %37 = vector.load %arg16[%c0_37, %c0_38] : memref<20x256xf32, #tpu.memory_space<vmem>>, vector<20x256xf32>
    tpu.vector_store %arg16[%c0_37, %c0_38], %36 {strides = array<i32>} : memref<20x256xf32, #tpu.memory_space<vmem>>, vector<20x256xf32>,
    %c2_39 = arith.constant 2 : index
    %c0_40 = arith.constant 0 : index
    %38 = vector.load %arg16[%c2_39, %c0_40] : memref<20x256xf32, #tpu.memory_space<vmem>>, vector<16x256xf32>
    tpu.vector_store %arg16[%c2_39, %c0_40], %35 {strides = array<i32>} : memref<20x256xf32, #tpu.memory_space<vmem>>, vector<16x256xf32>,
    %c0_41 = arith.constant 0 : index
    %c0_42 = arith.constant 0 : index
    %39 = vector.load %arg16[%c0_41, %c0_42] : memref<20x256xf32, #tpu.memory_space<vmem>>, vector<16x128xf32>
    %c1_43 = arith.constant 1 : index
    %c0_44 = arith.constant 0 : index
    %40 = vector.load %arg16[%c1_43, %c0_44] : memref<20x256xf32, #tpu.memory_space<vmem>>, vector<16x128xf32>
    %c2_45 = arith.constant 2 : index
    %c0_46 = arith.constant 0 : index
    %41 = vector.load %arg16[%c2_45, %c0_46] : memref<20x256xf32, #tpu.memory_space<vmem>>, vector<16x128xf32>
    %c3_47 = arith.constant 3 : index
    %c0_48 = arith.constant 0 : index
    %42 = vector.load %arg16[%c3_47, %c0_48] : memref<20x256xf32, #tpu.memory_space<vmem>>, vector<16x128xf32>
    %c4_49 = arith.constant 4 : index
    %c0_50 = arith.constant 0 : index
    %43 = vector.load %arg16[%c4_49, %c0_50] : memref<20x256xf32, #tpu.memory_space<vmem>>, vector<16x128xf32>
    %44 = tpu.concatenate %39, %40, %41, %42, %43 in 1 : vector<16x128xf32>, vector<16x128xf32>, vector<16x128xf32>, vector<16x128xf32>, vector<16x128xf32> -> vector<16x640xf32>
    %c0_51 = arith.constant 0 : index
    %c128 = arith.constant 128 : index
    %45 = vector.load %arg16[%c0_51, %c128] : memref<20x256xf32, #tpu.memory_space<vmem>>, vector<16x128xf32>
    %c1_52 = arith.constant 1 : index
    %c128_53 = arith.constant 128 : index
    %46 = vector.load %arg16[%c1_52, %c128_53] : memref<20x256xf32, #tpu.memory_space<vmem>>, vector<16x128xf32>
    %c2_54 = arith.constant 2 : index
    %c128_55 = arith.constant 128 : index
    %47 = vector.load %arg16[%c2_54, %c128_55] : memref<20x256xf32, #tpu.memory_space<vmem>>, vector<16x128xf32>
    %c3_56 = arith.constant 3 : index
    %c128_57 = arith.constant 128 : index
    %48 = vector.load %arg16[%c3_56, %c128_57] : memref<20x256xf32, #tpu.memory_space<vmem>>, vector<16x128xf32>
    %c4_58 = arith.constant 4 : index
    %c128_59 = arith.constant 128 : index
    %49 = vector.load %arg16[%c4_58, %c128_59] : memref<20x256xf32, #tpu.memory_space<vmem>>, vector<16x128xf32>
    %50 = tpu.concatenate %45, %46, %47, %48, %49 in 1 : vector<16x128xf32>, vector<16x128xf32>, vector<16x128xf32>, vector<16x128xf32>, vector<16x128xf32> -> vector<16x640xf32>
    %c0_60 = arith.constant 0 : index
    %c0_61 = arith.constant 0 : index
    %51 = vector.load %arg5[%c0_60, %c0_61] : memref<640x128xf32, #tpu.memory_space<vmem>>, vector<640x128xf32>
    %cst_62 = arith.constant dense<0.000000e+00> : vector<16x128xf32>
    %52 = tpu.matmul %44, %51, %cst_62 {dimension_numbers = #tpu.dot_dimension_numbers<[1], [0], [0], [1], [0, 0, 1, 1], [], []>} : vector<16x640xf32>, vector<640x128xf32>, vector<16x128xf32> -> vector<16x128xf32>
    %c0_63 = arith.constant 0 : index
    %c0_64 = arith.constant 0 : index
    %53 = vector.load %arg6[%c0_63, %c0_64] : memref<1x128xf32, #tpu.memory_space<vmem>>, vector<1x128xf32>
    %54 = vector.broadcast %53 : vector<1x128xf32> to vector<16x128xf32>
    %55 = arith.addf %52, %54 : vector<16x128xf32>
    %cst_65 = arith.constant 0.000000e+00 : f32
    %56 = vector.broadcast %cst_65 : f32 to vector<16x128xf32>
    %57 = arith.maximumf %55, %56 : vector<16x128xf32>
    %c0_66 = arith.constant 0 : index
    %c0_67 = arith.constant 0 : index
    %58 = vector.load %arg7[%c0_66, %c0_67] : memref<640x128xf32, #tpu.memory_space<vmem>>, vector<640x128xf32>
    %cst_68 = arith.constant dense<0.000000e+00> : vector<16x128xf32>
    %59 = tpu.matmul %50, %58, %cst_68 {dimension_numbers = #tpu.dot_dimension_numbers<[1], [0], [0], [1], [0, 0, 1, 1], [], []>} : vector<16x640xf32>, vector<640x128xf32>, vector<16x128xf32> -> vector<16x128xf32>
    %c0_69 = arith.constant 0 : index
    %c0_70 = arith.constant 0 : index
    %60 = vector.load %arg8[%c0_69, %c0_70] : memref<1x128xf32, #tpu.memory_space<vmem>>, vector<1x128xf32>
    %61 = vector.broadcast %60 : vector<1x128xf32> to vector<16x128xf32>
    %62 = arith.addf %59, %61 : vector<16x128xf32>
    %cst_71 = arith.constant 0.000000e+00 : f32
    %63 = vector.broadcast %cst_71 : f32 to vector<16x128xf32>
    %64 = arith.maximumf %62, %63 : vector<16x128xf32>
    %cst_72 = arith.constant 6.250000e-02 : f32
    %65 = vector.broadcast %cst_72 : f32 to vector<1x16xf32>
    %66 = tpu.concatenate %57, %64 in 1 : vector<16x128xf32>, vector<16x128xf32> -> vector<16x256xf32>
    %cst_73 = arith.constant dense<0.000000e+00> : vector<1x256xf32>
    %67 = tpu.matmul %65, %66, %cst_73 {dimension_numbers = #tpu.dot_dimension_numbers<[1], [0], [0], [1], [0, 0, 1, 1], [], []>} : vector<1x16xf32>, vector<16x256xf32>, vector<1x256xf32> -> vector<1x256xf32>
    %c0_74 = arith.constant 0 : index
    %c0_75 = arith.constant 0 : index
    %68 = vector.load %arg11[%c0_74, %c0_75] : memref<256x128xf32, #tpu.memory_space<vmem>>, vector<256x128xf32>
    %cst_76 = arith.constant dense<0.000000e+00> : vector<1x128xf32>
    %69 = tpu.matmul %67, %68, %cst_76 {dimension_numbers = #tpu.dot_dimension_numbers<[1], [0], [0], [1], [0, 0, 1, 1], [], []>} : vector<1x256xf32>, vector<256x128xf32>, vector<1x128xf32> -> vector<1x128xf32>
    %c0_77 = arith.constant 0 : index
    %c0_78 = arith.constant 0 : index
    %70 = vector.load %arg12[%c0_77, %c0_78] : memref<1x128xf32, #tpu.memory_space<vmem>>, vector<1x128xf32>
    %71 = arith.addf %69, %70 : vector<1x128xf32>
    %c0_79 = arith.constant 0 : index
    %c0_80 = arith.constant 0 : index
    %c0_81 = arith.constant 0 : index
    %72 = vector.load %arg14[%c0_79, %c0_80, %c0_81] : memref<1x1x128xf32, #tpu.memory_space<vmem>>, vector<1x1x128xf32>
    %73 = vector.shape_cast %72 : vector<1x1x128xf32> to vector<1x128xf32>
    %74 = vector.shape_cast %71 : vector<1x128xf32> to vector<1x1x128xf32>
    tpu.vector_store %arg14[%c0_79, %c0_80, %c0_81], %74 {strides = array<i32>} : memref<1x1x128xf32, #tpu.memory_space<vmem>>, vector<1x1x128xf32>,
    %c0_82 = arith.constant 0 : index
    %c0_83 = arith.constant 0 : index
    %c0_84 = arith.constant 0 : index
    %75 = vector.load %arg2[%c0_82, %c0_83, %c0_84] : memref<1x1x128xf32, #tpu.memory_space<vmem>>, vector<1x1x128xf32>
    %76 = vector.shape_cast %75 : vector<1x1x128xf32> to vector<1x128xf32>
    %c0_85 = arith.constant 0 : index
    %c0_86 = arith.constant 0 : index
    %77 = vector.load %arg9[%c0_85, %c0_86] : memref<128x128xf32, #tpu.memory_space<vmem>>, vector<128x128xf32>
    %cst_87 = arith.constant dense<0.000000e+00> : vector<1x128xf32>
    %78 = tpu.matmul %76, %77, %cst_87 {dimension_numbers = #tpu.dot_dimension_numbers<[1], [0], [0], [1], [0, 0, 1, 1], [], []>} : vector<1x128xf32>, vector<128x128xf32>, vector<1x128xf32> -> vector<1x128xf32>
    %c0_88 = arith.constant 0 : index
    %c0_89 = arith.constant 0 : index
    %79 = vector.load %arg10[%c0_88, %c0_89] : memref<1x128xf32, #tpu.memory_space<vmem>>, vector<1x128xf32>
    %80 = arith.addf %78, %79 : vector<1x128xf32>
    %81 = vector.broadcast %80 : vector<1x128xf32> to vector<16x128xf32>
    %82 = arith.addf %57, %81 : vector<16x128xf32>
    %c0_90 = arith.constant 0 : index
    %c0_91 = arith.constant 0 : index
    %c0_92 = arith.constant 0 : index
    %83 = vector.load %arg13[%c0_90, %c0_91, %c0_92] : memref<1x16x128xf32, #tpu.memory_space<vmem>>, vector<1x16x128xf32>
    %84 = vector.shape_cast %83 : vector<1x16x128xf32> to vector<16x128xf32>
    %85 = vector.shape_cast %82 : vector<16x128xf32> to vector<1x16x128xf32>
    tpu.vector_store %arg13[%c0_90, %c0_91, %c0_92], %85 {strides = array<i32>} : memref<1x16x128xf32, #tpu.memory_space<vmem>>, vector<1x16x128xf32>,
    return
  }
  func.func @transform_0(%arg0: i32) -> (i32, i32, i32) {
    %c0_i32 = arith.constant 0 : i32
    %c0_i32_0 = arith.constant 0 : i32
    %c0_i32_1 = arith.constant 0 : i32
    return %arg0, %c0_i32, %c0_i32_0 : i32, i32, i32
  }
  func.func @transform_1(%arg0: i32) -> (i32, i32, i32) {
    %c0_i32 = arith.constant 0 : i32
    %c0_i32_0 = arith.constant 0 : i32
    %c0_i32_1 = arith.constant 0 : i32
    return %arg0, %c0_i32, %c0_i32_0 : i32, i32, i32
  }
  func.func @transform_2(%arg0: i32) -> (i32, i32, i32) {
    %c0_i32 = arith.constant 0 : i32
    %c0_i32_0 = arith.constant 0 : i32
    %c0_i32_1 = arith.constant 0 : i32
    %c0_i32_2 = arith.constant 0 : i32
    return %c0_i32, %c0_i32_0, %c0_i32_1 : i32, i32, i32
  }
  func.func @transform_3(%arg0: i32) -> (i32, i32) {
    %c0_i32 = arith.constant 0 : i32
    %c0_i32_0 = arith.constant 0 : i32
    %c0_i32_1 = arith.constant 0 : i32
    return %c0_i32, %c0_i32_0 : i32, i32
  }
  func.func @transform_4(%arg0: i32) -> (i32, i32) {
    %c0_i32 = arith.constant 0 : i32
    %c0_i32_0 = arith.constant 0 : i32
    %c0_i32_1 = arith.constant 0 : i32
    return %c0_i32, %c0_i32_0 : i32, i32
  }
  func.func @transform_5(%arg0: i32) -> (i32, i32) {
    %c0_i32 = arith.constant 0 : i32
    %c0_i32_0 = arith.constant 0 : i32
    %c0_i32_1 = arith.constant 0 : i32
    return %c0_i32, %c0_i32_0 : i32, i32
  }
  func.func @transform_6(%arg0: i32) -> (i32, i32) {
    %c0_i32 = arith.constant 0 : i32
    %c0_i32_0 = arith.constant 0 : i32
    %c0_i32_1 = arith.constant 0 : i32
    return %c0_i32, %c0_i32_0 : i32, i32
  }
  func.func @transform_7(%arg0: i32) -> (i32, i32) {
    %c0_i32 = arith.constant 0 : i32
    %c0_i32_0 = arith.constant 0 : i32
    %c0_i32_1 = arith.constant 0 : i32
    return %c0_i32, %c0_i32_0 : i32, i32
  }
  func.func @transform_8(%arg0: i32) -> (i32, i32) {
    %c0_i32 = arith.constant 0 : i32
    %c0_i32_0 = arith.constant 0 : i32
    %c0_i32_1 = arith.constant 0 : i32
    return %c0_i32, %c0_i32_0 : i32, i32
  }
  func.func @transform_9(%arg0: i32) -> (i32, i32) {
    %c0_i32 = arith.constant 0 : i32
    %c0_i32_0 = arith.constant 0 : i32
    %c0_i32_1 = arith.constant 0 : i32
    return %c0_i32, %c0_i32_0 : i32, i32
  }
  func.func @transform_10(%arg0: i32) -> (i32, i32) {
    %c0_i32 = arith.constant 0 : i32
    %c0_i32_0 = arith.constant 0 : i32
    %c0_i32_1 = arith.constant 0 : i32
    return %c0_i32, %c0_i32_0 : i32, i32
  }
  func.func @transform_11(%arg0: i32) -> (i32, i32) {
    %c0_i32 = arith.constant 0 : i32
    %c0_i32_0 = arith.constant 0 : i32
    %c0_i32_1 = arith.constant 0 : i32
    return %c0_i32, %c0_i32_0 : i32, i32
  }
  func.func @transform_12(%arg0: i32) -> (i32, i32, i32) {
    %c0_i32 = arith.constant 0 : i32
    %c0_i32_0 = arith.constant 0 : i32
    %c0_i32_1 = arith.constant 0 : i32
    return %arg0, %c0_i32, %c0_i32_0 : i32, i32, i32
  }
  func.func @transform_13(%arg0: i32) -> (i32, i32, i32) {
    %c0_i32 = arith.constant 0 : i32
    %c0_i32_0 = arith.constant 0 : i32
    %c0_i32_1 = arith.constant 0 : i32
    return %arg0, %c0_i32, %c0_i32_0 : i32, i32, i32
  }
}

module attributes {stable_mosaic.version = 11 : i64} {
  func.func @_fusion_kernel(%arg0: i32, %arg1: memref<1x8x128xf32, #tpu.memory_space<vmem>>, %arg2: memref<1x16x128xf32, #tpu.memory_space<vmem>>, %arg3: memref<128x256xf32, #tpu.memory_space<vmem>>, %arg4: memref<1x256xf32, #tpu.memory_space<vmem>>, %arg5: memref<128x512xf32, #tpu.memory_space<vmem>>, %arg6: memref<1x512xf32, #tpu.memory_space<vmem>>, %arg7: memref<4x64x256xf32, #tpu.memory_space<vmem>>, %arg8: memref<1x256xf32, #tpu.memory_space<vmem>>, %arg9: memref<256x128xf32, #tpu.memory_space<vmem>>, %arg10: memref<1x128xf32, #tpu.memory_space<vmem>>, %arg11: memref<128x128xf32, #tpu.memory_space<vmem>>, %arg12: memref<1x128xf32, #tpu.memory_space<vmem>>, %arg13: memref<1x128xf32, #tpu.memory_space<vmem>>, %arg14: memref<1x128xf32, #tpu.memory_space<vmem>>, %arg15: memref<1x128xf32, #tpu.memory_space<vmem>>, %arg16: memref<1x128xf32, #tpu.memory_space<vmem>>, %arg17: memref<384x128xf32, #tpu.memory_space<vmem>>, %arg18: memref<1x128xf32, #tpu.memory_space<vmem>>, %arg19: memref<128x1xf32, #tpu.memory_space<vmem>>, %arg20: memref<1x1xf32, #tpu.memory_space<vmem>>, %arg21: memref<1x8x1xf32, #tpu.memory_space<vmem>>, %arg22: memref<10x128xf32, #tpu.memory_space<vmem>>) attributes {dimension_semantics = [#tpu.dimension_semantics<parallel>], iteration_bounds = array<i64: 2>, scalar_prefetch = 0 : i64, scratch_operands = 1 : i64, tpu.core_type = #tpu.core_type<tc>, window_params = [{transform_indices = @transform_0, window_bounds = array<i64: 1, 8, 128>}, {transform_indices = @transform_1, window_bounds = array<i64: 1, 16, 128>}, {pipeline_mode = #tpu.pipeline_mode<synchronous>, transform_indices = @transform_2, window_bounds = array<i64: 128, 256>}, {pipeline_mode = #tpu.pipeline_mode<synchronous>, transform_indices = @transform_3, window_bounds = array<i64: 1, 256>}, {pipeline_mode = #tpu.pipeline_mode<synchronous>, transform_indices = @transform_4, window_bounds = array<i64: 128, 512>}, {pipeline_mode = #tpu.pipeline_mode<synchronous>, transform_indices = @transform_5, window_bounds = array<i64: 1, 512>}, {pipeline_mode = #tpu.pipeline_mode<synchronous>, transform_indices = @transform_6, window_bounds = array<i64: 4, 64, 256>}, {pipeline_mode = #tpu.pipeline_mode<synchronous>, transform_indices = @transform_7, window_bounds = array<i64: 1, 256>}, {pipeline_mode = #tpu.pipeline_mode<synchronous>, transform_indices = @transform_8, window_bounds = array<i64: 256, 128>}, {pipeline_mode = #tpu.pipeline_mode<synchronous>, transform_indices = @transform_9, window_bounds = array<i64: 1, 128>}, {pipeline_mode = #tpu.pipeline_mode<synchronous>, transform_indices = @transform_10, window_bounds = array<i64: 128, 128>}, {pipeline_mode = #tpu.pipeline_mode<synchronous>, transform_indices = @transform_11, window_bounds = array<i64: 1, 128>}, {pipeline_mode = #tpu.pipeline_mode<synchronous>, transform_indices = @transform_12, window_bounds = array<i64: 1, 128>}, {pipeline_mode = #tpu.pipeline_mode<synchronous>, transform_indices = @transform_13, window_bounds = array<i64: 1, 128>}, {pipeline_mode = #tpu.pipeline_mode<synchronous>, transform_indices = @transform_14, window_bounds = array<i64: 1, 128>}, {pipeline_mode = #tpu.pipeline_mode<synchronous>, transform_indices = @transform_15, window_bounds = array<i64: 1, 128>}, {pipeline_mode = #tpu.pipeline_mode<synchronous>, transform_indices = @transform_16, window_bounds = array<i64: 384, 128>}, {pipeline_mode = #tpu.pipeline_mode<synchronous>, transform_indices = @transform_17, window_bounds = array<i64: 1, 128>}, {pipeline_mode = #tpu.pipeline_mode<synchronous>, transform_indices = @transform_18, window_bounds = array<i64: 128, 1>}, {pipeline_mode = #tpu.pipeline_mode<synchronous>, transform_indices = @transform_19, window_bounds = array<i64: 1, 1>}, {transform_indices = @transform_20, window_bounds = array<i64: 1, 8, 1>}]} {
    %c0 = arith.constant 0 : index
    %c0_0 = arith.constant 0 : index
    %c0_1 = arith.constant 0 : index
    %0 = vector.load %arg1[%c0, %c0_0, %c0_1] : memref<1x8x128xf32, #tpu.memory_space<vmem>>, vector<1x8x128xf32>
    %1 = vector.shape_cast %0 : vector<1x8x128xf32> to vector<8x128xf32>
    %c0_2 = arith.constant 0 : index
    %c0_3 = arith.constant 0 : index
    %c0_4 = arith.constant 0 : index
    %2 = vector.load %arg2[%c0_2, %c0_3, %c0_4] : memref<1x16x128xf32, #tpu.memory_space<vmem>>, vector<1x16x128xf32>
    %3 = vector.shape_cast %2 : vector<1x16x128xf32> to vector<16x128xf32>
    %c0_5 = arith.constant 0 : index
    %c0_6 = arith.constant 0 : index
    %4 = vector.load %arg3[%c0_5, %c0_6] : memref<128x256xf32, #tpu.memory_space<vmem>>, vector<128x256xf32>
    %cst = arith.constant dense<0.000000e+00> : vector<8x256xf32>
    %5 = tpu.matmul %1, %4, %cst {dimension_numbers = #tpu.dot_dimension_numbers<[1], [0], [0], [1], [0, 0, 1, 1], [], []>} : vector<8x128xf32>, vector<128x256xf32>, vector<8x256xf32> -> vector<8x256xf32>
    %c0_7 = arith.constant 0 : index
    %c0_8 = arith.constant 0 : index
    %6 = vector.load %arg4[%c0_7, %c0_8] : memref<1x256xf32, #tpu.memory_space<vmem>>, vector<1x256xf32>
    %7 = vector.broadcast %6 : vector<1x256xf32> to vector<8x256xf32>
    %8 = arith.addf %5, %7 : vector<8x256xf32>
    %c0_9 = arith.constant 0 : index
    %c0_10 = arith.constant 0 : index
    %9 = vector.load %arg5[%c0_9, %c0_10] : memref<128x512xf32, #tpu.memory_space<vmem>>, vector<128x512xf32>
    %cst_11 = arith.constant dense<0.000000e+00> : vector<16x512xf32>
    %10 = tpu.matmul %3, %9, %cst_11 {dimension_numbers = #tpu.dot_dimension_numbers<[1], [0], [0], [1], [0, 0, 1, 1], [], []>} : vector<16x128xf32>, vector<128x512xf32>, vector<16x512xf32> -> vector<16x512xf32>
    %c0_12 = arith.constant 0 : index
    %c0_13 = arith.constant 0 : index
    %11 = vector.load %arg6[%c0_12, %c0_13] : memref<1x512xf32, #tpu.memory_space<vmem>>, vector<1x512xf32>
    %12 = vector.broadcast %11 : vector<1x512xf32> to vector<16x512xf32>
    %13 = arith.addf %10, %12 : vector<16x512xf32>
    %14 = vector.extract_strided_slice %8 {offsets = [0, 0], sizes = [8, 64], strides = [1, 1]} : vector<8x256xf32> to vector<8x64xf32>
    %15 = vector.extract_strided_slice %13 {offsets = [0, 0], sizes = [16, 64], strides = [1, 1]} : vector<16x512xf32> to vector<16x64xf32>
    %16 = vector.extract_strided_slice %13 {offsets = [0, 256], sizes = [16, 64], strides = [1, 1]} : vector<16x512xf32> to vector<16x64xf32>
    "tpu.trace_start"() <{level = 10 : i32, message = "qd,kd->qk"}> : () -> ()
    %cst_14 = arith.constant dense<0.000000e+00> : vector<8x16xf32>
    %17 = tpu.matmul %14, %15, %cst_14 {dimension_numbers = #tpu.dot_dimension_numbers<[1], [1], [0], [0], [0, 0, 1, 0], [], []>} : vector<8x64xf32>, vector<16x64xf32>, vector<8x16xf32> -> vector<8x16xf32>
    "tpu.trace_stop"() : () -> ()
    %cst_15 = arith.constant dense<0xFF800000> : vector<8xf32>
    %18 = vector.multi_reduction <maximumf>, %17, %cst_15 [1] : vector<8x16xf32> to vector<8xf32>
    %19 = vector.shape_cast %18 : vector<8xf32> to vector<8x1xf32>
    %20 = vector.broadcast %19 : vector<8x1xf32> to vector<8x16xf32>
    %21 = arith.subf %17, %20 : vector<8x16xf32>
    %22 = math.exp %21 : vector<8x16xf32>
    %cst_16 = arith.constant dense<0.000000e+00> : vector<8xf32>
    %23 = vector.multi_reduction <add>, %22, %cst_16 [1] : vector<8x16xf32> to vector<8xf32>
    %24 = vector.shape_cast %23 : vector<8xf32> to vector<8x1xf32>
    %25 = tpu.reciprocal %24 {approx = true} : vector<8x1xf32> -> vector<8x1xf32>
    %26 = vector.broadcast %25 : vector<8x1xf32> to vector<8x16xf32>
    %27 = arith.mulf %22, %26 : vector<8x16xf32>
    %cst_17 = arith.constant dense<0.000000e+00> : vector<8x64xf32>
    %28 = tpu.matmul %27, %16, %cst_17 {dimension_numbers = #tpu.dot_dimension_numbers<[1], [0], [0], [1], [0, 0, 1, 1], [], []>} : vector<8x16xf32>, vector<16x64xf32>, vector<8x64xf32> -> vector<8x64xf32>
    %c0_18 = arith.constant 0 : index
    %c0_19 = arith.constant 0 : index
    %c0_20 = arith.constant 0 : index
    %29 = vector.load %arg7[%c0_18, %c0_19, %c0_20] : memref<4x64x256xf32, #tpu.memory_space<vmem>>, vector<1x64x256xf32>
    %30 = vector.shape_cast %29 : vector<1x64x256xf32> to vector<64x256xf32>
    %cst_21 = arith.constant dense<0.000000e+00> : vector<8x256xf32>
    %31 = tpu.matmul %28, %30, %cst_21 {dimension_numbers = #tpu.dot_dimension_numbers<[1], [0], [0], [1], [0, 0, 1, 1], [], []>} : vector<8x64xf32>, vector<64x256xf32>, vector<8x256xf32> -> vector<8x256xf32>
    %32 = vector.extract_strided_slice %8 {offsets = [0, 64], sizes = [8, 64], strides = [1, 1]} : vector<8x256xf32> to vector<8x64xf32>
    %33 = vector.extract_strided_slice %13 {offsets = [0, 64], sizes = [16, 64], strides = [1, 1]} : vector<16x512xf32> to vector<16x64xf32>
    %34 = vector.extract_strided_slice %13 {offsets = [0, 320], sizes = [16, 64], strides = [1, 1]} : vector<16x512xf32> to vector<16x64xf32>
    "tpu.trace_start"() <{level = 10 : i32, message = "qd,kd->qk"}> : () -> ()
    %cst_22 = arith.constant dense<0.000000e+00> : vector<8x16xf32>
    %35 = tpu.matmul %32, %33, %cst_22 {dimension_numbers = #tpu.dot_dimension_numbers<[1], [1], [0], [0], [0, 0, 1, 0], [], []>} : vector<8x64xf32>, vector<16x64xf32>, vector<8x16xf32> -> vector<8x16xf32>
    "tpu.trace_stop"() : () -> ()
    %cst_23 = arith.constant dense<0xFF800000> : vector<8xf32>
    %36 = vector.multi_reduction <maximumf>, %35, %cst_23 [1] : vector<8x16xf32> to vector<8xf32>
    %37 = vector.shape_cast %36 : vector<8xf32> to vector<8x1xf32>
    %38 = vector.broadcast %37 : vector<8x1xf32> to vector<8x16xf32>
    %39 = arith.subf %35, %38 : vector<8x16xf32>
    %40 = math.exp %39 : vector<8x16xf32>
    %cst_24 = arith.constant dense<0.000000e+00> : vector<8xf32>
    %41 = vector.multi_reduction <add>, %40, %cst_24 [1] : vector<8x16xf32> to vector<8xf32>
    %42 = vector.shape_cast %41 : vector<8xf32> to vector<8x1xf32>
    %43 = tpu.reciprocal %42 {approx = true} : vector<8x1xf32> -> vector<8x1xf32>
    %44 = vector.broadcast %43 : vector<8x1xf32> to vector<8x16xf32>
    %45 = arith.mulf %40, %44 : vector<8x16xf32>
    %cst_25 = arith.constant dense<0.000000e+00> : vector<8x64xf32>
    %46 = tpu.matmul %45, %34, %cst_25 {dimension_numbers = #tpu.dot_dimension_numbers<[1], [0], [0], [1], [0, 0, 1, 1], [], []>} : vector<8x16xf32>, vector<16x64xf32>, vector<8x64xf32> -> vector<8x64xf32>
    %c1 = arith.constant 1 : index
    %c0_26 = arith.constant 0 : index
    %c0_27 = arith.constant 0 : index
    %47 = vector.load %arg7[%c1, %c0_26, %c0_27] : memref<4x64x256xf32, #tpu.memory_space<vmem>>, vector<1x64x256xf32>
    %48 = vector.shape_cast %47 : vector<1x64x256xf32> to vector<64x256xf32>
    %cst_28 = arith.constant dense<0.000000e+00> : vector<8x256xf32>
    %49 = tpu.matmul %46, %48, %cst_28 {dimension_numbers = #tpu.dot_dimension_numbers<[1], [0], [0], [1], [0, 0, 1, 1], [], []>} : vector<8x64xf32>, vector<64x256xf32>, vector<8x256xf32> -> vector<8x256xf32>
    %50 = arith.addf %31, %49 : vector<8x256xf32>
    %51 = vector.extract_strided_slice %8 {offsets = [0, 128], sizes = [8, 64], strides = [1, 1]} : vector<8x256xf32> to vector<8x64xf32>
    %52 = vector.extract_strided_slice %13 {offsets = [0, 128], sizes = [16, 64], strides = [1, 1]} : vector<16x512xf32> to vector<16x64xf32>
    %53 = vector.extract_strided_slice %13 {offsets = [0, 384], sizes = [16, 64], strides = [1, 1]} : vector<16x512xf32> to vector<16x64xf32>
    "tpu.trace_start"() <{level = 10 : i32, message = "qd,kd->qk"}> : () -> ()
    %cst_29 = arith.constant dense<0.000000e+00> : vector<8x16xf32>
    %54 = tpu.matmul %51, %52, %cst_29 {dimension_numbers = #tpu.dot_dimension_numbers<[1], [1], [0], [0], [0, 0, 1, 0], [], []>} : vector<8x64xf32>, vector<16x64xf32>, vector<8x16xf32> -> vector<8x16xf32>
    "tpu.trace_stop"() : () -> ()
    %cst_30 = arith.constant dense<0xFF800000> : vector<8xf32>
    %55 = vector.multi_reduction <maximumf>, %54, %cst_30 [1] : vector<8x16xf32> to vector<8xf32>
    %56 = vector.shape_cast %55 : vector<8xf32> to vector<8x1xf32>
    %57 = vector.broadcast %56 : vector<8x1xf32> to vector<8x16xf32>
    %58 = arith.subf %54, %57 : vector<8x16xf32>
    %59 = math.exp %58 : vector<8x16xf32>
    %cst_31 = arith.constant dense<0.000000e+00> : vector<8xf32>
    %60 = vector.multi_reduction <add>, %59, %cst_31 [1] : vector<8x16xf32> to vector<8xf32>
    %61 = vector.shape_cast %60 : vector<8xf32> to vector<8x1xf32>
    %62 = tpu.reciprocal %61 {approx = true} : vector<8x1xf32> -> vector<8x1xf32>
    %63 = vector.broadcast %62 : vector<8x1xf32> to vector<8x16xf32>
    %64 = arith.mulf %59, %63 : vector<8x16xf32>
    %cst_32 = arith.constant dense<0.000000e+00> : vector<8x64xf32>
    %65 = tpu.matmul %64, %53, %cst_32 {dimension_numbers = #tpu.dot_dimension_numbers<[1], [0], [0], [1], [0, 0, 1, 1], [], []>} : vector<8x16xf32>, vector<16x64xf32>, vector<8x64xf32> -> vector<8x64xf32>
    %c2 = arith.constant 2 : index
    %c0_33 = arith.constant 0 : index
    %c0_34 = arith.constant 0 : index
    %66 = vector.load %arg7[%c2, %c0_33, %c0_34] : memref<4x64x256xf32, #tpu.memory_space<vmem>>, vector<1x64x256xf32>
    %67 = vector.shape_cast %66 : vector<1x64x256xf32> to vector<64x256xf32>
    %cst_35 = arith.constant dense<0.000000e+00> : vector<8x256xf32>
    %68 = tpu.matmul %65, %67, %cst_35 {dimension_numbers = #tpu.dot_dimension_numbers<[1], [0], [0], [1], [0, 0, 1, 1], [], []>} : vector<8x64xf32>, vector<64x256xf32>, vector<8x256xf32> -> vector<8x256xf32>
    %69 = arith.addf %50, %68 : vector<8x256xf32>
    %70 = vector.extract_strided_slice %8 {offsets = [0, 192], sizes = [8, 64], strides = [1, 1]} : vector<8x256xf32> to vector<8x64xf32>
    %71 = vector.extract_strided_slice %13 {offsets = [0, 192], sizes = [16, 64], strides = [1, 1]} : vector<16x512xf32> to vector<16x64xf32>
    %72 = vector.extract_strided_slice %13 {offsets = [0, 448], sizes = [16, 64], strides = [1, 1]} : vector<16x512xf32> to vector<16x64xf32>
    "tpu.trace_start"() <{level = 10 : i32, message = "qd,kd->qk"}> : () -> ()
    %cst_36 = arith.constant dense<0.000000e+00> : vector<8x16xf32>
    %73 = tpu.matmul %70, %71, %cst_36 {dimension_numbers = #tpu.dot_dimension_numbers<[1], [1], [0], [0], [0, 0, 1, 0], [], []>} : vector<8x64xf32>, vector<16x64xf32>, vector<8x16xf32> -> vector<8x16xf32>
    "tpu.trace_stop"() : () -> ()
    %cst_37 = arith.constant dense<0xFF800000> : vector<8xf32>
    %74 = vector.multi_reduction <maximumf>, %73, %cst_37 [1] : vector<8x16xf32> to vector<8xf32>
    %75 = vector.shape_cast %74 : vector<8xf32> to vector<8x1xf32>
    %76 = vector.broadcast %75 : vector<8x1xf32> to vector<8x16xf32>
    %77 = arith.subf %73, %76 : vector<8x16xf32>
    %78 = math.exp %77 : vector<8x16xf32>
    %cst_38 = arith.constant dense<0.000000e+00> : vector<8xf32>
    %79 = vector.multi_reduction <add>, %78, %cst_38 [1] : vector<8x16xf32> to vector<8xf32>
    %80 = vector.shape_cast %79 : vector<8xf32> to vector<8x1xf32>
    %81 = tpu.reciprocal %80 {approx = true} : vector<8x1xf32> -> vector<8x1xf32>
    %82 = vector.broadcast %81 : vector<8x1xf32> to vector<8x16xf32>
    %83 = arith.mulf %78, %82 : vector<8x16xf32>
    %cst_39 = arith.constant dense<0.000000e+00> : vector<8x64xf32>
    %84 = tpu.matmul %83, %72, %cst_39 {dimension_numbers = #tpu.dot_dimension_numbers<[1], [0], [0], [1], [0, 0, 1, 1], [], []>} : vector<8x16xf32>, vector<16x64xf32>, vector<8x64xf32> -> vector<8x64xf32>
    %c3 = arith.constant 3 : index
    %c0_40 = arith.constant 0 : index
    %c0_41 = arith.constant 0 : index
    %85 = vector.load %arg7[%c3, %c0_40, %c0_41] : memref<4x64x256xf32, #tpu.memory_space<vmem>>, vector<1x64x256xf32>
    %86 = vector.shape_cast %85 : vector<1x64x256xf32> to vector<64x256xf32>
    %cst_42 = arith.constant dense<0.000000e+00> : vector<8x256xf32>
    %87 = tpu.matmul %84, %86, %cst_42 {dimension_numbers = #tpu.dot_dimension_numbers<[1], [0], [0], [1], [0, 0, 1, 1], [], []>} : vector<8x64xf32>, vector<64x256xf32>, vector<8x256xf32> -> vector<8x256xf32>
    %88 = arith.addf %69, %87 : vector<8x256xf32>
    %c0_43 = arith.constant 0 : index
    %c0_44 = arith.constant 0 : index
    %89 = vector.load %arg8[%c0_43, %c0_44] : memref<1x256xf32, #tpu.memory_space<vmem>>, vector<1x256xf32>
    %90 = vector.broadcast %89 : vector<1x256xf32> to vector<8x256xf32>
    %91 = arith.addf %88, %90 : vector<8x256xf32>
    %c0_45 = arith.constant 0 : index
    %c0_46 = arith.constant 0 : index
    %92 = vector.load %arg9[%c0_45, %c0_46] : memref<256x128xf32, #tpu.memory_space<vmem>>, vector<256x128xf32>
    %cst_47 = arith.constant dense<0.000000e+00> : vector<8x128xf32>
    %93 = tpu.matmul %91, %92, %cst_47 {dimension_numbers = #tpu.dot_dimension_numbers<[1], [0], [0], [1], [0, 0, 1, 1], [], []>} : vector<8x256xf32>, vector<256x128xf32>, vector<8x128xf32> -> vector<8x128xf32>
    %c0_48 = arith.constant 0 : index
    %c0_49 = arith.constant 0 : index
    %94 = vector.load %arg10[%c0_48, %c0_49] : memref<1x128xf32, #tpu.memory_space<vmem>>, vector<1x128xf32>
    %95 = vector.broadcast %94 : vector<1x128xf32> to vector<8x128xf32>
    %96 = arith.addf %93, %95 : vector<8x128xf32>
    %97 = arith.addf %96, %1 : vector<8x128xf32>
    %cst_50 = arith.constant 0.000000e+00 : f32
    %98 = vector.broadcast %cst_50 : f32 to vector<8x128xf32>
    %99 = arith.maximumf %97, %98 : vector<8x128xf32>
    %c0_51 = arith.constant 0 : index
    %c0_52 = arith.constant 0 : index
    %100 = vector.load %arg13[%c0_51, %c0_52] : memref<1x128xf32, #tpu.memory_space<vmem>>, vector<1x128xf32>
    %c0_53 = arith.constant 0 : index
    %c0_54 = arith.constant 0 : index
    %101 = vector.load %arg14[%c0_53, %c0_54] : memref<1x128xf32, #tpu.memory_space<vmem>>, vector<1x128xf32>
    %cst_55 = arith.constant dense<0.000000e+00> : vector<8xf32>
    %102 = vector.multi_reduction <add>, %99, %cst_55 [1] : vector<8x128xf32> to vector<8xf32>
    %103 = vector.shape_cast %102 : vector<8xf32> to vector<8x1xf32>
    %cst_56 = arith.constant 1.280000e+02 : f32
    %104 = vector.broadcast %cst_56 : f32 to vector<8x1xf32>
    %105 = arith.divf %103, %104 : vector<8x1xf32>
    %106 = vector.broadcast %105 : vector<8x1xf32> to vector<8x128xf32>
    %107 = arith.subf %99, %106 : vector<8x128xf32>
    %108 = arith.mulf %107, %107 : vector<8x128xf32>
    %cst_57 = arith.constant dense<0.000000e+00> : vector<8xf32>
    %109 = vector.multi_reduction <add>, %108, %cst_57 [1] : vector<8x128xf32> to vector<8xf32>
    %110 = vector.shape_cast %109 : vector<8xf32> to vector<8x1xf32>
    %cst_58 = arith.constant 1.280000e+02 : f32
    %111 = vector.broadcast %cst_58 : f32 to vector<8x1xf32>
    %112 = arith.divf %110, %111 : vector<8x1xf32>
    %113 = vector.broadcast %105 : vector<8x1xf32> to vector<8x128xf32>
    %114 = arith.subf %99, %113 : vector<8x128xf32>
    %cst_59 = arith.constant 9.99999997E-7 : f32
    %115 = vector.broadcast %cst_59 : f32 to vector<8x1xf32>
    %116 = arith.addf %112, %115 : vector<8x1xf32>
    %117 = math.rsqrt %116 : vector<8x1xf32>
    %118 = vector.broadcast %117 : vector<8x1xf32> to vector<8x128xf32>
    %119 = arith.mulf %114, %118 : vector<8x128xf32>
    %120 = vector.broadcast %100 : vector<1x128xf32> to vector<8x128xf32>
    %121 = arith.mulf %119, %120 : vector<8x128xf32>
    %122 = vector.broadcast %101 : vector<1x128xf32> to vector<8x128xf32>
    %123 = arith.addf %121, %122 : vector<8x128xf32>
    %c0_60 = arith.constant 0 : index
    %c0_61 = arith.constant 0 : index
    %124 = vector.load %arg11[%c0_60, %c0_61] : memref<128x128xf32, #tpu.memory_space<vmem>>, vector<128x128xf32>
    %cst_62 = arith.constant dense<0.000000e+00> : vector<8x128xf32>
    %125 = tpu.matmul %123, %124, %cst_62 {dimension_numbers = #tpu.dot_dimension_numbers<[1], [0], [0], [1], [0, 0, 1, 1], [], []>} : vector<8x128xf32>, vector<128x128xf32>, vector<8x128xf32> -> vector<8x128xf32>
    %c0_63 = arith.constant 0 : index
    %c0_64 = arith.constant 0 : index
    %126 = vector.load %arg12[%c0_63, %c0_64] : memref<1x128xf32, #tpu.memory_space<vmem>>, vector<1x128xf32>
    %127 = vector.broadcast %126 : vector<1x128xf32> to vector<8x128xf32>
    %128 = arith.addf %125, %127 : vector<8x128xf32>
    %129 = arith.addf %128, %123 : vector<8x128xf32>
    %cst_65 = arith.constant 0.000000e+00 : f32
    %130 = vector.broadcast %cst_65 : f32 to vector<8x128xf32>
    %131 = arith.maximumf %129, %130 : vector<8x128xf32>
    %c0_66 = arith.constant 0 : index
    %c0_67 = arith.constant 0 : index
    %132 = vector.load %arg15[%c0_66, %c0_67] : memref<1x128xf32, #tpu.memory_space<vmem>>, vector<1x128xf32>
    %c0_68 = arith.constant 0 : index
    %c0_69 = arith.constant 0 : index
    %133 = vector.load %arg16[%c0_68, %c0_69] : memref<1x128xf32, #tpu.memory_space<vmem>>, vector<1x128xf32>
    %cst_70 = arith.constant dense<0.000000e+00> : vector<8xf32>
    %134 = vector.multi_reduction <add>, %131, %cst_70 [1] : vector<8x128xf32> to vector<8xf32>
    %135 = vector.shape_cast %134 : vector<8xf32> to vector<8x1xf32>
    %cst_71 = arith.constant 1.280000e+02 : f32
    %136 = vector.broadcast %cst_71 : f32 to vector<8x1xf32>
    %137 = arith.divf %135, %136 : vector<8x1xf32>
    %138 = vector.broadcast %137 : vector<8x1xf32> to vector<8x128xf32>
    %139 = arith.subf %131, %138 : vector<8x128xf32>
    %140 = arith.mulf %139, %139 : vector<8x128xf32>
    %cst_72 = arith.constant dense<0.000000e+00> : vector<8xf32>
    %141 = vector.multi_reduction <add>, %140, %cst_72 [1] : vector<8x128xf32> to vector<8xf32>
    %142 = vector.shape_cast %141 : vector<8xf32> to vector<8x1xf32>
    %cst_73 = arith.constant 1.280000e+02 : f32
    %143 = vector.broadcast %cst_73 : f32 to vector<8x1xf32>
    %144 = arith.divf %142, %143 : vector<8x1xf32>
    %145 = vector.broadcast %137 : vector<8x1xf32> to vector<8x128xf32>
    %146 = arith.subf %131, %145 : vector<8x128xf32>
    %cst_74 = arith.constant 9.99999997E-7 : f32
    %147 = vector.broadcast %cst_74 : f32 to vector<8x1xf32>
    %148 = arith.addf %144, %147 : vector<8x1xf32>
    %149 = math.rsqrt %148 : vector<8x1xf32>
    %150 = vector.broadcast %149 : vector<8x1xf32> to vector<8x128xf32>
    %151 = arith.mulf %146, %150 : vector<8x128xf32>
    %152 = vector.broadcast %132 : vector<1x128xf32> to vector<8x128xf32>
    %153 = arith.mulf %151, %152 : vector<8x128xf32>
    %154 = vector.broadcast %133 : vector<1x128xf32> to vector<8x128xf32>
    %155 = arith.addf %153, %154 : vector<8x128xf32>
    %cst_75 = arith.constant 0.000000e+00 : f32
    %156 = vector.broadcast %cst_75 : f32 to vector<10x128xf32>
    %c0_76 = arith.constant 0 : index
    %c0_77 = arith.constant 0 : index
    %157 = vector.load %arg22[%c0_76, %c0_77] : memref<10x128xf32, #tpu.memory_space<vmem>>, vector<10x128xf32>
    tpu.vector_store %arg22[%c0_76, %c0_77], %156 {strides = array<i32>} : memref<10x128xf32, #tpu.memory_space<vmem>>, vector<10x128xf32>,
    %c1_78 = arith.constant 1 : index
    %c0_79 = arith.constant 0 : index
    %158 = vector.load %arg22[%c1_78, %c0_79] : memref<10x128xf32, #tpu.memory_space<vmem>>, vector<8x128xf32>
    tpu.vector_store %arg22[%c1_78, %c0_79], %155 {strides = array<i32>} : memref<10x128xf32, #tpu.memory_space<vmem>>, vector<8x128xf32>,
    %c0_80 = arith.constant 0 : index
    %c0_81 = arith.constant 0 : index
    %159 = vector.load %arg22[%c0_80, %c0_81] : memref<10x128xf32, #tpu.memory_space<vmem>>, vector<8x128xf32>
    %c1_82 = arith.constant 1 : index
    %c0_83 = arith.constant 0 : index
    %160 = vector.load %arg22[%c1_82, %c0_83] : memref<10x128xf32, #tpu.memory_space<vmem>>, vector<8x128xf32>
    %c2_84 = arith.constant 2 : index
    %c0_85 = arith.constant 0 : index
    %161 = vector.load %arg22[%c2_84, %c0_85] : memref<10x128xf32, #tpu.memory_space<vmem>>, vector<8x128xf32>
    %162 = tpu.concatenate %159, %160, %161 in 1 : vector<8x128xf32>, vector<8x128xf32>, vector<8x128xf32> -> vector<8x384xf32>
    %c0_86 = arith.constant 0 : index
    %c0_87 = arith.constant 0 : index
    %163 = vector.load %arg17[%c0_86, %c0_87] : memref<384x128xf32, #tpu.memory_space<vmem>>, vector<384x128xf32>
    %cst_88 = arith.constant dense<0.000000e+00> : vector<8x128xf32>
    %164 = tpu.matmul %162, %163, %cst_88 {dimension_numbers = #tpu.dot_dimension_numbers<[1], [0], [0], [1], [0, 0, 1, 1], [], []>} : vector<8x384xf32>, vector<384x128xf32>, vector<8x128xf32> -> vector<8x128xf32>
    %c0_89 = arith.constant 0 : index
    %c0_90 = arith.constant 0 : index
    %165 = vector.load %arg18[%c0_89, %c0_90] : memref<1x128xf32, #tpu.memory_space<vmem>>, vector<1x128xf32>
    %166 = vector.broadcast %165 : vector<1x128xf32> to vector<8x128xf32>
    %167 = arith.addf %164, %166 : vector<8x128xf32>
    %cst_91 = arith.constant 0.000000e+00 : f32
    %168 = vector.broadcast %cst_91 : f32 to vector<8x128xf32>
    %169 = arith.cmpf oge, %167, %168 : vector<8x128xf32>
    %cst_92 = arith.constant 0.00999999977 : f32
    %170 = vector.broadcast %cst_92 : f32 to vector<8x128xf32>
    %171 = arith.mulf %170, %167 : vector<8x128xf32>
    %172 = arith.select %169, %167, %171 : vector<8x128xi1>, vector<8x128xf32>
    %c0_93 = arith.constant 0 : index
    %c0_94 = arith.constant 0 : index
    %173 = vector.load %arg19[%c0_93, %c0_94] : memref<128x1xf32, #tpu.memory_space<vmem>>, vector<128x1xf32>
    %cst_95 = arith.constant dense<0.000000e+00> : vector<8x1xf32>
    %174 = tpu.matmul %172, %173, %cst_95 {dimension_numbers = #tpu.dot_dimension_numbers<[1], [0], [0], [1], [0, 0, 1, 1], [], []>} : vector<8x128xf32>, vector<128x1xf32>, vector<8x1xf32> -> vector<8x1xf32>
    %c0_96 = arith.constant 0 : index
    %c0_97 = arith.constant 0 : index
    %175 = vector.load %arg20[%c0_96, %c0_97] : memref<1x1xf32, #tpu.memory_space<vmem>>, vector<1x1xf32>
    %176 = vector.broadcast %175 : vector<1x1xf32> to vector<8x1xf32>
    %177 = arith.addf %174, %176 : vector<8x1xf32>
    %c0_98 = arith.constant 0 : index
    %c0_99 = arith.constant 0 : index
    %c0_100 = arith.constant 0 : index
    %178 = vector.load %arg21[%c0_98, %c0_99, %c0_100] : memref<1x8x1xf32, #tpu.memory_space<vmem>>, vector<1x8x1xf32>
    %179 = vector.shape_cast %178 : vector<1x8x1xf32> to vector<8x1xf32>
    %180 = vector.shape_cast %177 : vector<8x1xf32> to vector<1x8x1xf32>
    tpu.vector_store %arg21[%c0_98, %c0_99, %c0_100], %180 {strides = array<i32>} : memref<1x8x1xf32, #tpu.memory_space<vmem>>, vector<1x8x1xf32>,
    return
  }
  func.func @transform_0(%arg0: i32) -> (i32, i32, i32) {
    %c0_i32 = arith.constant 0 : i32
    %c0_i32_0 = arith.constant 0 : i32
    %c0_i32_1 = arith.constant 0 : i32
    return %arg0, %c0_i32, %c0_i32_0 : i32, i32, i32
  }
  func.func @transform_1(%arg0: i32) -> (i32, i32, i32) {
    %c0_i32 = arith.constant 0 : i32
    %c0_i32_0 = arith.constant 0 : i32
    %c0_i32_1 = arith.constant 0 : i32
    return %arg0, %c0_i32, %c0_i32_0 : i32, i32, i32
  }
  func.func @transform_2(%arg0: i32) -> (i32, i32) {
    %c0_i32 = arith.constant 0 : i32
    %c0_i32_0 = arith.constant 0 : i32
    %c0_i32_1 = arith.constant 0 : i32
    return %c0_i32, %c0_i32_0 : i32, i32
  }
  func.func @transform_3(%arg0: i32) -> (i32, i32) {
    %c0_i32 = arith.constant 0 : i32
    %c0_i32_0 = arith.constant 0 : i32
    %c0_i32_1 = arith.constant 0 : i32
    return %c0_i32, %c0_i32_0 : i32, i32
  }
  func.func @transform_4(%arg0: i32) -> (i32, i32) {
    %c0_i32 = arith.constant 0 : i32
    %c0_i32_0 = arith.constant 0 : i32
    %c0_i32_1 = arith.constant 0 : i32
    return %c0_i32, %c0_i32_0 : i32, i32
  }
  func.func @transform_5(%arg0: i32) -> (i32, i32) {
    %c0_i32 = arith.constant 0 : i32
    %c0_i32_0 = arith.constant 0 : i32
    %c0_i32_1 = arith.constant 0 : i32
    return %c0_i32, %c0_i32_0 : i32, i32
  }
  func.func @transform_6(%arg0: i32) -> (i32, i32, i32) {
    %c0_i32 = arith.constant 0 : i32
    %c0_i32_0 = arith.constant 0 : i32
    %c0_i32_1 = arith.constant 0 : i32
    %c0_i32_2 = arith.constant 0 : i32
    return %c0_i32, %c0_i32_0, %c0_i32_1 : i32, i32, i32
  }
  func.func @transform_7(%arg0: i32) -> (i32, i32) {
    %c0_i32 = arith.constant 0 : i32
    %c0_i32_0 = arith.constant 0 : i32
    %c0_i32_1 = arith.constant 0 : i32
    return %c0_i32, %c0_i32_0 : i32, i32
  }
  func.func @transform_8(%arg0: i32) -> (i32, i32) {
    %c0_i32 = arith.constant 0 : i32
    %c0_i32_0 = arith.constant 0 : i32
    %c0_i32_1 = arith.constant 0 : i32
    return %c0_i32, %c0_i32_0 : i32, i32
  }
  func.func @transform_9(%arg0: i32) -> (i32, i32) {
    %c0_i32 = arith.constant 0 : i32
    %c0_i32_0 = arith.constant 0 : i32
    %c0_i32_1 = arith.constant 0 : i32
    return %c0_i32, %c0_i32_0 : i32, i32
  }
  func.func @transform_10(%arg0: i32) -> (i32, i32) {
    %c0_i32 = arith.constant 0 : i32
    %c0_i32_0 = arith.constant 0 : i32
    %c0_i32_1 = arith.constant 0 : i32
    return %c0_i32, %c0_i32_0 : i32, i32
  }
  func.func @transform_11(%arg0: i32) -> (i32, i32) {
    %c0_i32 = arith.constant 0 : i32
    %c0_i32_0 = arith.constant 0 : i32
    %c0_i32_1 = arith.constant 0 : i32
    return %c0_i32, %c0_i32_0 : i32, i32
  }
  func.func @transform_12(%arg0: i32) -> (i32, i32) {
    %c0_i32 = arith.constant 0 : i32
    %c0_i32_0 = arith.constant 0 : i32
    %c0_i32_1 = arith.constant 0 : i32
    return %c0_i32, %c0_i32_0 : i32, i32
  }
  func.func @transform_13(%arg0: i32) -> (i32, i32) {
    %c0_i32 = arith.constant 0 : i32
    %c0_i32_0 = arith.constant 0 : i32
    %c0_i32_1 = arith.constant 0 : i32
    return %c0_i32, %c0_i32_0 : i32, i32
  }
  func.func @transform_14(%arg0: i32) -> (i32, i32) {
    %c0_i32 = arith.constant 0 : i32
    %c0_i32_0 = arith.constant 0 : i32
    %c0_i32_1 = arith.constant 0 : i32
    return %c0_i32, %c0_i32_0 : i32, i32
  }
  func.func @transform_15(%arg0: i32) -> (i32, i32) {
    %c0_i32 = arith.constant 0 : i32
    %c0_i32_0 = arith.constant 0 : i32
    %c0_i32_1 = arith.constant 0 : i32
    return %c0_i32, %c0_i32_0 : i32, i32
  }
  func.func @transform_16(%arg0: i32) -> (i32, i32) {
    %c0_i32 = arith.constant 0 : i32
    %c0_i32_0 = arith.constant 0 : i32
    %c0_i32_1 = arith.constant 0 : i32
    return %c0_i32, %c0_i32_0 : i32, i32
  }
  func.func @transform_17(%arg0: i32) -> (i32, i32) {
    %c0_i32 = arith.constant 0 : i32
    %c0_i32_0 = arith.constant 0 : i32
    %c0_i32_1 = arith.constant 0 : i32
    return %c0_i32, %c0_i32_0 : i32, i32
  }
  func.func @transform_18(%arg0: i32) -> (i32, i32) {
    %c0_i32 = arith.constant 0 : i32
    %c0_i32_0 = arith.constant 0 : i32
    %c0_i32_1 = arith.constant 0 : i32
    return %c0_i32, %c0_i32_0 : i32, i32
  }
  func.func @transform_19(%arg0: i32) -> (i32, i32) {
    %c0_i32 = arith.constant 0 : i32
    %c0_i32_0 = arith.constant 0 : i32
    %c0_i32_1 = arith.constant 0 : i32
    return %c0_i32, %c0_i32_0 : i32, i32
  }
  func.func @transform_20(%arg0: i32) -> (i32, i32, i32) {
    %c0_i32 = arith.constant 0 : i32
    %c0_i32_0 = arith.constant 0 : i32
    %c0_i32_1 = arith.constant 0 : i32
    return %arg0, %c0_i32, %c0_i32_0 : i32, i32, i32
  }
}

</mosaic_0001>

<bundles_post_ra>
// kernel: pitch_model_forward.2
= control target key start
LH: loop header
LB: loop body
LE: loop exit
PB: predicated region body
PF: predicated region fallthrough
CT: control target
= control target key end

     0   :  { %19 = vsyncpa [#allocation5], 0  ;;  %s3139_s0 = inlined_call_operand.vmem [shape: f32[2,16,32], index: 0, kind: input, shape index: {}]   ;;  %s3140_s1 = inlined_call_operand.vmem [shape: f32[2,1,128], index: 1, kind: input, shape index: {}]   ;;  %s3141_s2 = inlined_call_operand.hbm [shape: f32[5,32,256], index: 2, kind: input, shape index: {}]   ;;  %s3142_s3 = inlined_call_operand.vmem [shape: f32[1,256], index: 3, kind: input, shape index: {}]   ;;  %s3143_s4 = inlined_call_operand.hbm [shape: f32[640,128], index: 4, kind: input, shape index: {}]   ;;  %s3144_s5 = inlined_call_operand.vmem [shape: f32[1,128], index: 5, kind: input, shape index: {}]   ;;  %s3145_s6 = inlined_call_operand.hbm [shape: f32[640,128], index: 6, kind: input, shape index: {}]   ;;  %s3146_s7 = inlined_call_operand.vmem [shape: f32[1,128], index: 7, kind: input, shape index: {}]   ;;  %s3147_s8 = inlined_call_operand.vmem [shape: f32[128,128], index: 8, kind: input, shape index: {}]   ;;  %s3148_s9 = inlined_call_operand.vmem [shape: f32[1,128], index: 9, kind: input, shape index: {}]   ;;  %s3149_s10 = inlined_call_operand.hbm [shape: f32[256,128], index: 10, kind: input, shape index: {}]   ;;  %s3150_s11 = inlined_call_operand.vmem [shape: f32[1,128], index: 11, kind: input, shape index: {}]   ;;  %s3151_s12 = inlined_call_operand.vmem [shape: f32[2,16,128], index: 12, kind: output, shape index: {0}]   ;;  %s3152_s13 = inlined_call_operand.vmem [shape: f32[2,1,128], index: 13, kind: output, shape index: {1}]  }
   0x1   :  { %20 = vsyncpa [#allocation7], 0 }
   0x2   :  { %21 = vsyncpa [#allocation10], 0  ;;  %s2833_s25 = smov 0  }
   0x3 LB: > { %s2752_s26 = smov [#allocation6]   ;;  %s2839_s28 = sadd.s32 4294967295, %s2750_s25   ;;  %s2750_s25 = sphi %s2833_s25, %s27_s25  }
   0x4   : > { %s374_s27 = sshll.u32 %s2752_s26, 4  ;;  %p2195_p0 = scmp.ge.s32.totalorder %s2750_s25, 1  ;;  %s375_s27 = int_to_ptr.vmem [resolvable:$true] %s374_s27 }
   0x5   : > { %p346_p1 = scmp.lt.s32.totalorder %s2750_s25, 3  ;;  %p2601_p2 = scmp.eq.s32.totalorder %s2839_s28, 0 }
   0x6   : > { %s2753_s30 = smov [#allocation4]   ;;  %s2754_s16 = smov [#allocation8]  }
   0x7   : > { %p2844_p3 = pnand %p2195_p0, %p346_p1  ;;  %s358_s14 = sshll.u32 %s2753_s30, 4  ;;  %s2850_s14 = int_to_ptr.vmem [resolvable:$true] %s358_s14 }
   0x8   : > { %s2858_s17 = sshll.u32 %s2754_s16, 4  ;;  %s2639_s18 = scalar_lea.vmem %s375_s27, 10240  ;;  %s391_s17 = int_to_ptr.vmem [resolvable:$true] %s2858_s17 }
   0x9   : > { %p2588_p4 = pneg %p2844_p3  ;;  %p2640_p7 = scmp.ne.s32.totalorder %s375_s27, %s2639_s18 }
   0xa   : > { %p2647_p10 = scmp.lt.s32.totalorder %s375_s27, %s375_s27  ;;  %p2648_p11 = scmp.lt.s32.totalorder %s2639_s18, %s2639_s18 }
   0xb   : > { %p2854_p5 = pnand %p2601_p2, %p2588_p4 }
   0xc   : > { %p2649_p12 = por %p2648_p11, %p2647_p10 }
   0xd   : > { %p2630_p6 = pneg %p2854_p5 }
   0xf   : > { %p2642_p8 = pnand %p2640_p7, %p2630_p6 }
  0x11   : > { %p2643_p9 = pneg %p2642_p8 }
  0x13   : > { %p2650_p13 = pnand %p2649_p12, %p2643_p9 }
  0x15   : > { %2653 = shalt.err (!%p2650_p13)
}
  0x16   : > { %s2755_s19 = smov 128   ;;  %s2756_s20 = smov 8  }
  0x17   : > { %2594 = dma.hbm_to_vmem [thread:$0]  (!%p2854_p5), %s3143_s4, 10240, %s375_s27, [#allocation7], %s2755_s19, %s2755_s19, %s2756_s20  }
  0x18   : > { %s2665_s23 = scalar_lea.vmem %s2850_s14, 5120  ;;  %p2673_p7 = scmp.lt.s32.totalorder %s2850_s14, %s2850_s14 }
  0x19   : > { %p2666_p0 = scmp.ne.s32.totalorder %s2850_s14, %s2665_s23  ;;  %p2674_p8 = scmp.lt.s32.totalorder %s2665_s23, %s2665_s23 }
  0x1b   : > { %p2668_p1 = pnand %p2666_p0, %p2630_p6  ;;  %p2675_p9 = por %p2674_p8, %p2673_p7 }
  0x1d   : > { %p2669_p4 = pneg %p2668_p1 }
  0x1f   : > { %p2676_p10 = pnand %p2675_p9, %p2669_p4 }
  0x21   : > { %2679 = shalt.err (!%p2676_p10)
}
  0x22   : > { %s2757_s24 = smov 256   ;;  %s2758_s26 = smov 16  }
  0x23   : > { %2591 = dma.hbm_to_vmem [thread:$0]  (!%p2854_p5), %s3141_s2, 5120, %s2850_s14, [#allocation5], %s2757_s24, %s2757_s24, %s2758_s26  }
  0x24   : > { %s2759_s16 = smov [#allocation9]   ;;  %s2691_s21 = scalar_lea.vmem %s391_s17, 10240 }
  0x25   : > { %s412_s18 = sshll.u32 %s2759_s16, 4  ;;  %p2692_p11 = scmp.ne.s32.totalorder %s391_s17, %s2691_s21  ;;  %s413_s18 = int_to_ptr.vmem [resolvable:$true] %s412_s18 }
  0x26   : > { %p2699_p0 = scmp.lt.s32.totalorder %s391_s17, %s391_s17  ;;  %p2700_p1 = scmp.lt.s32.totalorder %s2691_s21, %s2691_s21 }
  0x27   : > { %p2694_p12 = pnand %p2692_p11, %p2630_p6 }
  0x28   : > { %p2701_p4 = por %p2700_p1, %p2699_p0 }
  0x29   : > { %p2695_p13 = pneg %p2694_p12 }
  0x2b   : > { %p2702_p7 = pnand %p2701_p4, %p2695_p13 }
  0x2d   : > { %2705 = shalt.err (!%p2702_p7)
}
  0x2e   : > { %2597 = dma.hbm_to_vmem [thread:$0]  (!%p2854_p5), %s3145_s6, 10240, %s391_s17, [#allocation7], %s2755_s19, %s2755_s19, %s2756_s20  }
  0x2f   : > { %s2717_s23 = scalar_lea.vmem %s413_s18, 4096  ;;  %p2725_p11 = scmp.lt.s32.totalorder %s413_s18, %s413_s18 }
  0x30   : > { %p2718_p8 = scmp.ne.s32.totalorder %s413_s18, %s2717_s23  ;;  %p2726_p12 = scmp.lt.s32.totalorder %s2717_s23, %s2717_s23 }
  0x32   : > { %p2720_p9 = pnand %p2718_p8, %p2630_p6  ;;  %p2727_p13 = por %p2726_p12, %p2725_p11 }
  0x34   : > { %p2721_p10 = pneg %p2720_p9 }
  0x36   : > { %p2728_p0 = pnand %p2727_p13, %p2721_p10 }
  0x38   : > { %2731 = shalt.err (!%p2728_p0)
}
  0x39   : > { %2600 = dma.hbm_to_vmem [thread:$0]  (!%p2854_p5), %s3149_s10, 4096, %s413_s18, [#allocation10], %s2755_s19, %s2755_s19, %s2756_s20  }
  0x3a   : > { %445 = sbr.rel (%p2844_p3) target bundleno = 994 (0x3e2), region = 68 }
  0x3f   : > { %2737 = dma.done.wait (%p2601_p2), [#allocation5], 5120  }
  0x40   : > { %2739 = vsyncadd (%p2601_p2), [#allocation5], 4294962176 }
  0x41   : > { %2741 = dma.done.wait (%p2601_p2), [#allocation7], 20480  }
  0x42   : > { %2743 = vsyncadd (%p2601_p2), [#allocation7], 4294946816 }
  0x43   : > { %2745 = dma.done.wait (%p2601_p2), [#allocation10], 4096  }
  0x44   : > { %2747 = vsyncadd (%p2601_p2), [#allocation10], 4294963200  ;;  %p507_p3 = scmp.lt.s32.totalorder %s2839_s28, 1  ;;  %vm523_vm0 = vcmask 261120   ;;  %vm526_vm1 = vcmask 257024   ;;  %v2760_v0 = vmov 0.0  }
  0x45   : > { %623 = vmatprep.mubr.f32.mxu0 %v2760_v0  ;;  %1033 = vst [vmem:[#allocation3 + $0x28] sm:$0xff] %v2760_v0  ;;  %1034 = vst [vmem:[#allocation3 + $0x10] sm:$0xff] %v2760_v0  ;;  %706 = vmatprep.mubr.f32.mxu1 %v2760_v0  ;;  %v552_v1 = vld [vmem:[#allocation4 + $0x78] sm:$0xff]  ;;  %v551_v3 = vld [vmem:[#allocation4 + $0x70] sm:$0xff]  ;;  %vm1043_vm2 = vcmask 1041408   ;;  %vm1075_vm3 = vcmask 1046528  }
  0x46   : > { %1037 = vst [vmem:[#allocation3 + $0x18] sm:$0xf] %v2760_v0  ;;  %1038 = vst [vmem:[#allocation3 + $0x20] sm:$0xf] %v2760_v0  ;;  %s3156_s28 = smov (!%p507_p3, %s2839_s28), 1  ;;  %v541_v2 = vld [vmem:[#allocation4 + $0x38] sm:$0xff]  ;;  %583 = vmatprep.subr.mxu0 %v552_v1 }
  0x47   : > { %524 = vst.msk [vmem:[#allocation2] sm:$0xff] %vm523_vm0, %v2760_v0  ;;  %525 = vst.msk [vmem:[#allocation2 + $0x8] sm:$0xff] %vm523_vm0, %v2760_v0  ;;  %s2225_s29 = sshll.u32 %s3156_s28, 4  ;;  %666 = vmatprep.subr.mxu1 %v541_v2  ;;  %v540_v4 = vld [vmem:[#allocation4 + $0x30] sm:$0xff]  ;;  %v550_v5 = vld [vmem:[#allocation4 + $0x68] sm:$0xff]  ;;  %584 = vmatpush1.msra.mxu0 %v551_v3  ;;  %vm1095_vm4 = vcmask 1044480   ;;  %s514_s26 = scalar_lea.vmem %s3140_s1, %s3156_s28 }
  0x48   : > { %527 = vst.msk [vmem:[#allocation2 + $0x10] sm:$0xf] %vm526_vm1, %v2760_v0  ;;  %v539_v6 = vld [vmem:[#allocation4 + $0x28] sm:$0xff]  ;;  %667 = vmatpush1.msra.mxu1 %v540_v4  ;;  %v549_v7 = vld [vmem:[#allocation4 + $0x60] sm:$0xff]  ;;  %v548_v9 = vld [vmem:[#allocation4 + $0x58] sm:$0xff]  ;;  %s511_s19 = scalar_lea.vmem %s3139_s0, %s2225_s29  ;;  %585 = vmatprep.subr.mxu0 %v550_v5  ;;  %vm1085_vm5 = vcmask 1045504   ;;  %s519_s16 = scalar_lea.vmem %s3151_s12, %s2225_s29 }
  0x49   : > { %v538_v8 = vld [vmem:[#allocation4 + $0x20] sm:$0xff]  ;;  %668 = vmatprep.subr.mxu1 %v539_v6  ;;  %v537_v10 = vld [vmem:[#allocation4 + $0x18] sm:$0xff]  ;;  %v547_v11 = vld [vmem:[#allocation4 + $0x50] sm:$0xff]  ;;  %586 = vmatpush1.msra.mxu0 %v549_v7  ;;  %vm1105_vm6 = vcmask 1043456   ;;  %vm1788_vm7 = vcmask 130048   ;;  %vm2762_vm8 = vmmov 0   ;;  %s522_s23 = scalar_lea.vmem %s3152_s13, %s3156_s28 }
  0x4a   : > { %v536_v12 = vld [vmem:[#allocation4 + $0x10] sm:$0xff]  ;;  %669 = vmatpush1.msra.mxu1 %v538_v8  ;;  %v546_v13 = vld [vmem:[#allocation4 + $0x48] sm:$0xff]  ;;  %587 = vmatprep.subr.mxu0 %v548_v9  ;;  %v545_v15 = vld [vmem:[#allocation4 + $0x40] sm:$0xff] }
  0x4b   : > { %v535_v14 = vld [vmem:[#allocation4 + $0x8] sm:$0xff]  ;;  %670 = vmatprep.subr.mxu1 %v537_v10  ;;  %v534_v16 = vld [vmem:[#allocation4] sm:$0xff]  ;;  %v528_v17 = vld [vmem:[%s511_s19] sm:$0xff]  ;;  %588 = vmatpush1.msra.mxu0 %v547_v11 }
  0x4c   : > { %671 = vmatpush1.msra.mxu1 %v536_v12  ;;  %530 = vst.msk [vmem:[#allocation2 + $0x2] sm:$0xff] %vm523_vm0, %v528_v17  ;;  %v729_v18 = vld [vmem:[#allocation4 + $0xb8] sm:$0xff]  ;;  %589 = vmatprep.subr.mxu0 %v546_v13  ;;  %v529_v20 = vld [vmem:[%s511_s19 + $0x8] sm:$0xff]  ;;  %v728_v21 = vld [vmem:[#allocation4 + $0xb0] sm:$0xff] }
  0x4d   : > { %v827_v19 = vld [vmem:[#allocation4 + $0xf8] sm:$0xff]  ;;  %672 = vmatprep.subr.mxu1 %v535_v14  ;;  %590 = vmatpush1.msra.mxu0 %v545_v15  ;;  %531 = vst.msk [vmem:[#allocation2 + $0xa] sm:$0xff] %vm523_vm0, %v529_v20  ;;  %v727_v24 = vld [vmem:[#allocation4 + $0xa8] sm:$0xff]  ;;  %v726_v25 = vld [vmem:[#allocation4 + $0xa0] sm:$0xff] }
  0x4e   : > { %673 = vmatpush1.msra.mxu1 %v534_v16  ;;  %760 = vmatprep.subr.mxu0 %v729_v18  ;;  %v826_v26 = vld [vmem:[#allocation4 + $0xf0] sm:$0xff]  ;;  %v725_v29 = vld [vmem:[#allocation4 + $0x98] sm:$0xff]  ;;  %v825_v30 = vld [vmem:[#allocation4 + $0xe8] sm:$0xff] }
  0x4f   : > { %858 = vmatprep.subr.mxu1 %v827_v19  ;;  %v724_v31 = vld [vmem:[#allocation4 + $0x90] sm:$0xff]  ;;  %v824_v32 = vld [vmem:[#allocation4 + $0xe0] sm:$0xff]  ;;  %v723_v33 = vld [vmem:[#allocation4 + $0x88] sm:$0xff] }
  0x50   : > { %v823_v34 = vld [vmem:[#allocation4 + $0xd8] sm:$0xff]  ;;  %v722_v35 = vld [vmem:[#allocation4 + $0x80] sm:$0xff]  ;;  %v822_v36 = vld [vmem:[#allocation4 + $0xd0] sm:$0xff] }
  0x51   : > { %v821_v38 = vld [vmem:[#allocation4 + $0xc8] sm:$0xff]  ;;  %v925_v39 = vld [vmem:[#allocation4 + $0x138] sm:$0xff]  ;;  %v820_v40 = vld [vmem:[#allocation4 + $0xc0] sm:$0xff] }
  0x52   : > { %v924_v41 = vld [vmem:[#allocation4 + $0x130] sm:$0xff]  ;;  %v923_v43 = vld [vmem:[#allocation4 + $0x128] sm:$0xff]  ;;  %v922_v44 = vld [vmem:[#allocation4 + $0x120] sm:$0xff] }
  0x53   : > { %v542_v22 = vld [vmem:[#allocation2 + $0x1] sm:$0xff]  ;;  %v920_v47 = vld [vmem:[#allocation4 + $0x110] sm:$0xff]  ;;  %v919_v49 = vld [vmem:[#allocation4 + $0x108] sm:$0xff] }
  0x54   : > { %v532_v23 = vld [vmem:[#allocation2] sm:$0xff]  ;;  %2210 = vmatmul.mubr.msk.f32.vlgmr.msra.gmra.mxu0 %vm523_vm0, %v542_v22  ;;  %v543_v27 = vld [vmem:[#allocation2 + $0x9] sm:$0xff]  ;;  %v1190_v57 = vld [vmem:[#allocation6 + $0xf0] sm:$0xff] }
  0x55   : > { %2212 = vmatmul.mubr.msk.f32.vlgmr.msra.gmra.mxu1 %vm523_vm0, %v532_v23  ;;  %761 = vmatpush1.msra.mxu0 %v728_v21  ;;  %v533_v28 = vld [vmem:[#allocation2 + $0x8] sm:$0xff]  ;;  %v921_v46 = vld [vmem:[#allocation4 + $0x118] sm:$0xff]  ;;  %v1222_v58 = vld [vmem:[#allocation6 + $0x1f0] sm:$0xff] }
  0x56   : > { %629 = vmatprep.mubr.f32.mxu0 %v2760_v0  ;;  %762 = vmatprep.subr.mxu0 %v727_v24  ;;  %v719_v37 = vld [vmem:[#allocation2 + $0x2] sm:$0xff]  ;;  %v720_v45 = vld [vmem:[#allocation2 + $0xa] sm:$0xff]  ;;  %v1174_v59 = vld [vmem:[#allocation6 + $0x70] sm:$0xff] }
  0x57   : > { %712 = vmatprep.mubr.f32.mxu1 %v2760_v0  ;;  %763 = vmatpush1.msra.mxu0 %v726_v25  ;;  %v817_v42 = vld [vmem:[#allocation2 + $0x3] sm:$0xff]  ;;  %v818_v48 = vld [vmem:[#allocation2 + $0xb] sm:$0xff]  ;;  %v1206_v60 = vld [vmem:[#allocation6 + $0x170] sm:$0xff] }
  0x58   : > { %859 = vmatpush1.msra.mxu1 %v826_v26  ;;  %2211 = vmatmul.mubr.msk.f32.gmra.mxu0 %vm523_vm0, %v543_v27  ;;  %v918_v50 = vld [vmem:[#allocation4 + $0x100] sm:$0xff]  ;;  %v1191_v53 = vld [vmem:[#allocation6 + $0xf8] sm:$0xff]  ;;  %v1189_v61 = vld [vmem:[#allocation6 + $0xe8] sm:$0xff] }
  0x59   : > { %2213 = vmatmul.mubr.msk.f32.gmra.mxu1 %vm523_vm0, %v533_v28  ;;  %764 = vmatprep.subr.mxu0 %v725_v29  ;;  %v915_v51 = vld [vmem:[#allocation2 + $0x4] sm:$0xff]  ;;  %v916_v52 = vld [vmem:[#allocation2 + $0xc] sm:$0xff]  ;;  %v1186_v10 = vld [vmem:[#allocation6 + $0xd0] sm:$0xff] }
  0x5a   : > { %860 = vmatprep.subr.mxu1 %v825_v30  ;;  %765 = vmatpush1.msra.mxu0 %v724_v31  ;;  %v1223_v54 = vld [vmem:[#allocation6 + $0x1f8] sm:$0xff]  ;;  %v1221_v62 = vld [vmem:[#allocation6 + $0x1e8] sm:$0xff]  ;;  %v1188_v2 = vld [vmem:[#allocation6 + $0xe0] sm:$0xff] }
  0x5b   : > { %861 = vmatpush1.msra.mxu1 %v824_v32  ;;  %766 = vmatprep.subr.mxu0 %v723_v33  ;;  %v1175_v55 = vld [vmem:[#allocation6 + $0x78] sm:$0xff]  ;;  %v1173_v63 = vld [vmem:[#allocation6 + $0x68] sm:$0xff]  ;;  %v1220_v3 = vld [vmem:[#allocation6 + $0x1e0] sm:$0xff] }
  0x5c   : > { %862 = vmatprep.subr.mxu1 %v823_v34  ;;  %767 = vmatpush1.msra.mxu0 %v722_v35  ;;  %v1207_v56 = vld [vmem:[#allocation6 + $0x178] sm:$0xff]  ;;  %v1205_v1 = vld [vmem:[#allocation6 + $0x168] sm:$0xff]  ;;  %v1172_v4 = vld [vmem:[#allocation6 + $0x60] sm:$0xff] }
  0x5d   : > { %800 = vmatprep.mubr.f32.mxu0 %v2760_v0  ;;  %863 = vmatpush1.msra.mxu1 %v822_v36  ;;  %v1204_v5 = vld [vmem:[#allocation6 + $0x160] sm:$0xff]  ;;  %v1187_v6 = vld [vmem:[#allocation6 + $0xd8] sm:$0xff]  ;;  %v1218_v11 = vld [vmem:[#allocation6 + $0x1d0] sm:$0xff] }
  0x5e   : > { %2214 = vmatmul.mubr.msk.f32.vlgmr.msra.gmra.mxu0 %vm523_vm0, %v719_v37  ;;  %864 = vmatprep.subr.mxu1 %v821_v38  ;;  %v1219_v7 = vld [vmem:[#allocation6 + $0x1d8] sm:$0xff]  ;;  %v1170_v12 = vld [vmem:[#allocation6 + $0x50] sm:$0xff]  ;;  %v1185_v14 = vld [vmem:[#allocation6 + $0xc8] sm:$0xff] }
  0x5f   : > { %956 = vmatprep.subr.mxu0 %v925_v39  ;;  %865 = vmatpush1.msra.mxu1 %v820_v40  ;;  %v1171_v8 = vld [vmem:[#allocation6 + $0x58] sm:$0xff]  ;;  %v1202_v13 = vld [vmem:[#allocation6 + $0x150] sm:$0xff]  ;;  %v1217_v15 = vld [vmem:[#allocation6 + $0x1c8] sm:$0xff] }
  0x60   : > { %898 = vmatprep.mubr.f32.mxu1 %v2760_v0  ;;  %957 = vmatpush1.msra.mxu0 %v924_v41  ;;  %v1203_v9 = vld [vmem:[#allocation6 + $0x158] sm:$0xff]  ;;  %v1169_v16 = vld [vmem:[#allocation6 + $0x48] sm:$0xff]  ;;  %v1184_v18 = vld [vmem:[#allocation6 + $0xc0] sm:$0xff] }
  0x61   : > { %2216 = vmatmul.mubr.msk.f32.vlgmr.msra.gmra.mxu1 %vm523_vm0, %v817_v42  ;;  %958 = vmatprep.subr.mxu0 %v923_v43  ;;  %v1201_v17 = vld [vmem:[#allocation6 + $0x148] sm:$0xff]  ;;  %v1216_v19 = vld [vmem:[#allocation6 + $0x1c0] sm:$0xff]  ;;  %v1183_v22 = vld [vmem:[#allocation6 + $0xb8] sm:$0xff] }
  0x62   : > { %806 = vmatprep.mubr.f32.mxu0 %v2760_v0  ;;  %959 = vmatpush1.msra.mxu0 %v922_v44  ;;  %v1168_v20 = vld [vmem:[#allocation6 + $0x40] sm:$0xff]  ;;  %v1215_v23 = vld [vmem:[#allocation6 + $0x1b8] sm:$0xff]  ;;  %v1182_v26 = vld [vmem:[#allocation6 + $0xb0] sm:$0xff] }
  0x63   : > { %904 = vmatprep.mubr.f32.mxu1 %v2760_v0  ;;  %2215 = vmatmul.mubr.msk.f32.gmra.mxu0 %vm523_vm0, %v720_v45  ;;  %v1200_v21 = vld [vmem:[#allocation6 + $0x140] sm:$0xff]  ;;  %v1167_v24 = vld [vmem:[#allocation6 + $0x38] sm:$0xff]  ;;  %v1214_v27 = vld [vmem:[#allocation6 + $0x1b0] sm:$0xff] }
  0x64   : > { %960 = vmatprep.subr.mxu0 %v921_v46  ;;  %996 = vmatprep.mubr.f32.mxu0 %v2760_v0  ;;  %v1199_v25 = vld [vmem:[#allocation6 + $0x138] sm:$0xff]  ;;  %v1166_v28 = vld [vmem:[#allocation6 + $0x30] sm:$0xff]  ;;  %v1181_v30 = vld [vmem:[#allocation6 + $0xa8] sm:$0xff] }
  0x65   : > { %961 = vmatpush1.msra.mxu0 %v920_v47  ;;  %2217 = vmatmul.mubr.msk.f32.gmra.mxu1 %vm523_vm0, %v818_v48  ;;  %v1198_v29 = vld [vmem:[#allocation6 + $0x130] sm:$0xff]  ;;  %v1213_v31 = vld [vmem:[#allocation6 + $0x1a8] sm:$0xff]  ;;  %v1180_v34 = vld [vmem:[#allocation6 + $0xa0] sm:$0xff] }
  0x66   : > { %962 = vmatprep.subr.mxu0 %v919_v49  ;;  %2227 = vmatprep.subr.mxu1 %v1191_v53  ;;  %v1165_v32 = vld [vmem:[#allocation6 + $0x28] sm:$0xff]  ;;  %v1212_v35 = vld [vmem:[#allocation6 + $0x1a0] sm:$0xff]  ;;  %v1179_v38 = vld [vmem:[#allocation6 + $0x98] sm:$0xff] }
  0x67   : > { %963 = vmatpush1.msra.mxu0 %v918_v50  ;;  %2228 = vmatpush3.msra.mxu1 %v1175_v55  ;;  %v1197_v33 = vld [vmem:[#allocation6 + $0x128] sm:$0xff]  ;;  %v1164_v36 = vld [vmem:[#allocation6 + $0x20] sm:$0xff]  ;;  %v1211_v39 = vld [vmem:[#allocation6 + $0x198] sm:$0xff] }
  0x68   : > { %2218 = vmatmul.mubr.msk.f32.vlgmr.msra.gmra.mxu0 %vm523_vm0, %v915_v51  ;;  %2265 = vmatprep.subr.mxu0 %v1223_v54  ;;  %v1196_v37 = vld [vmem:[#allocation6 + $0x120] sm:$0xff]  ;;  %v1163_v40 = vld [vmem:[#allocation6 + $0x18] sm:$0xff]  ;;  %v1178_v42 = vld [vmem:[#allocation6 + $0x90] sm:$0xff] }
  0x69   : > { %1002 = vmatprep.mubr.f32.mxu0 %v2760_v0  ;;  %2266 = vmatpush3.msra.mxu0 %v1207_v56  ;;  %v1195_v41 = vld [vmem:[#allocation6 + $0x118] sm:$0xff]  ;;  %v1210_v43 = vld [vmem:[#allocation6 + $0x190] sm:$0xff]  ;;  %v1177_v46 = vld [vmem:[#allocation6 + $0x88] sm:$0xff] }
  0x6a   : > { %2229 = vmatprep.subr.mxu1 %v1190_v57  ;;  %2267 = vmatprep.subr.mxu0 %v1222_v58  ;;  %v1162_v44 = vld [vmem:[#allocation6 + $0x10] sm:$0xff]  ;;  %v1209_v47 = vld [vmem:[#allocation6 + $0x188] sm:$0xff]  ;;  %v1176_v50 = vld [vmem:[#allocation6 + $0x80] sm:$0xff] }
  0x6b   : > { %2230 = vmatpush3.msra.mxu1 %v1174_v59  ;;  %2268 = vmatpush3.msra.mxu0 %v1206_v60  ;;  %v1194_v45 = vld [vmem:[#allocation6 + $0x110] sm:$0xff]  ;;  %v1161_v48 = vld [vmem:[#allocation6 + $0x8] sm:$0xff]  ;;  %v1208_v51 = vld [vmem:[#allocation6 + $0x180] sm:$0xff] }
  0x6c   : > { %2219 = vmatmul.mubr.msk.f32.gmra.mxu0 %vm523_vm0, %v916_v52  ;;  %2231 = vmatprep.subr.mxu1 %v1189_v61  ;;  %v1193_v49 = vld [vmem:[#allocation6 + $0x108] sm:$0xff]  ;;  %v1160_v52 = vld [vmem:[#allocation6] sm:$0xff]  ;;  %v2964_v54 = vld [vmem:[#allocation6 + $0x278] sm:$0xff] }
  0x6d   : > { %2269 = vmatprep.subr.mxu0 %v1221_v62  ;;  %2232 = vmatpush3.msra.mxu1 %v1173_v63  ;;  %v1192_v53 = vld [vmem:[#allocation6 + $0x100] sm:$0xff]  ;;  %v1505_v55 = vld [vmem:[#allocation8 + $0xf8] sm:$0xff]  ;;  %v1015_v63 = vlaneseq }
  0x6e   : > { %2270 = vmatpush3.msra.mxu0 %v1205_v1  ;;  %2233 = vmatprep.subr.mxu1 %v1188_v2 }
  0x6f   : > { %2271 = vmatprep.subr.mxu0 %v1220_v3  ;;  %2234 = vmatpush3.msra.mxu1 %v1172_v4  ;;  %v2967_v3 = vshrl.u32 %v1015_v63, 7 }
  0x70   : > { %2272 = vmatpush3.msra.mxu0 %v1204_v5  ;;  %2235 = vmatprep.subr.mxu1 %v1187_v6 }
  0x71   : > { %2273 = vmatprep.subr.mxu0 %v1219_v7  ;;  %2236 = vmatpush3.msra.mxu1 %v1171_v8 }
  0x72   : > { %2274 = vmatpush3.msra.mxu0 %v1203_v9  ;;  %2237 = vmatprep.subr.mxu1 %v1186_v10  ;;  %v1017_v10 = vsub.s32 0, %v2967_v3 }
  0x73   : > { %2275 = vmatprep.subr.mxu0 %v1218_v11  ;;  %2238 = vmatpush3.msra.mxu1 %v1170_v12  ;;  %v1013_v12 = vld [vmem:[%s3142_s3] sm:$0x3] }
  0x74   : > { %2276 = vmatpush3.msra.mxu0 %v1202_v13  ;;  %2239 = vmatprep.subr.mxu1 %v1185_v14 }
  0x75   : > { %2277 = vmatprep.subr.mxu0 %v1217_v15  ;;  %2240 = vmatpush3.msra.mxu1 %v1169_v16  ;;  %v1021_v15 = vsub.s32 1, %v2967_v3 }
  0x76   : > { %2278 = vmatpush3.msra.mxu0 %v1201_v17  ;;  %2241 = vmatprep.subr.mxu1 %v1184_v18 }
  0x77   : > { %2279 = vmatprep.subr.mxu0 %v1216_v19  ;;  %2242 = vmatpush3.msra.mxu1 %v1168_v20 }
  0x78   : > { %2280 = vmatpush3.msra.mxu0 %v1200_v21  ;;  %2243 = vmatprep.subr.mxu1 %v1183_v22  ;;  %v1018_v21 = vrot.slane %v1013_v12, %v1017_v10 }
  0x79   : > { %2281 = vmatprep.subr.mxu0 %v1215_v23  ;;  %2244 = vmatpush3.msra.mxu1 %v1167_v24 }
  0x7a   : > { %2282 = vmatpush3.msra.mxu0 %v1199_v25  ;;  %2245 = vmatprep.subr.mxu1 %v1182_v26  ;;  %v1022_v26 = vrot.slane %v1013_v12, %v1021_v15 }
  0x7b   : > { %2283 = vmatprep.subr.mxu0 %v1214_v27  ;;  %2246 = vmatpush3.msra.mxu1 %v1166_v28 }
  0x7c   : > { %2284 = vmatpush3.msra.mxu0 %v1198_v29  ;;  %2247 = vmatprep.subr.mxu1 %v1181_v30 }
  0x7d   : > { %2285 = vmatprep.subr.mxu0 %v1213_v31  ;;  %2248 = vmatpush3.msra.mxu1 %v1165_v32 }
  0x7e   : > { %2286 = vmatpush3.msra.mxu0 %v1197_v33  ;;  %2249 = vmatprep.subr.mxu1 %v1180_v34 }
  0x7f   : > { %2287 = vmatprep.subr.mxu0 %v1212_v35  ;;  %2250 = vmatpush3.msra.mxu1 %v1164_v36 }
  0x80   : > { %2288 = vmatpush3.msra.mxu0 %v1196_v37  ;;  %2251 = vmatprep.subr.mxu1 %v1179_v38 }
  0x81   : > { %2289 = vmatprep.subr.mxu0 %v1211_v39  ;;  %2252 = vmatpush3.msra.mxu1 %v1163_v40 }
  0x82   : > { %2290 = vmatpush3.msra.mxu0 %v1195_v41  ;;  %2253 = vmatprep.subr.mxu1 %v1178_v42 }
  0x83   : > { %2291 = vmatprep.subr.mxu0 %v1210_v43  ;;  %2254 = vmatpush3.msra.mxu1 %v1162_v44 }
  0x84   : > { %2292 = vmatpush3.msra.mxu0 %v1194_v45  ;;  %2255 = vmatprep.subr.mxu1 %v1177_v46 }
  0x85   : > { %2293 = vmatprep.subr.mxu0 %v1209_v47  ;;  %2256 = vmatpush3.msra.mxu1 %v1161_v48 }
  0x86   : > { %2294 = vmatpush3.msra.mxu0 %v1193_v49  ;;  %2257 = vmatprep.subr.mxu1 %v1176_v50 }
  0x87   : > { %2295 = vmatprep.subr.mxu0 %v1208_v51  ;;  %2258 = vmatpush3.msra.mxu1 %v1160_v52 }
  0x88   : > { %2296 = vmatpush3.msra.mxu0 %v1192_v53  ;;  %2467 = vmatprep.subr.mxu1 %v2964_v54 }
  0x89   : > { %2321 = vmatprep.subr.mxu0 %v1505_v55 }
 0x114   : > { %v625_v56 = vpop.f32.mrf.mxu0 }
 0x115   : > { %v708_v57 = vpop.f32.mrf.mxu1 }
 0x116   : > { %v627_v58 = vpop.f32.mrf.mxu0  ;;  %v709_v5 = vadd.f32 %v708_v57, %v625_v56 }
 0x117   : > { %v710_v59 = vpop.f32.mrf.mxu1 }
 0x118   : > { %v631_v60 = vpop.f32.mrf.mxu0  ;;  %v711_v7 = vadd.f32 %v710_v59, %v627_v58 }
 0x119   : > { %v714_v61 = vpop.f32.mrf.mxu1 }
 0x11a   : > { %v633_v62 = vpop.f32.mrf.mxu0  ;;  %v715_v13 = vadd.f32 %v714_v61, %v631_v60  ;;  %v1489_v60 = vld [vmem:[#allocation8 + $0x78] sm:$0xff] }
 0x11b   : > { %v716_v2 = vpop.f32.mrf.mxu1 }
 0x11c   : > { %v717_v18 = vadd.f32 %v716_v2, %v633_v62  ;;  %v1504_v2 = vld [vmem:[#allocation8 + $0xf0] sm:$0xff] }
 0x11e   : > { %v802_v1 = vpop.f32.mrf.mxu0 }
 0x11f   : > { %v813_v8 = vadd.f32 %v802_v1, %v709_v5  ;;  %v1238_v1 = vld [vmem:[#allocation6 + $0x270] sm:$0xff] }
 0x120   : > { %v804_v4 = vpop.f32.mrf.mxu0 }
 0x121   : > { %v900_v6 = vpop.f32.mrf.mxu1  ;;  %v814_v14 = vadd.f32 %v804_v4, %v711_v7 }
 0x122   : > { %v911_v19 = vadd.f32 %v900_v6, %v813_v8 }
 0x123   : > { %v902_v9 = vpop.f32.mrf.mxu1  ;;  %v808_v11 = vpop.f32.mrf.mxu0 }
 0x124   : > { %v815_v20 = vadd.f32 %v808_v11, %v715_v13  ;;  %v912_v23 = vadd.f32 %v902_v9, %v814_v14  ;;  %v1488_v13 = vld [vmem:[#allocation8 + $0x70] sm:$0xff] }
 0x125   : > { %v810_v16 = vpop.f32.mrf.mxu0  ;;  %v906_v17 = vpop.f32.mrf.mxu1 }
 0x126   : > { %v816_v24 = vadd.f32 %v810_v16, %v717_v18  ;;  %v913_v29 = vadd.f32 %v906_v17, %v815_v20  ;;  %v1237_v17 = vld [vmem:[#allocation6 + $0x268] sm:$0xff] }
 0x127   : > { %v908_v27 = vpop.f32.mrf.mxu1  ;;  %v1503_v18 = vld [vmem:[#allocation8 + $0xe8] sm:$0xff] }
 0x128   : > { %v998_v22 = vpop.f32.mrf.mxu0  ;;  %v914_v33 = vadd.f32 %v908_v27, %v816_v24  ;;  %v1487_v24 = vld [vmem:[#allocation8 + $0x68] sm:$0xff]  ;;  %v1236_v27 = vld [vmem:[#allocation6 + $0x260] sm:$0xff] }
 0x129   : > { %v1009_v25 = vadd.f32 %v998_v22, %v911_v19 }
 0x12a   : > { %v1000_v28 = vpop.f32.mrf.mxu0 }
 0x12b   : > { %v1025_v30 = vadd.f32 %v1018_v21, %v1009_v25  ;;  %v1010_v31 = vadd.f32 %v1000_v28, %v912_v23 }
 0x12c   : > { %v1004_v32 = vpop.f32.mrf.mxu0 }
 0x12d   : > { %v1029_v34 = vmax.f32 %v1025_v30, 0.0  ;;  %v1026_v35 = vadd.f32 %v1022_v26, %v1010_v31  ;;  %v1011_v36 = vadd.f32 %v1004_v32, %v913_v29  ;;  %v1502_v30 = vld [vmem:[#allocation8 + $0xe0] sm:$0xff] }
 0x12e   : > { %v1006_v37 = vpop.f32.mrf.mxu0 }
 0x12f   : > { %v1044_v38 = vrot.slane %v1029_v34, 6  ;;  %v1030_v39 = vmax.f32 %v1026_v35, 0.0  ;;  %v1027_v40 = vadd.f32 %v1018_v21, %v1011_v36  ;;  %v1012_v41 = vadd.f32 %v1006_v37, %v914_v33  ;;  %v1486_v34 = vld [vmem:[#allocation8 + $0x60] sm:$0xff]  ;;  %v1235_v36 = vld [vmem:[#allocation6 + $0x258] sm:$0xff] }
 0x130   : > { %v1501_v37 = vld [vmem:[#allocation8 + $0xd8] sm:$0xff] }
 0x131   : > { %1056 = vst [vmem:[#allocation3 + $0x28] sm:$0xfc] %v1044_v38  ;;  %v1045_v42 = vrot.slane %v1030_v39, 6  ;;  %v1031_v43 = vmax.f32 %v1027_v40, 0.0  ;;  %v1028_v44 = vadd.f32 %v1022_v26, %v1012_v41  ;;  %v1234_v39 = vld [vmem:[#allocation6 + $0x250] sm:$0xff] }
 0x132   : > { %v1500_v40 = vld [vmem:[#allocation8 + $0xd0] sm:$0xff] }
 0x133   : > { %1057 = vst [vmem:[#allocation3 + $0x10] sm:$0xfc] %v1045_v42  ;;  %v1046_v45 = vrot.slane %v1031_v43, 6  ;;  %v1032_v46 = vmax.f32 %v1028_v44, 0.0  ;;  %v1484_v41 = vld [vmem:[#allocation8 + $0x50] sm:$0xff]  ;;  %v1499_v43 = vld [vmem:[#allocation8 + $0xc8] sm:$0xff] }
 0x134   : > { %v1483_v44 = vld [vmem:[#allocation8 + $0x48] sm:$0xff] }
 0x135   : > { %v2976_v47 = vsel %vm1043_vm2, %v1044_v38, %v1046_v45  ;;  %1060 = vst [vmem:[#allocation3 + $0x18] sm:$0x3] %v1046_v45  ;;  %v1048_v48 = vrot.slane %v1032_v46, 6  ;;  %v1485_v38 = vld [vmem:[#allocation8 + $0x58] sm:$0xff]  ;;  %v1232_v45 = vld [vmem:[#allocation6 + $0x240] sm:$0xff] }
 0x136   : > { %v1077_v53 = vrot.slane %v2976_v47, 1  ;;  %v1097_v56 = vrot.slane %v2976_v47, 3  ;;  %v1087_v59 = vrot.slane %v2976_v47, 2  ;;  %v1107_v28 = vrot.slane %v2976_v47, 4  ;;  %v1498_v46 = vld [vmem:[#allocation8 + $0xc0] sm:$0xff] }
 0x137   : > { %v2978_v49 = vsel %vm1043_vm2, %v1045_v42, %v1048_v48  ;;  %1061 = vst [vmem:[#allocation3 + $0x20] sm:$0x3] %v1048_v48  ;;  %v1233_v42 = vld [vmem:[#allocation6 + $0x248] sm:$0xff]  ;;  %v1482_v48 = vld [vmem:[#allocation8 + $0x40] sm:$0xff] }
 0x138   : > { %v1064_v50 = vld [vmem:[#allocation3 + $0x28] sm:$0xfe]  ;;  %v1127_v31 = vrot.slane %v2978_v49, 1 }
 0x139   : > { %v1068_v51 = vld [vmem:[#allocation3 + $0x28] sm:$0xf8]  ;;  %v1076_v52 = vrot.slane %v1064_v50, 1 }
 0x13a   : > { %v1096_v55 = vrot.slane %v1068_v51, 3  ;;  %v1066_v57 = vld [vmem:[#allocation3 + $0x28] sm:$0xfc]  ;;  %v1115_v14 = vld [vmem:[#allocation3 + $0x10] sm:$0xfe] }
 0x13b   : > { %v1086_v58 = vrot.slane %v1066_v57, 2  ;;  %v1078_v61 = vsel %vm1075_vm3, %v1076_v52, %v1077_v53  ;;  %v1062_v63 = vld [vmem:[#allocation3 + $0x28] sm:$0xff]  ;;  %v1117_v19 = vld [vmem:[#allocation3 + $0x10] sm:$0xfc]  ;;  %v1126_v25 = vrot.slane %v1115_v14, 1  ;;  %v1229_v57 = vld [vmem:[#allocation6 + $0x228] sm:$0xff] }
 0x13c   : > { %v1098_v62 = vsel %vm1095_vm4, %v1096_v55, %v1097_v56  ;;  %1311 = vmatprep.mubr.f32.mxu1 %v1078_v61  ;;  %v1065_v5 = vld [vmem:[#allocation3 + $0x18] sm:$0x1]  ;;  %v1070_v12 = vld [vmem:[#allocation3 + $0x28] sm:$0xf0]  ;;  %v1135_v22 = vrot.slane %v1117_v19, 2  ;;  %v1496_v55 = vld [vmem:[#allocation8 + $0xb0] sm:$0xff] }
 0x13d   : > { %1386 = vmatprep.mubr.f32.mxu0 %v1098_v62  ;;  %v1088_v4 = vsel %vm1085_vm5, %v1086_v58, %v1087_v59  ;;  %v1069_v6 = vld [vmem:[#allocation3 + $0x18] sm:$0x7]  ;;  %1312 = vmatmul.mubr.f32.vlgmr.msra.gmra.mxu1 %v1062_v63  ;;  %v1079_v8 = vrot.slane %v1065_v5, 1  ;;  %v1106_v21 = vrot.slane %v1070_v12, 4  ;;  %v1128_v35 = vsel %vm1075_vm3, %v1126_v25, %v1127_v31  ;;  %v1231_v50 = vld [vmem:[#allocation6 + $0x238] sm:$0xff]  ;;  %v1494_v61 = vld [vmem:[#allocation8 + $0xa0] sm:$0xff] }
 0x13e   : > { %v1067_v7 = vld [vmem:[#allocation3 + $0x18] sm:$0x3]  ;;  %1387 = vmatmul.mubr.f32.vlgmr.msra.gmra.mxu0 %v1088_v4  ;;  %v1099_v9 = vrot.slane %v1069_v6, 3  ;;  %2468 = vmatpush3.msra.mxu1 %v2964_v54  ;;  %v1136_v54 = vrot.slane %v2978_v49, 2  ;;  %v1118_v23 = vld [vmem:[#allocation3 + $0x20] sm:$0x3] }
 0x13f   : > { %v1089_v11 = vrot.slane %v1067_v7, 2  ;;  %2322 = vmatpush3.msra.mxu0 %v1489_v60  ;;  %v1080_v15 = vsel %vm1075_vm3, %v1077_v53, %v1079_v8  ;;  %2469 = vmatprep.subr.mxu1 %v1238_v1  ;;  %v1138_v26 = vrot.slane %v1118_v23, 2  ;;  %v1108_v33 = vsel %vm1105_vm6, %v1106_v21, %v1107_v28  ;;  %v1497_v51 = vld [vmem:[#allocation8 + $0xb8] sm:$0xff]  ;;  %v1230_v53 = vld [vmem:[#allocation6 + $0x230] sm:$0xff]  ;;  %v1495_v58 = vld [vmem:[#allocation8 + $0xa8] sm:$0xff] }
 0x140   : > { %v1100_v16 = vsel %vm1095_vm4, %v1097_v56, %v1099_v9  ;;  %2323 = vmatprep.subr.mxu0 %v1504_v2  ;;  %1316 = vmatprep.mubr.f32.mxu1 %v1080_v15  ;;  %v2993_v29 = vsel %vm1085_vm5, %v1135_v22, %v1136_v54  ;;  %v1481_v52 = vld [vmem:[#allocation8 + $0x38] sm:$0xff]  ;;  %v1480_v56 = vld [vmem:[#allocation8 + $0x30] sm:$0xff]  ;;  %v1228_v60 = vld [vmem:[#allocation6 + $0x220] sm:$0xff] }
 0x141   : > { %1391 = vmatprep.mubr.f32.mxu0 %v1100_v16  ;;  %v1090_v20 = vsel %vm1085_vm5, %v1087_v59, %v1089_v11  ;;  %2470 = vmatpush3.msra.mxu1 %v1238_v1  ;;  %v2998_v32 = vsel %vm1085_vm5, %v1136_v54, %v1138_v26  ;;  %v1479_v59 = vld [vmem:[#allocation8 + $0x28] sm:$0xff]  ;;  %v1478_v62 = vld [vmem:[#allocation8 + $0x20] sm:$0xff]  ;;  %v1227_v63 = vld [vmem:[#allocation6 + $0x218] sm:$0xff] }
 0x142   : > { %2324 = vmatpush3.msra.mxu0 %v1488_v13  ;;  %2471 = vmatprep.subr.mxu1 %v1237_v17  ;;  %v1493_v1 = vld [vmem:[#allocation8 + $0x98] sm:$0xff]  ;;  %v1226_v4 = vld [vmem:[#allocation6 + $0x210] sm:$0xff]  ;;  %v1071_v7 = vld [vmem:[#allocation3 + $0x18] sm:$0xf] }
 0x143   : > { %2325 = vmatprep.subr.mxu0 %v1503_v18  ;;  %1317 = vmatmul.mubr.f32.gmra.mxu1 %v2976_v47  ;;  %v1477_v2 = vld [vmem:[#allocation8 + $0x18] sm:$0xff]  ;;  %v1492_v5 = vld [vmem:[#allocation8 + $0x90] sm:$0xff]  ;;  %v1225_v8 = vld [vmem:[#allocation6 + $0x208] sm:$0xff]  ;;  %v1109_v15 = vrot.slane %v1071_v7, 4 }
 0x144   : > { %1392 = vmatmul.mubr.f32.gmra.mxu0 %v1090_v20  ;;  %2472 = vmatpush3.msra.mxu1 %v1237_v17  ;;  %v1476_v6 = vld [vmem:[#allocation8 + $0x10] sm:$0xff]  ;;  %v1491_v9 = vld [vmem:[#allocation8 + $0x88] sm:$0xff]  ;;  %v1224_v13 = vld [vmem:[#allocation6 + $0x200] sm:$0xff] }
 0x145   : > { %2326 = vmatpush3.msra.mxu0 %v1487_v24  ;;  %2473 = vmatprep.subr.mxu1 %v1236_v27  ;;  %v1475_v11 = vld [vmem:[#allocation8 + $0x8] sm:$0xff]  ;;  %v1116_v12 = vld [vmem:[#allocation3 + $0x20] sm:$0x1]  ;;  %v1490_v14 = vld [vmem:[#allocation8 + $0x80] sm:$0xff]  ;;  %v1110_v22 = vsel %vm1105_vm6, %v1107_v28, %v1109_v15  ;;  %v1145_v24 = vrot.slane %v2978_v49, 3 }
 0x146   : > { %2499 = vmatprep.mubr.f32.mxu1 %v1108_v33  ;;  %2327 = vmatprep.subr.mxu0 %v1502_v30  ;;  %v1119_v16 = vld [vmem:[#allocation3 + $0x10] sm:$0xf8]  ;;  %v1129_v18 = vrot.slane %v1116_v12, 1  ;;  %v1537_v19 = vld [vmem:[#allocation8 + $0x1f8] sm:$0xff]  ;;  %v1552_v30 = vld [vmem:[#allocation8 + $0x270] sm:$0xff] }
 0x147   : > { %1625 = vmatprep.mubr.f32.mxu0 %v1128_v35  ;;  %2474 = vmatpush3.msra.mxu1 %v1236_v27  ;;  %v1474_v17 = vld [vmem:[#allocation8] sm:$0xff]  ;;  %v1553_v20 = vld [vmem:[#allocation8 + $0x278] sm:$0xff]  ;;  %v1144_v21 = vrot.slane %v1119_v16, 3  ;;  %v1536_v27 = vld [vmem:[#allocation8 + $0x1f0] sm:$0xff] }
 0x148   : > { %2328 = vmatpush3.msra.mxu0 %v1486_v34  ;;  %2475 = vmatprep.subr.mxu1 %v1235_v36  ;;  %v1113_v54 = vld [vmem:[#allocation3 + $0x10] sm:$0xff]  ;;  %v1521_v23 = vld [vmem:[#allocation8 + $0x178] sm:$0xff]  ;;  %v1130_v26 = vsel %vm1075_vm3, %v1127_v31, %v1129_v18  ;;  %v1520_v28 = vld [vmem:[#allocation8 + $0x170] sm:$0xff]  ;;  %v1154_v31 = vrot.slane %v2978_v49, 4 }
 0x149   : > { %2329 = vmatprep.subr.mxu0 %v1501_v37  ;;  %2476 = vmatpush3.msra.mxu1 %v1235_v36  ;;  %v1121_v25 = vld [vmem:[#allocation3 + $0x10] sm:$0xf0]  ;;  %v1146_v47 = vsel %vm1095_vm4, %v1144_v21, %v1145_v24  ;;  %v1535_v33 = vld [vmem:[#allocation8 + $0x1e8] sm:$0xff]  ;;  %v1541_v7 = vld [vmem:[#allocation8 + $0x218] sm:$0xff] }
 0x14a   : > { %2330 = vmatpush3.msra.mxu0 %v1485_v38  ;;  %2477 = vmatprep.subr.mxu1 %v1234_v39  ;;  %v1153_v34 = vrot.slane %v1121_v25, 4  ;;  %v1551_v35 = vld [vmem:[#allocation8 + $0x268] sm:$0xff]  ;;  %v1534_v37 = vld [vmem:[#allocation8 + $0x1e0] sm:$0xff]  ;;  %v1508_v12 = vld [vmem:[#allocation8 + $0x110] sm:$0xff] }
 0x14b   : > { %2331 = vmatprep.subr.mxu0 %v1500_v40  ;;  %2478 = vmatpush3.msra.mxu1 %v1234_v39  ;;  %v1519_v36 = vld [vmem:[#allocation8 + $0x168] sm:$0xff]  ;;  %v1550_v38 = vld [vmem:[#allocation8 + $0x260] sm:$0xff]  ;;  %v1120_v16 = vld [vmem:[#allocation3 + $0x20] sm:$0x7] }
 0x14c   : > { %2332 = vmatpush3.msra.mxu0 %v1484_v41  ;;  %2479 = vmatprep.subr.mxu1 %v1233_v42  ;;  %v1155_v39 = vsel %vm1105_vm6, %v1153_v34, %v1154_v31  ;;  %v1518_v40 = vld [vmem:[#allocation8 + $0x160] sm:$0xff]  ;;  %v1533_v41 = vld [vmem:[#allocation8 + $0x1d8] sm:$0xff]  ;;  %v1539_v15 = vld [vmem:[#allocation8 + $0x208] sm:$0xff] }
 0x14d   : > { %2333 = vmatprep.subr.mxu0 %v1499_v43  ;;  %2480 = vmatpush3.msra.mxu1 %v1233_v42  ;;  %v1549_v42 = vld [vmem:[#allocation8 + $0x258] sm:$0xff]  ;;  %v1522_v18 = vld [vmem:[#allocation8 + $0x180] sm:$0xff]  ;;  %v1873_v34 = vld [vmem:[#allocation9 + $0x50] sm:$0xff] }
 0x14e   : > { %2334 = vmatpush3.msra.mxu0 %v1483_v44  ;;  %2481 = vmatprep.subr.mxu1 %v1232_v45  ;;  %v1517_v43 = vld [vmem:[#allocation8 + $0x158] sm:$0xff]  ;;  %v1532_v44 = vld [vmem:[#allocation8 + $0x1d0] sm:$0xff]  ;;  %v1506_v21 = vld [vmem:[#allocation8 + $0x100] sm:$0xff] }
 0x14f   : > { %2335 = vmatprep.subr.mxu0 %v1498_v46  ;;  %2482 = vmatpush3.msra.mxu1 %v1232_v45  ;;  %v1548_v45 = vld [vmem:[#allocation8 + $0x250] sm:$0xff]  ;;  %v1894_v25 = vld [vmem:[#allocation9 + $0xf8] sm:$0xff] }
 0x150   : > { %2336 = vmatpush3.msra.mxu0 %v1482_v48  ;;  %2483 = vmatprep.subr.mxu1 %v1231_v50  ;;  %v1516_v46 = vld [vmem:[#allocation8 + $0x150] sm:$0xff]  ;;  %v1531_v48 = vld [vmem:[#allocation8 + $0x1c8] sm:$0xff] }
 0x151   : > { %2337 = vmatprep.subr.mxu0 %v1497_v51  ;;  %2484 = vmatpush3.msra.mxu1 %v1231_v50  ;;  %v1547_v50 = vld [vmem:[#allocation8 + $0x248] sm:$0xff] }
 0x152   : > { %2338 = vmatpush3.msra.mxu0 %v1481_v52  ;;  %2485 = vmatprep.subr.mxu1 %v1230_v53  ;;  %v1515_v51 = vld [vmem:[#allocation8 + $0x148] sm:$0xff]  ;;  %v1530_v52 = vld [vmem:[#allocation8 + $0x1c0] sm:$0xff] }
 0x153   : > { %2339 = vmatprep.subr.mxu0 %v1496_v55  ;;  %2486 = vmatpush3.msra.mxu1 %v1230_v53  ;;  %v1546_v53 = vld [vmem:[#allocation8 + $0x240] sm:$0xff] }
 0x154   : > { %2340 = vmatpush3.msra.mxu0 %v1480_v56  ;;  %2487 = vmatprep.subr.mxu1 %v1229_v57  ;;  %v1514_v55 = vld [vmem:[#allocation8 + $0x140] sm:$0xff]  ;;  %v1529_v56 = vld [vmem:[#allocation8 + $0x1b8] sm:$0xff] }
 0x155   : > { %2341 = vmatprep.subr.mxu0 %v1495_v58  ;;  %2488 = vmatpush3.msra.mxu1 %v1229_v57  ;;  %v1545_v57 = vld [vmem:[#allocation8 + $0x238] sm:$0xff] }
 0x156   : > { %2342 = vmatpush3.msra.mxu0 %v1479_v59  ;;  %2489 = vmatprep.subr.mxu1 %v1228_v60  ;;  %v1513_v58 = vld [vmem:[#allocation8 + $0x138] sm:$0xff]  ;;  %v1528_v59 = vld [vmem:[#allocation8 + $0x1b0] sm:$0xff] }
 0x157   : > { %2343 = vmatprep.subr.mxu0 %v1494_v61  ;;  %2490 = vmatpush3.msra.mxu1 %v1228_v60  ;;  %v1544_v60 = vld [vmem:[#allocation8 + $0x230] sm:$0xff] }
 0x158   : > { %2344 = vmatpush3.msra.mxu0 %v1478_v62  ;;  %2491 = vmatprep.subr.mxu1 %v1227_v63  ;;  %v1512_v61 = vld [vmem:[#allocation8 + $0x130] sm:$0xff]  ;;  %v1527_v62 = vld [vmem:[#allocation8 + $0x1a8] sm:$0xff] }
 0x159   : > { %2345 = vmatprep.subr.mxu0 %v1493_v1  ;;  %2492 = vmatpush3.msra.mxu1 %v1227_v63  ;;  %v1543_v63 = vld [vmem:[#allocation8 + $0x228] sm:$0xff] }
 0x15a   : > { %2346 = vmatpush3.msra.mxu0 %v1477_v2  ;;  %2493 = vmatprep.subr.mxu1 %v1226_v4  ;;  %v1511_v1 = vld [vmem:[#allocation8 + $0x128] sm:$0xff]  ;;  %v1526_v2 = vld [vmem:[#allocation8 + $0x1a0] sm:$0xff] }
 0x15b   : > { %2347 = vmatprep.subr.mxu0 %v1492_v5  ;;  %2494 = vmatpush3.msra.mxu1 %v1226_v4  ;;  %v1542_v4 = vld [vmem:[#allocation8 + $0x220] sm:$0xff] }
 0x15c   : > { %2348 = vmatpush3.msra.mxu0 %v1476_v6  ;;  %2495 = vmatprep.subr.mxu1 %v1225_v8  ;;  %v1510_v5 = vld [vmem:[#allocation8 + $0x120] sm:$0xff]  ;;  %v1525_v6 = vld [vmem:[#allocation8 + $0x198] sm:$0xff] }
 0x15d   : > { %2349 = vmatprep.subr.mxu0 %v1491_v9  ;;  %2496 = vmatpush3.msra.mxu1 %v1225_v8  ;;  %v1509_v8 = vld [vmem:[#allocation8 + $0x118] sm:$0xff]  ;;  %v1524_v9 = vld [vmem:[#allocation8 + $0x190] sm:$0xff] }
 0x15e   : > { %2350 = vmatpush3.msra.mxu0 %v1475_v11  ;;  %2497 = vmatprep.subr.mxu1 %v1224_v13  ;;  %v1540_v11 = vld [vmem:[#allocation8 + $0x210] sm:$0xff] }
 0x15f   : > { %2351 = vmatprep.subr.mxu0 %v1490_v14  ;;  %2498 = vmatpush3.msra.mxu1 %v1224_v13  ;;  %v1122_v13 = vld [vmem:[#allocation3 + $0x20] sm:$0xf]  ;;  %v1523_v14 = vld [vmem:[#allocation8 + $0x188] sm:$0xff] }
 0x160   : > { %2352 = vmatpush3.msra.mxu0 %v1474_v17  ;;  %2500 = vmatmul.mubr.f32.vlgmr.msra.gmra.mxu1 %v1110_v22  ;;  %v1507_v17 = vld [vmem:[#allocation8 + $0x108] sm:$0xff]  ;;  %v1147_v22 = vrot.slane %v1120_v16, 3 }
 0x161   : > { %1626 = vmatmul.mubr.f32.vlgmr.msra.gmra.mxu0 %v1113_v54  ;;  %2359 = vmatprep.subr.mxu1 %v1537_v19  ;;  %v1538_v19 = vld [vmem:[#allocation8 + $0x200] sm:$0xff] }
 0x162   : > { %2502 = vmatprep.subr.mxu0 %v1553_v20  ;;  %1630 = vmatprep.mubr.f32.mxu0 %v1130_v26  ;;  %v1878_v26 = vld [vmem:[#allocation9 + $0x78] sm:$0xff] }
 0x163   : > { %2360 = vmatpush3.msra.mxu1 %v1521_v23  ;;  %1700 = vmatprep.mubr.f32.mxu1 %v1146_v47  ;;  %v1148_v23 = vsel %vm1095_vm4, %v1145_v24, %v1147_v22  ;;  %v1892_v47 = vld [vmem:[#allocation9 + $0xe8] sm:$0xff]  ;;  %v1890_v24 = vld [vmem:[#allocation9 + $0xd8] sm:$0xff] }
 0x164   : > { %2503 = vmatpush3.msra.mxu0 %v1553_v20  ;;  %2361 = vmatprep.subr.mxu1 %v1536_v27  ;;  %v1156_v20 = vrot.slane %v1122_v13, 4  ;;  %v1893_v27 = vld [vmem:[#allocation9 + $0xf0] sm:$0xff] }
 0x165   : > { %2504 = vmatprep.subr.mxu0 %v1552_v30  ;;  %2362 = vmatpush3.msra.mxu1 %v1520_v28  ;;  %v1876_v28 = vld [vmem:[#allocation9 + $0x68] sm:$0xff] }
 0x166   : > { %2505 = vmatpush3.msra.mxu0 %v1552_v30  ;;  %2363 = vmatprep.subr.mxu1 %v1535_v33  ;;  %v1157_v54 = vsel %vm1105_vm6, %v1154_v31, %v1156_v20  ;;  %v1877_v30 = vld [vmem:[#allocation9 + $0x70] sm:$0xff]  ;;  %v1874_v33 = vld [vmem:[#allocation9 + $0x58] sm:$0xff]  ;;  %v1887_v31 = vld [vmem:[#allocation9 + $0xc0] sm:$0xff] }
 0x167   : > { %1631 = vmatmul.mubr.f32.gmra.mxu0 %v2978_v49  ;;  %2506 = vmatprep.subr.mxu0 %v1551_v35  ;;  %v1875_v49 = vld [vmem:[#allocation9 + $0x60] sm:$0xff] }
 0x168   : > { %2364 = vmatpush3.msra.mxu1 %v1519_v36  ;;  %2507 = vmatpush3.msra.mxu0 %v1551_v35  ;;  %v1888_v35 = vld [vmem:[#allocation9 + $0xc8] sm:$0xff] }
 0x169   : > { %2534 = vmatprep.mubr.f32.mxu0 %v1155_v39  ;;  %2365 = vmatprep.subr.mxu1 %v1534_v37  ;;  %v1872_v36 = vld [vmem:[#allocation9 + $0x48] sm:$0xff]  ;;  %v1871_v37 = vld [vmem:[#allocation9 + $0x40] sm:$0xff]  ;;  %v1870_v39 = vld [vmem:[#allocation9 + $0x38] sm:$0xff] }
 0x16a   : > { %2508 = vmatprep.subr.mxu0 %v1550_v38  ;;  %2366 = vmatpush3.msra.mxu1 %v1518_v40  ;;  %v1885_v40 = vld [vmem:[#allocation9 + $0xb0] sm:$0xff] }
 0x16b   : > { %2509 = vmatpush3.msra.mxu0 %v1550_v38  ;;  %2367 = vmatprep.subr.mxu1 %v1533_v41  ;;  %v1886_v38 = vld [vmem:[#allocation9 + $0xb8] sm:$0xff]  ;;  %v1869_v41 = vld [vmem:[#allocation9 + $0x30] sm:$0xff] }
 0x16c   : > { %2510 = vmatprep.subr.mxu0 %v1549_v42  ;;  %2368 = vmatpush3.msra.mxu1 %v1517_v43  ;;  %v1868_v43 = vld [vmem:[#allocation9 + $0x28] sm:$0xff] }
 0x16d   : > { %2511 = vmatpush3.msra.mxu0 %v1549_v42  ;;  %2369 = vmatprep.subr.mxu1 %v1532_v44  ;;  %v1884_v42 = vld [vmem:[#allocation9 + $0xa8] sm:$0xff]  ;;  %v1883_v44 = vld [vmem:[#allocation9 + $0xa0] sm:$0xff] }
 0x16e   : > { %2512 = vmatprep.subr.mxu0 %v1548_v45  ;;  %2370 = vmatpush3.msra.mxu1 %v1516_v46  ;;  %v1882_v46 = vld [vmem:[#allocation9 + $0x98] sm:$0xff] }
 0x16f   : > { %2513 = vmatpush3.msra.mxu0 %v1548_v45  ;;  %2371 = vmatprep.subr.mxu1 %v1531_v48  ;;  %v1867_v45 = vld [vmem:[#allocation9 + $0x20] sm:$0xff]  ;;  %v1866_v48 = vld [vmem:[#allocation9 + $0x18] sm:$0xff] }
 0x170   : > { %2514 = vmatprep.subr.mxu0 %v1547_v50  ;;  %2372 = vmatpush3.msra.mxu1 %v1515_v51  ;;  %v1865_v51 = vld [vmem:[#allocation9 + $0x10] sm:$0xff] }
 0x171   : > { %2515 = vmatpush3.msra.mxu0 %v1547_v50  ;;  %2373 = vmatprep.subr.mxu1 %v1530_v52  ;;  %v1881_v50 = vld [vmem:[#allocation9 + $0x90] sm:$0xff] }
 0x172   : > { %2516 = vmatprep.subr.mxu0 %v1546_v53  ;;  %2374 = vmatpush3.msra.mxu1 %v1514_v55 }
 0x173   : > { %2517 = vmatpush3.msra.mxu0 %v1546_v53  ;;  %2375 = vmatprep.subr.mxu1 %v1529_v56 }
 0x174   : > { %2518 = vmatprep.subr.mxu0 %v1545_v57  ;;  %2376 = vmatpush3.msra.mxu1 %v1513_v58 }
 0x175   : > { %2519 = vmatpush3.msra.mxu0 %v1545_v57  ;;  %2377 = vmatprep.subr.mxu1 %v1528_v59 }
 0x176   : > { %2520 = vmatprep.subr.mxu0 %v1544_v60  ;;  %2378 = vmatpush3.msra.mxu1 %v1512_v61 }
 0x177   : > { %2521 = vmatpush3.msra.mxu0 %v1544_v60  ;;  %2379 = vmatprep.subr.mxu1 %v1527_v62 }
 0x178   : > { %2522 = vmatprep.subr.mxu0 %v1543_v63  ;;  %2380 = vmatpush3.msra.mxu1 %v1511_v1 }
 0x179   : > { %2523 = vmatpush3.msra.mxu0 %v1543_v63  ;;  %2381 = vmatprep.subr.mxu1 %v1526_v2 }
 0x17a   : > { %2524 = vmatprep.subr.mxu0 %v1542_v4  ;;  %2382 = vmatpush3.msra.mxu1 %v1510_v5 }
 0x17b   : > { %2525 = vmatpush3.msra.mxu0 %v1542_v4  ;;  %2383 = vmatprep.subr.mxu1 %v1525_v6 }
 0x17c   : > { %2526 = vmatprep.subr.mxu0 %v1541_v7  ;;  %2384 = vmatpush3.msra.mxu1 %v1509_v8 }
 0x17d   : > { %2527 = vmatpush3.msra.mxu0 %v1541_v7  ;;  %2385 = vmatprep.subr.mxu1 %v1524_v9  ;;  %v2221_v9 = vld [vmem:[%s3146_s7] ss:$0 sm:$0xff] }
 0x17e   : > { %2528 = vmatprep.subr.mxu0 %v1540_v11  ;;  %2386 = vmatpush3.msra.mxu1 %v1508_v12  ;;  %v2220_v12 = vld [vmem:[%s3144_s5] ss:$0 sm:$0xff] }
 0x17f   : > { %2529 = vmatpush3.msra.mxu0 %v1540_v11  ;;  %2387 = vmatprep.subr.mxu1 %v1523_v14 }
 0x180   : > { %2530 = vmatprep.subr.mxu0 %v1539_v15  ;;  %2388 = vmatpush3.msra.mxu1 %v1507_v17 }
 0x181   : > { %2531 = vmatpush3.msra.mxu0 %v1539_v15  ;;  %2389 = vmatprep.subr.mxu1 %v1522_v18 }
 0x182   : > { %2532 = vmatprep.subr.mxu0 %v1538_v19  ;;  %2390 = vmatpush3.msra.mxu1 %v1506_v21 }
 0x183   : > { %2533 = vmatpush3.msra.mxu0 %v1538_v19  ;;  %1701 = vmatmul.mubr.f32.vlgmr.msra.gmra.mxu1 %v2993_v29  ;;  %v1891_v29 = vld [vmem:[#allocation9 + $0xe0] sm:$0xff] }
 0x184   : > { %2535 = vmatmul.mubr.f32.vlgmr.msra.gmra.mxu0 %v1157_v54  ;;  %1705 = vmatprep.mubr.f32.mxu1 %v1148_v23 }
 0x185   : > { %2415 = vmatprep.subr.mxu0 %v1894_v25 }
 0x186   : > { %2416 = vmatpush3.msra.mxu0 %v1878_v26 }
 0x187   : > { %1706 = vmatmul.mubr.f32.gmra.mxu1 %v2998_v32  ;;  %2417 = vmatprep.subr.mxu0 %v1893_v27  ;;  %v1889_v32 = vld [vmem:[#allocation9 + $0xd0] sm:$0xff] }
 0x188   : > { %1856 = vmatprep.mubr.f32.mxu1 %v2760_v0  ;;  %2418 = vmatpush3.msra.mxu0 %v1877_v30 }
 0x189   : > { %2419 = vmatprep.subr.mxu0 %v1892_v47 }
 0x18a   : > { %2420 = vmatpush3.msra.mxu0 %v1876_v28 }
 0x18b   : > { %2421 = vmatprep.subr.mxu0 %v1891_v29 }
 0x18c   : > { %2422 = vmatpush3.msra.mxu0 %v1875_v49 }
 0x18d   : > { %2423 = vmatprep.subr.mxu0 %v1890_v24 }
 0x18e   : > { %2424 = vmatpush3.msra.mxu0 %v1874_v33 }
 0x18f   : > { %2425 = vmatprep.subr.mxu0 %v1889_v32 }
 0x190   : > { %2426 = vmatpush3.msra.mxu0 %v1873_v34 }
 0x191   : > { %2427 = vmatprep.subr.mxu0 %v1888_v35 }
 0x192   : > { %2428 = vmatpush3.msra.mxu0 %v1872_v36  ;;  %v1983_v36 = vld [vmem:[%s3147_s8 + $0x78] sm:$0xff] }
 0x193   : > { %2429 = vmatprep.subr.mxu0 %v1887_v31  ;;  %v2761_v31 = vmov 0.0625  }
 0x194   : > { %2430 = vmatpush3.msra.mxu0 %v1871_v37  ;;  %v1982_v37 = vld [vmem:[%s3147_s8 + $0x70] sm:$0xff] }
 0x195   : > { %2431 = vmatprep.subr.mxu0 %v1886_v38  ;;  %v1981_v38 = vld [vmem:[%s3147_s8 + $0x68] sm:$0xff] }
 0x196   : > { %2432 = vmatpush3.msra.mxu0 %v1870_v39  ;;  %v1980_v39 = vld [vmem:[%s3147_s8 + $0x60] sm:$0xff] }
 0x197   : > { %2433 = vmatprep.subr.mxu0 %v1885_v40  ;;  %v1979_v40 = vld [vmem:[%s3147_s8 + $0x58] sm:$0xff] }
 0x198   : > { %2434 = vmatpush3.msra.mxu0 %v1869_v41  ;;  %v1978_v41 = vld [vmem:[%s3147_s8 + $0x50] sm:$0xff] }
 0x199   : > { %2435 = vmatprep.subr.mxu0 %v1884_v42  ;;  %v1977_v42 = vld [vmem:[%s3147_s8 + $0x48] sm:$0xff] }
 0x19a   : > { %2436 = vmatpush3.msra.mxu0 %v1868_v43  ;;  %v1976_v43 = vld [vmem:[%s3147_s8 + $0x40] sm:$0xff] }
 0x19b   : > { %2437 = vmatprep.subr.mxu0 %v1883_v44  ;;  %v1975_v44 = vld [vmem:[%s3147_s8 + $0x38] sm:$0xff] }
 0x19c   : > { %2438 = vmatpush3.msra.mxu0 %v1867_v45  ;;  %v1974_v45 = vld [vmem:[%s3147_s8 + $0x30] sm:$0xff] }
 0x19d   : > { %2439 = vmatprep.subr.mxu0 %v1882_v46  ;;  %v1973_v46 = vld [vmem:[%s3147_s8 + $0x28] sm:$0xff] }
 0x19e   : > { %2440 = vmatpush3.msra.mxu0 %v1866_v48  ;;  %v1972_v48 = vld [vmem:[%s3147_s8 + $0x20] sm:$0xff] }
 0x19f   : > { %2441 = vmatprep.subr.mxu0 %v1881_v50  ;;  %v1971_v50 = vld [vmem:[%s3147_s8 + $0x18] sm:$0xff] }
 0x1a0   : > { %2442 = vmatpush3.msra.mxu0 %v1865_v51  ;;  %v1970_v51 = vld [vmem:[%s3147_s8 + $0x10] sm:$0xff] }
 0x1fd   : > { %v2259_v55 = vpop.f32.mrf.mxu1 }
 0x1fe   : > { %v2297_v52 = vpop.f32.mrf.mxu0 }
 0x1ff   : > { %v2260_v57 = vpop.f32.mrf.mxu1 }
 0x200   : > { %v2298_v53 = vpop.f32.mrf.mxu0  ;;  %v2261_v8 = vadd.f32 %v2260_v57, %v2259_v55  ;;  %v1967_v55 = vld [vmem:[%s514_s26] sm:$0x1]  ;;  %v1864_v57 = vld [vmem:[#allocation9 + $0x8] sm:$0xff] }
 0x201   : > { %v2299_v25 = vadd.f32 %v2298_v53, %v2297_v52  ;;  %v1969_v52 = vld [vmem:[%s3147_s8 + $0x8] sm:$0xff]  ;;  %v1968_v53 = vld [vmem:[%s3147_s8] sm:$0xff] }
 0x202   : > { %v1314_v18 = vadd.f32 %v2261_v8, %v2220_v12 }
 0x203   : > { %v2262_v59 = vpop.f32.mrf.mxu1 }
 0x204   : > { %v2300_v56 = vpop.f32.mrf.mxu0  ;;  %v1389_v47 = vadd.f32 %v2299_v25, %v1314_v18 }
 0x205   : > { %v2263_v61 = vpop.f32.mrf.mxu1 }
 0x206   : > { %v2301_v58 = vpop.f32.mrf.mxu0  ;;  %v2264_v4 = vadd.f32 %v2263_v61, %v2262_v59  ;;  %v1863_v59 = vld [vmem:[#allocation9] sm:$0xff] }
 0x207   : > { %v2302_v19 = vadd.f32 %v2301_v58, %v2300_v56  ;;  %v1880_v56 = vld [vmem:[#allocation9 + $0x88] sm:$0xff]  ;;  %v1879_v58 = vld [vmem:[#allocation9 + $0x80] sm:$0xff] }
 0x208   : > { %v1319_v15 = vadd.f32 %v2264_v4, %v2220_v12  ;;  %2443 = vmatprep.subr.mxu0 %v1880_v56 }
 0x209   : > { %2444 = vmatpush3.msra.mxu0 %v1864_v57 }
 0x20a   : > { %v1394_v26 = vadd.f32 %v2302_v19, %v1319_v15  ;;  %2445 = vmatprep.subr.mxu0 %v1879_v58 }
 0x20b   : > { %2446 = vmatpush3.msra.mxu0 %v1863_v59 }
 0x220   : > { %v2501_v63 = vpop.f32.mrf.mxu1 }
 0x221   : > { %v2353_v60 = vpop.f32.mrf.mxu0  ;;  %v3036_v30 = vadd.f32 %v2501_v63, %v1394_v26 }
 0x222   : > { %v1463_v2 = vpop.f32.mrf.mxu1 }
 0x223   : > { %v2354_v62 = vpop.f32.mrf.mxu0  ;;  %v3038_v24 = vadd.f32 %v1463_v2, %v1389_v47  ;;  %v1473_v32 = vmax.f32 %v3036_v30, 0.0 }
 0x224   : > { %v2355_v7 = vadd.f32 %v2354_v62, %v2353_v60 }
 0x225   : > { %v1472_v35 = vmax.f32 %v3038_v24, 0.0 }
 0x226   : > { %v1628_v17 = vadd.f32 %v2355_v7, %v2221_v9  ;;  %v1895_v7 = vld [vmem:[%s3150_s11] sm:$0x1] }
 0x227   : > { %v2356_v1 = vpop.f32.mrf.mxu0 }
 0x229   : > { %v2357_v5 = vpop.f32.mrf.mxu0 }
 0x22a   : > { %v2358_v13 = vadd.f32 %v2357_v5, %v2356_v1 }
 0x22c   : > { %v1633_v22 = vadd.f32 %v2358_v13, %v2221_v9 }
 0x243   : > { %v2391_v6 = vpop.f32.mrf.mxu1 }
 0x244   : > { %v2536_v20 = vpop.f32.mrf.mxu0 }
 0x245   : > { %v2392_v11 = vpop.f32.mrf.mxu1 }
 0x246   : > { %v2393_v14 = vadd.f32 %v2392_v11, %v2391_v6  ;;  %v1777_v28 = vpop.f32.mrf.mxu0 }
 0x247   : > { %v2394_v16 = vpop.f32.mrf.mxu1 }
 0x248   : > { %v1703_v54 = vadd.f32 %v2393_v14, %v1628_v17 }
 0x249   : > { %v2395_v21 = vpop.f32.mrf.mxu1 }
 0x24a   : > { %v2396_v23 = vadd.f32 %v2395_v21, %v2394_v16  ;;  %v1778_v29 = vadd.f32 %v1777_v28, %v1703_v54 }
 0x24c   : > { %v1708_v27 = vadd.f32 %v2396_v23, %v1633_v22  ;;  %v1786_v34 = vmax.f32 %v1778_v29, 0.0 }
 0x24e   : > { %v1783_v49 = vadd.f32 %v2536_v20, %v1708_v27 }
 0x250   : > { %v1787_v33 = vmax.f32 %v1783_v49, 0.0 }
 0x252   : > { %1820 = vmatprep.subr.mxu1 %v1787_v33 }
 0x253   : > { %1821 = vmatpush1.msra.mxu1 %v1473_v32 }
 0x254   : > { %1822 = vmatprep.subr.mxu1 %v1786_v34 }
 0x255   : > { %1823 = vmatpush1.msra.mxu1 %v1472_v35 }
 0x256   : > { %2222 = vmatmul.mubr.msk.f32.vlgmr.msra.gmra.mxu1 %vm1788_vm7, %v2761_v31  ;;  %2537 = vmatprep.subr.mxu1 %v2760_v0 }
 0x257   : > { %2538 = vmatpush3.msra.mxu1 %v1983_v36  ;;  %2569 = vmatprep.mubr.msk.f32.mxu1 %vm2762_vm8, %v2760_v0 }
 0x258   : > { %2539 = vmatprep.subr.mxu1 %v2760_v0 }
 0x259   : > { %2540 = vmatpush3.msra.mxu1 %v1982_v37 }
 0x25a   : > { %2541 = vmatprep.subr.mxu1 %v2760_v0 }
 0x25b   : > { %2542 = vmatpush3.msra.mxu1 %v1981_v38 }
 0x25c   : > { %2543 = vmatprep.subr.mxu1 %v2760_v0 }
 0x25d   : > { %2544 = vmatpush3.msra.mxu1 %v1980_v39 }
 0x25e   : > { %2545 = vmatprep.subr.mxu1 %v2760_v0 }
 0x25f   : > { %2546 = vmatpush3.msra.mxu1 %v1979_v40 }
 0x260   : > { %2547 = vmatprep.subr.mxu1 %v2760_v0 }
 0x261   : > { %2548 = vmatpush3.msra.mxu1 %v1978_v41 }
 0x262   : > { %2549 = vmatprep.subr.mxu1 %v2760_v0 }
 0x263   : > { %2550 = vmatpush3.msra.mxu1 %v1977_v42 }
 0x264   : > { %2551 = vmatprep.subr.mxu1 %v2760_v0 }
 0x265   : > { %2552 = vmatpush3.msra.mxu1 %v1976_v43 }
 0x266   : > { %2553 = vmatprep.subr.mxu1 %v2760_v0 }
 0x267   : > { %2554 = vmatpush3.msra.mxu1 %v1975_v44 }
 0x268   : > { %2555 = vmatprep.subr.mxu1 %v2760_v0 }
 0x269   : > { %2556 = vmatpush3.msra.mxu1 %v1974_v45 }
 0x26a   : > { %2557 = vmatprep.subr.mxu1 %v2760_v0 }
 0x26b   : > { %2558 = vmatpush3.msra.mxu1 %v1973_v46 }
 0x26c   : > { %2559 = vmatprep.subr.mxu1 %v2760_v0 }
 0x26d   : > { %2560 = vmatpush3.msra.mxu1 %v1972_v48 }
 0x26e   : > { %2561 = vmatprep.subr.mxu1 %v2760_v0 }
 0x26f   : > { %2562 = vmatpush3.msra.mxu1 %v1971_v50 }
 0x270   : > { %2563 = vmatprep.subr.mxu1 %v2760_v0 }
 0x271   : > { %2564 = vmatpush3.msra.mxu1 %v1970_v51 }
 0x272   : > { %2565 = vmatprep.subr.mxu1 %v2760_v0 }
 0x273   : > { %2566 = vmatpush3.msra.mxu1 %v1969_v52 }
 0x274   : > { %2567 = vmatprep.subr.mxu1 %v2760_v0  ;;  %v1984_v0 = vld [vmem:[%s3148_s9] sm:$0x1] }
 0x275   : > { %2568 = vmatpush3.msra.mxu1 %v1968_v53 }
 0x276   : > { %2570 = vmatmul.mubr.f32.vlgmr.msra.gmra.mxu1 %v1967_v55 }
 0x316   : > { %v1858_v60 = vpop.f32.mrf.mxu1 }
 0x318   : > { %v1860_v61 = vpop.f32.mrf.mxu1 }
 0x319   : > { %1960 = vmatprep.mubr.f32.mxu0 %v1860_v61 }
 0x31a   : > { %1961 = vmatmul.mubr.f32.vlgmr.msra.gmra.mxu0 %v1858_v60 }
 0x336   : > { %v2051_v62 = vpop.f32.mrf.mxu1 }
 0x337   : > { %v2052_v63 = vadd.f32 %v2051_v62, %v1984_v0 }
 0x338   : > { %v2571_v1 = vpop.f32.mrf.mxu1 }
 0x339   : > { %v2058_v2 = vrot.slane %v2052_v63, %v1017_v10 }
 0x33b   : > { %v2059_v4 = vadd.f32 %v2058_v2, %v1472_v35  ;;  %v2060_v5 = vadd.f32 %v2058_v2, %v1473_v32 }
 0x33d   : > { %2061 = vst [vmem:[%s519_s16] sm:$0xff] %v2059_v4  ;;  %2062 = vst [vmem:[%s519_s16 + $0x8] sm:$0xff] %v2060_v5 }
 0x3da   : > { %v2447_v6 = vpop.f32.mrf.mxu0 }
 0x3dc   : > { %v2448_v3 = vpop.f32.mrf.mxu0 }
 0x3dd   : > { %v2449_v10 = vadd.f32 %v2448_v3, %v2447_v6 }
 0x3df   : > { %v1963_v8 = vadd.f32 %v2449_v10, %v1895_v7 }
 0x3e1   : > { %1966 = vst [vmem:[%s522_s23] sm:$0x1] %v1963_v8 }
 0x3e2 PF: > { %s27_s25 = sadd.s32 1, %s2750_s25  }
 0x3e3   : > { %p24_p2 = scmp.ge.s32.totalorder %s27_s25, 4  }
 0x3e5   :  { %26 = sbr.rel (!%p24_p2) target bundleno = 3 (0x3), region = 134 }
 0x3ea   :  { %2096 = vsyncpa [#allocation5], 1 }
 0x3eb   :  { %2098 = vsyncpa [#allocation5 + $0x1], 1 }
 0x3ec   :  { %2099 = vsyncpa [#allocation7], 1 }
 0x3ed   :  { %2100 = vsyncpa [#allocation10], 1 }

// kernel: pitch_model_forward.3
= control target key start
LH: loop header
LB: loop body
LE: loop exit
PB: predicated region body
PF: predicated region fallthrough
CT: control target
= control target key end

     0   :  { %s3232_s23 = smov 0   ;;  %s4331_s0 = inlined_call_operand.vmem [shape: f32[2,8,128], index: 0, kind: input, shape index: {}]   ;;  %s4332_s1 = inlined_call_operand.vmem [shape: f32[2,16,128], index: 1, kind: input, shape index: {}]   ;;  %s4333_s2 = inlined_call_operand.vmem [shape: f32[128,256], index: 2, kind: input, shape index: {}]   ;;  %s4334_s3 = inlined_call_operand.vmem [shape: f32[1,256], index: 3, kind: input, shape index: {}]   ;;  %s4335_s4 = inlined_call_operand.vmem [shape: f32[128,512], index: 4, kind: input, shape index: {}]   ;;  %s4336_s5 = inlined_call_operand.vmem [shape: f32[1,512], index: 5, kind: input, shape index: {}]   ;;  %s4337_s6 = inlined_call_operand.vmem [shape: f32[4,64,256], index: 6, kind: input, shape index: {}]   ;;  %s4338_s7 = inlined_call_operand.vmem [shape: f32[1,256], index: 7, kind: input, shape index: {}]   ;;  %s4339_s8 = inlined_call_operand.vmem [shape: f32[256,128], index: 8, kind: input, shape index: {}]   ;;  %s4340_s9 = inlined_call_operand.vmem [shape: f32[1,128], index: 9, kind: input, shape index: {}]   ;;  %s4341_s10 = inlined_call_operand.vmem [shape: f32[128,128], index: 10, kind: input, shape index: {}]   ;;  %s4342_s11 = inlined_call_operand.vmem [shape: f32[1,128], index: 11, kind: input, shape index: {}]   ;;  %s4343_s12 = inlined_call_operand.vmem [shape: f32[1,128], index: 12, kind: input, shape index: {}]   ;;  %s4344_s13 = inlined_call_operand.vmem [shape: f32[1,128], index: 13, kind: input, shape index: {}]   ;;  %s4345_s14 = inlined_call_operand.vmem [shape: f32[1,128], index: 14, kind: input, shape index: {}]   ;;  %s4346_s15 = inlined_call_operand.vmem [shape: f32[1,128], index: 15, kind: input, shape index: {}]   ;;  %s4347_s16 = inlined_call_operand.vmem [shape: f32[384,128], index: 16, kind: input, shape index: {}]   ;;  %s4348_s17 = inlined_call_operand.vmem [shape: f32[1,128], index: 17, kind: input, shape index: {}]   ;;  %s4349_s18 = inlined_call_operand.vmem [shape: f32[128,1], index: 18, kind: input, shape index: {}]   ;;  %s4350_s19 = inlined_call_operand.<no memory space> [shape: f32[1,1], index: 19, kind: input, shape index: {}]   ;;  %s4351_s20 = inlined_call_operand.vmem [shape: f32[2,8,1], index: 20, kind: output, shape index: {}]  }
   0x1   :  { %4355 = sst [smem:[#allocation5_spill]] %s4331_s0  ;;  %v25_v0 = vstv %s4350_s19 }
   0x2   :  { %4356 = sst [smem:[#allocation6_spill]] %s4332_s1  ;;  %26 = vst [vmem:[#allocation3] sm:$0x1] %v25_v0 }
   0x3   :  { %4357 = sst [smem:[#allocation7_spill]] %s4333_s2 }
   0x4   :  { %4358 = sst [smem:[#allocation8_spill]] %s4334_s3 }
   0x5   :  { %4359 = sst [smem:[#allocation9_spill]] %s4335_s4 }
   0x6 LB: > { %4360 = sst [smem:[#allocation4_spill]] %s3119_s23  ;;  %s2687_s24 = sadd.s32 4294967295, %s3119_s23   ;;  %s3119_s23 = sphi %s3232_s23, %s32_s23  }
   0x7   : > { %p2691_p0 = scmp.ge.s32.totalorder %s3119_s23, 1  ;;  %p573_p1 = scmp.lt.s32.totalorder %s3119_s23, 3 }
   0x9   : > { %p574_p2 = pnand %p2691_p0, %p573_p1 }
   0xa   : > { %s4361_s3 = sld [smem:[#allocation9_spill]] (!%p574_p2)  ;;  %p3351_p3 = scmp.lt.s32.totalorder (!%p574_p2), %s2687_s24, 1 }
   0xb   : > { %577 = sbr.rel (%p574_p2) target bundleno = 3910 (0xf46), region = 100  ;;  %s4362_s25 = sld [smem:[#allocation7_spill]] (!%p574_p2) }
   0xc   : > { %s4364_s21 = sld [smem:[#allocation6_spill]] (!%p574_p2)  ;;  %s3123_s29 = smov (!%p574_p2), 64  }
   0xd   : > { %s4365_s26 = sld [smem:[#allocation5_spill]] (!%p574_p2) }
  0x10   : > { %v826_v1 = vld [vmem:[%s4361_s3 + $0x1e8] sm:$0xff]  ;;  %v825_v2 = vld [vmem:[%s4361_s3 + $0x1e0] sm:$0xff]  ;;  %v3121_v5 = vmov 0.0   ;;  %s4369_s24 = smov (!%p3351_p3, %s2687_s24), 1  ;;  %vm3122_vm0 = vmmov 0   ;;  %vm1005_vm1 = vcmask 523264  }
  0x11   : > { %v822_v3 = vld [vmem:[%s4361_s3 + $0x1c8] sm:$0xff]  ;;  %851 = vmatprep.subr.mxu1 %v826_v1  ;;  %v821_v4 = vld [vmem:[%s4361_s3 + $0x1c0] sm:$0xff]  ;;  %915 = vmatprep.mubr.f32.mxu1 %v3121_v5  ;;  %2323 = vst [vmem:[#allocation2] sm:$0xff] %v3121_v5  ;;  %2324 = vst [vmem:[#allocation2 + $0x8] sm:$0x3] %v3121_v5  ;;  %s2774_s4 = sshll.u32 %s4369_s24, 4 }
  0x12   : > { %852 = vmatpush1.msra.mxu1 %v825_v2  ;;  %v818_v6 = vld [vmem:[%s4361_s3 + $0x1a8] sm:$0xff]  ;;  %758 = vmatprep.mubr.f32.mxu0 %v3121_v5  ;;  %v817_v7 = vld [vmem:[%s4361_s3 + $0x1a0] sm:$0xff]  ;;  %v681_v8 = vld [vmem:[%s4362_s25 + $0xf8] sm:$0xff]  ;;  %s642_s1 = scalar_lea.vmem %s4364_s21, %s2774_s4  ;;  %s2692_s2 = sshll.u32 %s4369_s24, 3  ;;  %vm1085_vm2 = vcmask 130048   ;;  %vm2620_vm4 = vcmask 7168  }
  0x13   : > { %853 = vmatprep.subr.mxu1 %v822_v3  ;;  %v814_v9 = vld [vmem:[%s4361_s3 + $0x188] sm:$0xff]  ;;  %694 = vmatprep.subr.mxu0 %v681_v8  ;;  %v680_v10 = vld [vmem:[%s4362_s25 + $0xf0] sm:$0xff]  ;;  %v813_v12 = vld [vmem:[%s4361_s3 + $0x180] sm:$0xff]  ;;  %s637_s27 = scalar_lea.vmem %s4365_s26, %s2692_s2  ;;  %s4366_s26 = sld [smem:[#allocation8_spill]] }
  0x14   : > { %854 = vmatpush1.msra.mxu1 %v821_v4  ;;  %v679_v11 = vld [vmem:[%s4362_s25 + $0xe8] sm:$0xff]  ;;  %695 = vmatpush1.msra.mxu0 %v680_v10  ;;  %v678_v13 = vld [vmem:[%s4362_s25 + $0xe0] sm:$0xff]  ;;  %v677_v15 = vld [vmem:[%s4362_s25 + $0xd8] sm:$0xff]  ;;  %s646_s22 = scalar_lea.vmem %s4351_s20, %s2692_s2 }
  0x15   : > { %855 = vmatprep.subr.mxu1 %v818_v6  ;;  %v810_v14 = vld [vmem:[%s4361_s3 + $0x168] sm:$0xff]  ;;  %696 = vmatprep.subr.mxu0 %v679_v11  ;;  %v676_v16 = vld [vmem:[%s4362_s25 + $0xd0] sm:$0xff]  ;;  %v809_v17 = vld [vmem:[%s4361_s3 + $0x160] sm:$0xff] }
  0x16   : > { %856 = vmatpush1.msra.mxu1 %v817_v7  ;;  %697 = vmatpush1.msra.mxu0 %v678_v13  ;;  %v675_v18 = vld [vmem:[%s4362_s25 + $0xc8] sm:$0xff]  ;;  %v674_v20 = vld [vmem:[%s4362_s25 + $0xc0] sm:$0xff]  ;;  %v673_v22 = vld [vmem:[%s4362_s25 + $0xb8] sm:$0xff] }
  0x17   : > { %857 = vmatprep.subr.mxu1 %v814_v9  ;;  %v806_v19 = vld [vmem:[%s4361_s3 + $0x148] sm:$0xff]  ;;  %698 = vmatprep.subr.mxu0 %v677_v15  ;;  %v805_v21 = vld [vmem:[%s4361_s3 + $0x140] sm:$0xff]  ;;  %v672_v24 = vld [vmem:[%s4362_s25 + $0xb0] sm:$0xff] }
  0x18   : > { %858 = vmatpush1.msra.mxu1 %v813_v12  ;;  %699 = vmatpush1.msra.mxu0 %v676_v16  ;;  %v802_v23 = vld [vmem:[%s4361_s3 + $0x128] sm:$0xff]  ;;  %v801_v25 = vld [vmem:[%s4361_s3 + $0x120] sm:$0xff]  ;;  %v669_v30 = vld [vmem:[%s4362_s25 + $0x98] sm:$0xff] }
  0x19   : > { %859 = vmatprep.subr.mxu1 %v810_v14  ;;  %700 = vmatprep.subr.mxu0 %v675_v18  ;;  %v671_v26 = vld [vmem:[%s4362_s25 + $0xa8] sm:$0xff]  ;;  %v670_v28 = vld [vmem:[%s4362_s25 + $0xa0] sm:$0xff]  ;;  %v668_v32 = vld [vmem:[%s4362_s25 + $0x90] sm:$0xff] }
  0x1a   : > { %860 = vmatpush1.msra.mxu1 %v809_v17  ;;  %701 = vmatpush1.msra.mxu0 %v674_v20  ;;  %v798_v27 = vld [vmem:[%s4361_s3 + $0x108] sm:$0xff]  ;;  %v797_v29 = vld [vmem:[%s4361_s3 + $0x100] sm:$0xff]  ;;  %v665_v38 = vld [vmem:[%s4362_s25 + $0x78] sm:$0xff] }
  0x1b   : > { %861 = vmatprep.subr.mxu1 %v806_v19  ;;  %702 = vmatprep.subr.mxu0 %v673_v22  ;;  %v794_v31 = vld [vmem:[%s4361_s3 + $0xe8] sm:$0xff]  ;;  %v793_v33 = vld [vmem:[%s4361_s3 + $0xe0] sm:$0xff]  ;;  %v664_v40 = vld [vmem:[%s4362_s25 + $0x70] sm:$0xff] }
  0x1c   : > { %862 = vmatpush1.msra.mxu1 %v805_v21  ;;  %703 = vmatpush1.msra.mxu0 %v672_v24  ;;  %v667_v34 = vld [vmem:[%s4362_s25 + $0x88] sm:$0xff]  ;;  %v666_v36 = vld [vmem:[%s4362_s25 + $0x80] sm:$0xff]  ;;  %v661_v46 = vld [vmem:[%s4362_s25 + $0x58] sm:$0xff] }
  0x1d   : > { %863 = vmatprep.subr.mxu1 %v802_v23  ;;  %704 = vmatprep.subr.mxu0 %v671_v26  ;;  %v790_v35 = vld [vmem:[%s4361_s3 + $0xc8] sm:$0xff]  ;;  %v789_v37 = vld [vmem:[%s4361_s3 + $0xc0] sm:$0xff]  ;;  %v660_v48 = vld [vmem:[%s4362_s25 + $0x50] sm:$0xff] }
  0x1e   : > { %864 = vmatpush1.msra.mxu1 %v801_v25  ;;  %705 = vmatpush1.msra.mxu0 %v670_v28  ;;  %v786_v39 = vld [vmem:[%s4361_s3 + $0xa8] sm:$0xff]  ;;  %v785_v41 = vld [vmem:[%s4361_s3 + $0xa0] sm:$0xff]  ;;  %v657_v54 = vld [vmem:[%s4362_s25 + $0x38] sm:$0xff] }
  0x1f   : > { %865 = vmatprep.subr.mxu1 %v798_v27  ;;  %706 = vmatprep.subr.mxu0 %v669_v30  ;;  %v663_v42 = vld [vmem:[%s4362_s25 + $0x68] sm:$0xff]  ;;  %v662_v44 = vld [vmem:[%s4362_s25 + $0x60] sm:$0xff]  ;;  %v656_v56 = vld [vmem:[%s4362_s25 + $0x30] sm:$0xff] }
  0x20   : > { %866 = vmatpush1.msra.mxu1 %v797_v29  ;;  %707 = vmatpush1.msra.mxu0 %v668_v32  ;;  %v782_v43 = vld [vmem:[%s4361_s3 + $0x88] sm:$0xff]  ;;  %v781_v45 = vld [vmem:[%s4361_s3 + $0x80] sm:$0xff]  ;;  %v653_v62 = vld [vmem:[%s4362_s25 + $0x18] sm:$0xff] }
  0x21   : > { %867 = vmatprep.subr.mxu1 %v794_v31  ;;  %708 = vmatprep.subr.mxu0 %v667_v34  ;;  %v778_v47 = vld [vmem:[%s4361_s3 + $0x68] sm:$0xff]  ;;  %v777_v49 = vld [vmem:[%s4361_s3 + $0x60] sm:$0xff]  ;;  %v652_v0 = vld [vmem:[%s4362_s25 + $0x10] sm:$0xff] }
  0x22   : > { %868 = vmatpush1.msra.mxu1 %v793_v33  ;;  %709 = vmatpush1.msra.mxu0 %v666_v36  ;;  %v659_v50 = vld [vmem:[%s4362_s25 + $0x48] sm:$0xff]  ;;  %v658_v52 = vld [vmem:[%s4362_s25 + $0x40] sm:$0xff]  ;;  %v828_v6 = vld [vmem:[%s4361_s3 + $0x1f8] sm:$0xff] }
  0x23   : > { %869 = vmatprep.subr.mxu1 %v790_v35  ;;  %710 = vmatprep.subr.mxu0 %v665_v38  ;;  %v774_v51 = vld [vmem:[%s4361_s3 + $0x48] sm:$0xff]  ;;  %v773_v53 = vld [vmem:[%s4361_s3 + $0x40] sm:$0xff]  ;;  %v827_v7 = vld [vmem:[%s4361_s3 + $0x1f0] sm:$0xff]  ;;  %v684_v38 = vlaneseq }
  0x24   : > { %870 = vmatpush1.msra.mxu1 %v789_v37  ;;  %711 = vmatpush1.msra.mxu0 %v664_v40  ;;  %v770_v55 = vld [vmem:[%s4361_s3 + $0x28] sm:$0xff]  ;;  %v769_v57 = vld [vmem:[%s4361_s3 + $0x20] sm:$0xff]  ;;  %v824_v8 = vld [vmem:[%s4361_s3 + $0x1d8] sm:$0xff] }
  0x25   : > { %871 = vmatprep.subr.mxu1 %v786_v39  ;;  %712 = vmatprep.subr.mxu0 %v663_v42  ;;  %v655_v58 = vld [vmem:[%s4362_s25 + $0x28] sm:$0xff]  ;;  %v654_v60 = vld [vmem:[%s4362_s25 + $0x20] sm:$0xff]  ;;  %v823_v9 = vld [vmem:[%s4361_s3 + $0x1d0] sm:$0xff]  ;;  %v3574_v39 = vshrl.u32 %v684_v38, 7 }
  0x26   : > { %872 = vmatpush1.msra.mxu1 %v785_v41  ;;  %713 = vmatpush1.msra.mxu0 %v662_v44  ;;  %v766_v59 = vld [vmem:[%s4361_s3 + $0x8] sm:$0xff]  ;;  %v765_v61 = vld [vmem:[%s4361_s3] sm:$0xff]  ;;  %v820_v10 = vld [vmem:[%s4361_s3 + $0x1b8] sm:$0xff] }
  0x27   : > { %873 = vmatprep.subr.mxu1 %v782_v43  ;;  %714 = vmatprep.subr.mxu0 %v661_v46  ;;  %v3444_v63 = vld [vmem:[%s642_s1] sm:$0xff]  ;;  %v651_v1 = vld [vmem:[%s4362_s25 + $0x8] sm:$0xff]  ;;  %v819_v11 = vld [vmem:[%s4361_s3 + $0x1b0] sm:$0xff]  ;;  %v3582_v41 = vsub.s32 0, %v3574_v39 }
  0x28   : > { %874 = vmatpush1.msra.mxu1 %v781_v45  ;;  %715 = vmatpush1.msra.mxu0 %v660_v48  ;;  %v650_v2 = vld [vmem:[%s4362_s25] sm:$0xff]  ;;  %v3464_v4 = vld [vmem:[%s642_s1 + $0x8] sm:$0xff]  ;;  %v816_v12 = vld [vmem:[%s4361_s3 + $0x198] sm:$0xff] }
  0x29   : > { %875 = vmatprep.subr.mxu1 %v778_v47  ;;  %716 = vmatprep.subr.mxu0 %v659_v50  ;;  %v3461_v3 = vld [vmem:[%s637_s27] sm:$0xff]  ;;  %v815_v13 = vld [vmem:[%s4361_s3 + $0x190] sm:$0xff]  ;;  %v812_v14 = vld [vmem:[%s4361_s3 + $0x178] sm:$0xff] }
  0x2a   : > { %876 = vmatpush1.msra.mxu1 %v777_v49  ;;  %717 = vmatpush1.msra.mxu0 %v658_v52  ;;  %v811_v15 = vld [vmem:[%s4361_s3 + $0x170] sm:$0xff]  ;;  %v808_v16 = vld [vmem:[%s4361_s3 + $0x158] sm:$0xff]  ;;  %v3579_v40 = vld [vmem:[%s4366_s26] sm:$0x3]  ;;  %v841_v52 = vsub.s32 2, %v3574_v39 }
  0x2b   : > { %877 = vmatprep.subr.mxu1 %v774_v51  ;;  %718 = vmatprep.subr.mxu0 %v657_v54  ;;  %v807_v17 = vld [vmem:[%s4361_s3 + $0x150] sm:$0xff]  ;;  %v804_v18 = vld [vmem:[%s4361_s3 + $0x138] sm:$0xff]  ;;  %v3587_v42 = vld [vmem:[%s4336_s5] sm:$0xf]  ;;  %v687_v44 = vrot.slane %v3579_v40, %v3582_v41 }
  0x2c   : > { %878 = vmatpush1.msra.mxu1 %v773_v53  ;;  %719 = vmatpush1.msra.mxu0 %v656_v56  ;;  %v803_v19 = vld [vmem:[%s4361_s3 + $0x130] sm:$0xff]  ;;  %v800_v20 = vld [vmem:[%s4361_s3 + $0x118] sm:$0xff]  ;;  %v834_v46 = vrot.slane %v3587_v42, %v3582_v41  ;;  %v1170_v38 = vld [vmem:[%s4337_s6] sm:$0xff] }
  0x2d   : > { %879 = vmatprep.subr.mxu1 %v770_v55  ;;  %720 = vmatprep.subr.mxu0 %v655_v58  ;;  %v799_v21 = vld [vmem:[%s4361_s3 + $0x110] sm:$0xff]  ;;  %v796_v22 = vld [vmem:[%s4361_s3 + $0xf8] sm:$0xff]  ;;  %v842_v55 = vrot.slane %v3587_v42, %v841_v52 }
  0x2e   : > { %880 = vmatpush1.msra.mxu1 %v769_v57  ;;  %721 = vmatpush1.msra.mxu0 %v654_v60  ;;  %v795_v23 = vld [vmem:[%s4361_s3 + $0xf0] sm:$0xff]  ;;  %v792_v24 = vld [vmem:[%s4361_s3 + $0xd8] sm:$0xff] }
  0x2f   : > { %881 = vmatprep.subr.mxu1 %v766_v59  ;;  %722 = vmatprep.subr.mxu0 %v653_v62  ;;  %v791_v25 = vld [vmem:[%s4361_s3 + $0xd0] sm:$0xff]  ;;  %v788_v26 = vld [vmem:[%s4361_s3 + $0xb8] sm:$0xff] }
  0x30   : > { %882 = vmatpush1.msra.mxu1 %v765_v61  ;;  %723 = vmatpush1.msra.mxu0 %v652_v0  ;;  %v787_v27 = vld [vmem:[%s4361_s3 + $0xb0] sm:$0xff]  ;;  %v784_v28 = vld [vmem:[%s4361_s3 + $0x98] sm:$0xff] }
  0x31   : > { %916 = vmatmul.mubr.f32.vlgmr.msra.gmra.mxu1 %v3444_v63  ;;  %724 = vmatprep.subr.mxu0 %v651_v1  ;;  %v783_v29 = vld [vmem:[%s4361_s3 + $0x90] sm:$0xff]  ;;  %v780_v30 = vld [vmem:[%s4361_s3 + $0x78] sm:$0xff] }
  0x32   : > { %921 = vmatprep.mubr.f32.mxu1 %v3121_v5  ;;  %725 = vmatpush1.msra.mxu0 %v650_v2  ;;  %v779_v31 = vld [vmem:[%s4361_s3 + $0x70] sm:$0xff]  ;;  %v776_v32 = vld [vmem:[%s4361_s3 + $0x58] sm:$0xff] }
  0x33   : > { %2920 = vmatprep.subr.mxu1 %v3121_v5  ;;  %759 = vmatmul.mubr.f32.vlgmr.msra.gmra.mxu0 %v3461_v3  ;;  %v775_v33 = vld [vmem:[%s4361_s3 + $0x50] sm:$0xff]  ;;  %v772_v34 = vld [vmem:[%s4361_s3 + $0x38] sm:$0xff] }
  0x34   : > { %992 = vmatprep.mubr.f32.mxu0 %v3121_v5  ;;  %928 = vmatprep.subr.mxu0 %v828_v6  ;;  %v771_v35 = vld [vmem:[%s4361_s3 + $0x30] sm:$0xff]  ;;  %v768_v36 = vld [vmem:[%s4361_s3 + $0x18] sm:$0xff] }
  0x35   : > { %922 = vmatmul.mubr.f32.gmra.mxu1 %v3464_v4  ;;  %929 = vmatpush1.msra.mxu0 %v827_v7  ;;  %v767_v37 = vld [vmem:[%s4361_s3 + $0x10] sm:$0xff]  ;;  %v2715_v52 = vld [vmem:[%s4337_s6 + $0xd8] sm:$0xff] }
  0x36   : > { %2924 = vmatprep.mubr.msk.f32.mxu1 %vm3122_vm0, %v3121_v5  ;;  %930 = vmatprep.subr.mxu0 %v824_v8 }
  0x37   : > { %931 = vmatpush1.msra.mxu0 %v823_v9 }
  0x38   : > { %932 = vmatprep.subr.mxu0 %v820_v10 }
  0x39   : > { %933 = vmatpush1.msra.mxu0 %v819_v11 }
  0x3a   : > { %934 = vmatprep.subr.mxu0 %v816_v12 }
  0x3b   : > { %935 = vmatpush1.msra.mxu0 %v815_v13 }
  0x3c   : > { %936 = vmatprep.subr.mxu0 %v812_v14 }
  0x3d   : > { %937 = vmatpush1.msra.mxu0 %v811_v15 }
  0x3e   : > { %938 = vmatprep.subr.mxu0 %v808_v16 }
  0x3f   : > { %939 = vmatpush1.msra.mxu0 %v807_v17 }
  0x40   : > { %940 = vmatprep.subr.mxu0 %v804_v18 }
  0x41   : > { %941 = vmatpush1.msra.mxu0 %v803_v19 }
  0x42   : > { %942 = vmatprep.subr.mxu0 %v800_v20  ;;  %v1185_v20 = vld [vmem:[%s4337_s6 + $0x78] sm:$0xff] }
  0x43   : > { %943 = vmatpush1.msra.mxu0 %v799_v21  ;;  %v1184_v21 = vld [vmem:[%s4337_s6 + $0x70] sm:$0xff] }
  0x44   : > { %944 = vmatprep.subr.mxu0 %v796_v22  ;;  %v1183_v22 = vld [vmem:[%s4337_s6 + $0x68] sm:$0xff] }
  0x45   : > { %945 = vmatpush1.msra.mxu0 %v795_v23  ;;  %v1182_v23 = vld [vmem:[%s4337_s6 + $0x60] sm:$0xff] }
  0x46   : > { %946 = vmatprep.subr.mxu0 %v792_v24  ;;  %v1181_v24 = vld [vmem:[%s4337_s6 + $0x58] sm:$0xff] }
  0x47   : > { %947 = vmatpush1.msra.mxu0 %v791_v25  ;;  %v1180_v25 = vld [vmem:[%s4337_s6 + $0x50] sm:$0xff] }
  0x48   : > { %948 = vmatprep.subr.mxu0 %v788_v26  ;;  %v1179_v26 = vld [vmem:[%s4337_s6 + $0x48] sm:$0xff] }
  0x49   : > { %949 = vmatpush1.msra.mxu0 %v787_v27  ;;  %v1178_v27 = vld [vmem:[%s4337_s6 + $0x40] sm:$0xff] }
  0x4a   : > { %950 = vmatprep.subr.mxu0 %v784_v28  ;;  %v1177_v28 = vld [vmem:[%s4337_s6 + $0x38] sm:$0xff] }
  0x4b   : > { %951 = vmatpush1.msra.mxu0 %v783_v29  ;;  %v1176_v29 = vld [vmem:[%s4337_s6 + $0x30] sm:$0xff] }
  0x4c   : > { %952 = vmatprep.subr.mxu0 %v780_v30  ;;  %v1175_v30 = vld [vmem:[%s4337_s6 + $0x28] sm:$0xff] }
  0x4d   : > { %953 = vmatpush1.msra.mxu0 %v779_v31  ;;  %v1174_v31 = vld [vmem:[%s4337_s6 + $0x20] sm:$0xff] }
  0x4e   : > { %954 = vmatprep.subr.mxu0 %v776_v32 }
  0x4f   : > { %955 = vmatpush1.msra.mxu0 %v775_v33  ;;  %v1173_v33 = vld [vmem:[%s4337_s6 + $0x18] sm:$0xff] }
  0x50   : > { %956 = vmatprep.subr.mxu0 %v772_v34 }
  0x51   : > { %957 = vmatpush1.msra.mxu0 %v771_v35  ;;  %v1172_v35 = vld [vmem:[%s4337_s6 + $0x10] sm:$0xff] }
  0x52   : > { %958 = vmatprep.subr.mxu0 %v768_v36 }
  0x53   : > { %959 = vmatpush1.msra.mxu0 %v767_v37  ;;  %v1171_v37 = vld [vmem:[%s4337_s6 + $0x8] sm:$0xff] }
  0x54   : > { %993 = vmatmul.mubr.f32.vlgmr.msra.gmra.mxu0 %v3444_v63  ;;  %2934 = vmatprep.subr.mxu0 %v3121_v5 }
  0x55   : > { %998 = vmatprep.mubr.f32.mxu0 %v3121_v5 }
  0x58   : > { %999 = vmatmul.mubr.f32.gmra.mxu0 %v3464_v4 }
  0x59   : > { %2938 = vmatprep.mubr.msk.f32.mxu0 %vm3122_vm0, %v3121_v5 }
  0xf1   : > { %v917_v43 = vpop.f32.mrf.mxu1 }
  0xf2   : > { %v918_v51 = vadd.f32 %v917_v43, %v834_v46 }
  0xf3   : > { %v3591_v45 = vpop.f32.mrf.mxu1  ;;  %v760_v47 = vpop.f32.mrf.mxu0 }
  0xf4   : > { %v761_v49 = vadd.f32 %v760_v47, %v687_v44  ;;  %v2719_v44 = vld [vmem:[%s4337_s6 + $0xf8] sm:$0xff] }
  0xf5   : > { %v923_v48 = vpop.f32.mrf.mxu1  ;;  %v3606_v53 = vpop.f32.mrf.mxu0 }
  0xf6   : > { %v924_v50 = vadd.f32 %v923_v48, %v834_v46  ;;  %1186 = vrot.lane.b32.xlu1 %v761_v49, %s3123_s29 }
  0xf7   : > { %v3618_v63 = vpop.f32.mrf.mxu1 }
  0xf8   : > { %1190 = vrot.lane.b32.xlu0 %v924_v50, %s3123_s29  ;;  %2921 = vmatpush3.xpose.msk.msra.mxu1 %vm1005_vm1, %v924_v50  ;;  %v2717_v50 = vld [vmem:[%s4337_s6 + $0xe8] sm:$0xff] }
  0xf9   : > { %2922 = vmatprep.subr.mxu1 %v3121_v5 }
  0xfc   : > { %1188 = vrot.lane.b32.xlu0 %v918_v51, %s3123_s29  ;;  %2923 = vmatpush3.xpose.msk.msra.mxu1 %vm1005_vm1, %v918_v51  ;;  %v2716_v51 = vld [vmem:[%s4337_s6 + $0xe0] sm:$0xff] }
  0xfd   : > { %2927 = vmatprep.subr.mxu1 %v3121_v5 }
  0xff   : > { %2925 = vmatmul.mubr.msk.f32.vlgmr.msra.gmra.mxu1 %vm1005_vm1, %v761_v49  ;;  %v2718_v49 = vld [vmem:[%s4337_s6 + $0xf0] sm:$0xff] }
 0x100   : > { %2931 = vmatprep.mubr.msk.f32.mxu1 %vm3122_vm0, %v3121_v5 }
 0x114   : > { %v994_v54 = vpop.f32.mrf.mxu0 }
 0x115   : > { %v995_v58 = vadd.f32 %v994_v54, %v842_v55  ;;  %v2714_v54 = vld [vmem:[%s4337_s6 + $0xd0] sm:$0xff] }
 0x116   : > { %v3609_v56 = vpop.f32.mrf.mxu0 }
 0x118   : > { %v1000_v57 = vpop.f32.mrf.mxu0 }
 0x119   : > { %v1001_v59 = vadd.f32 %v1000_v57, %v842_v55  ;;  %v2713_v55 = vld [vmem:[%s4337_s6 + $0xc8] sm:$0xff]  ;;  %v2712_v57 = vld [vmem:[%s4337_s6 + $0xc0] sm:$0xff] }
 0x11a   : > { %v3621_v4 = vpop.f32.mrf.mxu0 }
 0x11b   : > { %2928 = vmatpush3.msra.mxu1 %v1001_v59 }
 0x11c   : > { %2929 = vmatprep.subr.mxu1 %v3121_v5 }
 0x11d   : > { %2930 = vmatpush3.msra.mxu1 %v995_v58 }
 0x11e   : > { %2941 = vmatprep.subr.mxu1 %v3121_v5 }
 0x168   : > { %v1187_v62 = vpop.permute.xlu1 %1186 }
 0x16a   : > { %v1191_v60 = vpop.permute.xlu0 %1190 }
 0x16b   : > { %2935 = vmatpush3.xpose.msk.msra.mxu0 %vm1005_vm1, %v1191_v60  ;;  %v2709_v60 = vld [vmem:[%s4337_s6 + $0xa8] sm:$0xff] }
 0x16c   : > { %2936 = vmatprep.subr.mxu0 %v3121_v5 }
 0x16e   : > { %v1189_v61 = vpop.permute.xlu0 %1188 }
 0x16f   : > { %2937 = vmatpush3.xpose.msk.msra.mxu0 %vm1005_vm1, %v1189_v61  ;;  %v2708_v61 = vld [vmem:[%s4337_s6 + $0xa0] sm:$0xff] }
 0x170   : > { %1470 = vmatprep.subr.mxu0 %v1185_v20 }
 0x172   : > { %2939 = vmatmul.mubr.msk.f32.vlgmr.msra.gmra.mxu0 %vm1005_vm1, %v1187_v62  ;;  %v2707_v62 = vld [vmem:[%s4337_s6 + $0x98] sm:$0xff] }
 0x173   : > { %1518 = vmatprep.mubr.f32.mxu0 %v3121_v5  ;;  %1471 = vmatpush1.msra.mxu0 %v1184_v21 }
 0x174   : > { %1472 = vmatprep.subr.mxu0 %v1183_v22  ;;  %v2741_v22 = vld [vmem:[%s4337_s6 + $0x178] sm:$0xff] }
 0x175   : > { %1473 = vmatpush1.msra.mxu0 %v1182_v23  ;;  %v2740_v23 = vld [vmem:[%s4337_s6 + $0x170] sm:$0xff] }
 0x176   : > { %1474 = vmatprep.subr.mxu0 %v1181_v24  ;;  %v2739_v24 = vld [vmem:[%s4337_s6 + $0x168] sm:$0xff] }
 0x177   : > { %1475 = vmatpush1.msra.mxu0 %v1180_v25  ;;  %v2738_v25 = vld [vmem:[%s4337_s6 + $0x160] sm:$0xff] }
 0x178   : > { %1476 = vmatprep.subr.mxu0 %v1179_v26  ;;  %v2737_v26 = vld [vmem:[%s4337_s6 + $0x158] sm:$0xff] }
 0x179   : > { %1477 = vmatpush1.msra.mxu0 %v1178_v27  ;;  %v2736_v27 = vld [vmem:[%s4337_s6 + $0x150] sm:$0xff] }
 0x17a   : > { %1478 = vmatprep.subr.mxu0 %v1177_v28  ;;  %v2735_v28 = vld [vmem:[%s4337_s6 + $0x148] sm:$0xff] }
 0x17b   : > { %1479 = vmatpush1.msra.mxu0 %v1176_v29  ;;  %v2734_v29 = vld [vmem:[%s4337_s6 + $0x140] sm:$0xff] }
 0x17c   : > { %1480 = vmatprep.subr.mxu0 %v1175_v30  ;;  %v2733_v30 = vld [vmem:[%s4337_s6 + $0x138] sm:$0xff] }
 0x17d   : > { %1481 = vmatpush1.msra.mxu0 %v1174_v31  ;;  %v2732_v31 = vld [vmem:[%s4337_s6 + $0x130] sm:$0xff] }
 0x17e   : > { %1482 = vmatprep.subr.mxu0 %v1173_v33  ;;  %v2730_v33 = vld [vmem:[%s4337_s6 + $0x120] sm:$0xff] }
 0x17f   : > { %1483 = vmatpush1.msra.mxu0 %v1172_v35  ;;  %v2728_v35 = vld [vmem:[%s4337_s6 + $0x110] sm:$0xff] }
 0x180   : > { %1484 = vmatprep.subr.mxu0 %v1171_v37 }
 0x181   : > { %1485 = vmatpush1.msra.mxu0 %v1170_v38 }
 0x182   : > { %2955 = vmatprep.subr.mxu0 %v3121_v5 }
 0x1bf   : > { %v1081_v0 = vpop.f32.mrf.mxu1 }
 0x1c0   : > { %v1086_v1 = vsel %vm1085_vm2, %v1081_v0, -inf }
 0x1c1   : > { %1087 = vmax.xlane.f32.xlu1 %v1086_v1  ;;  %v2926_v2 = vpop.f32.mrf.mxu1  ;;  %v2705_v1 = vld [vmem:[%s4337_s6 + $0x88] sm:$0xff] }
 0x1c2   : > { %v2704_v2 = vld [vmem:[%s4337_s6 + $0x80] sm:$0xff] }
 0x232   : > { %v1264_v6 = vpop.f32.mrf.mxu0 }
 0x233   : > { %v1268_v7 = vsel %vm1085_vm2, %v1264_v6, -inf }
 0x234   : > { %1269 = vmax.xlane.f32.xlu0 %v1268_v7  ;;  %v2940_v8 = vpop.f32.mrf.mxu0 }
 0x24a   : > { %v1088_v9 = vpop.xlane.xlu1 %1087 }
 0x24b   : > { %v1089_v10 = vsub.f32 %v1081_v0, %v1088_v9  ;;  %v2706_v0 = vld [vmem:[%s4337_s6 + $0x90] sm:$0xff] }
 0x24d   : > { %v1090_v11 = vmul.f32 1.442695, %v1089_v10 }
 0x24f   : > { %3092 = vpow2.f32 %v1090_v11 }
 0x25c   : > { %v3093_v12 = vpop.eup %3092 }
 0x25d   : > { %v1092_v13 = vsel %vm1085_vm2, %v3093_v12, 0.0 }
 0x25e   : > { %1093 = vadd.xlane.f32.xlu0 %v1092_v13 }
 0x274   : > { %1283 = vrot.lane.b32.xlu0 %v1001_v59, %s3123_s29  ;;  %v2710_v59 = vld [vmem:[%s4337_s6 + $0xb0] sm:$0xff] }
 0x2bd   : > { %v1270_v14 = vpop.xlane.xlu0 %1269 }
 0x2be   : > { %v1271_v15 = vsub.f32 %v1264_v6, %v1270_v14  ;;  %v845_v6 = vsub.s32 3, %v3574_v39 }
 0x2c0   : > { %v1272_v16 = vmul.f32 1.442695, %v1271_v15  ;;  %v846_v7 = vrot.slane %v3587_v42, %v845_v6 }
 0x2c2   : > { %3094 = vpow2.f32 %v1272_v16  ;;  %v3735_v8 = vadd.f32 %v3621_v4, %v846_v7  ;;  %v3739_v10 = vadd.f32 %v3609_v56, %v846_v7  ;;  %v3748_v4 = vsub.s32 1, %v3574_v39 }
 0x2c4   : > { %v691_v15 = vrot.slane %v3579_v40, %v3748_v4 }
 0x2cf   : > { %v3095_v17 = vpop.eup %3094 }
 0x2d0   : > { %v1274_v18 = vsel %vm1085_vm2, %v3095_v17, 0.0 }
 0x2d1   : > { %1275 = vadd.xlane.f32.xlu1 %v1274_v18 }
 0x2e2   : > { %1281 = vrot.lane.b32.xlu1 %v995_v58, %s3123_s29  ;;  %v2711_v58 = vld [vmem:[%s4337_s6 + $0xb8] sm:$0xff] }
 0x2e7   : > { %v1094_v19 = vpop.xlane.xlu0 %1093 }
 0x2e8   : > { %3096 = vrcp.f32 %v1094_v19 }
 0x2eb   : > { %v1284_v36 = vpop.permute.xlu0 %1283 }
 0x2f5   : > { %v3097_v32 = vpop.eup %3096 }
 0x2f6   : > { %v1096_v34 = vmul.f32 %v3097_v32, %v3093_v12  ;;  %v838_v12 = vrot.slane %v3587_v42, %v3748_v4  ;;  %v763_v42 = vadd.f32 %v3606_v53, %v691_v15  ;;  %v2731_v32 = vld [vmem:[%s4337_s6 + $0x128] sm:$0xff]  ;;  %v2753_v15 = vld [vmem:[%s4337_s6 + $0x1b0] sm:$0xff] }
 0x2f8   : > { %2932 = vmatmul.mubr.msk.f32.vlgmr.msra.gmra.mxu1 %vm1085_vm2, %v1096_v34  ;;  %v926_v56 = vadd.f32 %v3618_v63, %v838_v12  ;;  %v920_v39 = vadd.f32 %v3591_v45, %v838_v12  ;;  %v2729_v34 = vld [vmem:[%s4337_s6 + $0x118] sm:$0xff] }
 0x2f9   : > { %2942 = vmatpush3.msra.mxu1 %v1284_v36  ;;  %2945 = vmatprep.mubr.msk.f32.mxu1 %vm3122_vm0, %v3121_v5  ;;  %v2727_v36 = vld [vmem:[%s4337_s6 + $0x108] sm:$0xff]  ;;  %v2758_v12 = vld [vmem:[%s4337_s6 + $0x1d8] sm:$0xff] }
 0x2fa   : > { %2943 = vmatprep.subr.mxu1 %v3121_v5 }
 0x35a   : > { %v1276_v43 = vpop.xlane.xlu1 %1275 }
 0x35b   : > { %3098 = vrcp.f32 %v1276_v43 }
 0x35e   : > { %v1282_v46 = vpop.permute.xlu1 %1281 }
 0x35f   : > { %2944 = vmatpush3.msra.mxu1 %v1282_v46 }
 0x360   : > { %1396 = vmatprep.subr.mxu1 %v2719_v44 }
 0x368   : > { %v3099_v47 = vpop.eup %3098 }
 0x369   : > { %v1278_v48 = vmul.f32 %v3099_v47, %v3095_v17 }
 0x36b   : > { %2946 = vmatmul.mubr.msk.f32.vlgmr.msra.gmra.mxu1 %vm1085_vm2, %v1278_v48  ;;  %v2726_v48 = vld [vmem:[%s4337_s6 + $0x100] sm:$0xff] }
 0x36c   : > { %1397 = vmatpush1.msra.mxu1 %v2718_v49  ;;  %1444 = vmatprep.mubr.f32.mxu1 %v3121_v5 }
 0x36d   : > { %1398 = vmatprep.subr.mxu1 %v2717_v50 }
 0x36e   : > { %1399 = vmatpush1.msra.mxu1 %v2716_v51 }
 0x36f   : > { %1400 = vmatprep.subr.mxu1 %v2715_v52 }
 0x370   : > { %1401 = vmatpush1.msra.mxu1 %v2714_v54 }
 0x371   : > { %1402 = vmatprep.subr.mxu1 %v2713_v55 }
 0x372   : > { %1403 = vmatpush1.msra.mxu1 %v2712_v57 }
 0x373   : > { %1404 = vmatprep.subr.mxu1 %v2711_v58 }
 0x374   : > { %1405 = vmatpush1.msra.mxu1 %v2710_v59 }
 0x375   : > { %1406 = vmatprep.subr.mxu1 %v2709_v60 }
 0x376   : > { %1407 = vmatpush1.msra.mxu1 %v2708_v61 }
 0x377   : > { %1408 = vmatprep.subr.mxu1 %v2707_v62 }
 0x378   : > { %1409 = vmatpush1.msra.mxu1 %v2706_v0 }
 0x379   : > { %1410 = vmatprep.subr.mxu1 %v2705_v1 }
 0x37a   : > { %1411 = vmatpush1.msra.mxu1 %v2704_v2  ;;  %v2762_v2 = vld [vmem:[%s4337_s6 + $0x1f8] sm:$0xff] }
 0x37b   : > { %2948 = vmatprep.subr.mxu1 %v3121_v5 }
 0x3b8   : > { %v1166_v9 = vpop.f32.mrf.mxu1 }
 0x3b9   : > { %2721 = vmatmul.mubr.msk.f32.vlgmr.msra.gmra.mxu0 %vm1005_vm1, %v1166_v9  ;;  %v2761_v9 = vld [vmem:[%s4337_s6 + $0x1f0] sm:$0xff] }
 0x3ba   : > { %2956 = vmatpush3.msra.mxu0 %v3735_v8  ;;  %v2933_v11 = vpop.f32.mrf.mxu1  ;;  %2959 = vmatprep.mubr.msk.f32.mxu0 %vm3122_vm0, %v3121_v5 }
 0x3bb   : > { %2957 = vmatprep.subr.mxu0 %v3121_v5  ;;  %v2760_v11 = vld [vmem:[%s4337_s6 + $0x1e8] sm:$0xff] }
 0x3bc   : > { %2958 = vmatpush3.msra.mxu0 %v3739_v10 }
 0x3bd   : > { %2962 = vmatprep.subr.mxu0 %v3121_v5 }
 0x42b   : > { %v1356_v13 = vpop.f32.mrf.mxu1 }
 0x42c   : > { %2720 = vmatmul.mubr.msk.f32.vlgmr.msra.gmra.mxu1 %vm1005_vm1, %v1356_v13  ;;  %v2756_v13 = vld [vmem:[%s4337_s6 + $0x1c8] sm:$0xff] }
 0x42d   : > { %2949 = vmatpush3.xpose.msk.msra.mxu1 %vm1005_vm1, %v926_v56  ;;  %v2947_v14 = vpop.f32.mrf.mxu1  ;;  %2952 = vmatprep.mubr.msk.f32.mxu1 %vm3122_vm0, %v3121_v5 }
 0x42e   : > { %2950 = vmatprep.subr.mxu1 %v3121_v5  ;;  %v2755_v14 = vld [vmem:[%s4337_s6 + $0x1c0] sm:$0xff] }
 0x431   : > { %2951 = vmatpush3.xpose.msk.msra.mxu1 %vm1005_vm1, %v920_v39 }
 0x432   : > { %1724 = vmatprep.subr.mxu1 %v2741_v22  ;;  %v2076_v22 = vld [vmem:[%s4339_s8 + $0x70] sm:$0xff] }
 0x434   : > { %2953 = vmatmul.mubr.msk.f32.vlgmr.msra.gmra.mxu1 %vm1005_vm1, %v763_v42 }
 0x435   : > { %1772 = vmatprep.mubr.f32.mxu1 %v3121_v5  ;;  %1725 = vmatpush1.msra.mxu1 %v2740_v23  ;;  %v2091_v23 = vld [vmem:[%s4339_s8 + $0xe8] sm:$0xff] }
 0x436   : > { %1726 = vmatprep.subr.mxu1 %v2739_v24  ;;  %v2075_v24 = vld [vmem:[%s4339_s8 + $0x68] sm:$0xff] }
 0x437   : > { %1727 = vmatpush1.msra.mxu1 %v2738_v25  ;;  %v2090_v25 = vld [vmem:[%s4339_s8 + $0xe0] sm:$0xff] }
 0x438   : > { %1728 = vmatprep.subr.mxu1 %v2737_v26  ;;  %v2074_v26 = vld [vmem:[%s4339_s8 + $0x60] sm:$0xff] }
 0x439   : > { %1729 = vmatpush1.msra.mxu1 %v2736_v27  ;;  %v2089_v27 = vld [vmem:[%s4339_s8 + $0xd8] sm:$0xff] }
 0x43a   : > { %1730 = vmatprep.subr.mxu1 %v2735_v28  ;;  %v2073_v28 = vld [vmem:[%s4339_s8 + $0x58] sm:$0xff] }
 0x43b   : > { %1731 = vmatpush1.msra.mxu1 %v2734_v29  ;;  %v2088_v29 = vld [vmem:[%s4339_s8 + $0xd0] sm:$0xff] }
 0x43c   : > { %1732 = vmatprep.subr.mxu1 %v2733_v30  ;;  %v2072_v30 = vld [vmem:[%s4339_s8 + $0x50] sm:$0xff] }
 0x43d   : > { %1733 = vmatpush1.msra.mxu1 %v2732_v31  ;;  %v2087_v31 = vld [vmem:[%s4339_s8 + $0xc8] sm:$0xff] }
 0x43e   : > { %1734 = vmatprep.subr.mxu1 %v2731_v32  ;;  %v2071_v32 = vld [vmem:[%s4339_s8 + $0x48] sm:$0xff] }
 0x43f   : > { %1735 = vmatpush1.msra.mxu1 %v2730_v33  ;;  %v2086_v33 = vld [vmem:[%s4339_s8 + $0xc0] sm:$0xff] }
 0x440   : > { %1736 = vmatprep.subr.mxu1 %v2729_v34  ;;  %v2070_v34 = vld [vmem:[%s4339_s8 + $0x40] sm:$0xff] }
 0x441   : > { %1737 = vmatpush1.msra.mxu1 %v2728_v35  ;;  %v2085_v35 = vld [vmem:[%s4339_s8 + $0xb8] sm:$0xff] }
 0x442   : > { %1738 = vmatprep.subr.mxu1 %v2727_v36  ;;  %v2069_v36 = vld [vmem:[%s4339_s8 + $0x38] sm:$0xff] }
 0x443   : > { %1739 = vmatpush1.msra.mxu1 %v2726_v48 }
 0x479   : > { %v3832_v49 = vpop.f32.mrf.mxu0 }
 0x47b   : > { %v3834_v50 = vpop.f32.mrf.mxu0 }
 0x4ec   : > { %v3765_v63 = vpop.f32.mrf.mxu1 }
 0x4ee   : > { %v3767_v16 = vpop.f32.mrf.mxu1 }
 0x4f4   : > { %v1600_v17 = vpop.f32.mrf.mxu1 }
 0x4f5   : > { %v1604_v18 = vsel %vm1085_vm2, %v1600_v17, -inf }
 0x4f6   : > { %1605 = vmax.xlane.f32.xlu1 %v1604_v18  ;;  %v2954_v40 = vpop.f32.mrf.mxu1  ;;  %v2749_v18 = vld [vmem:[%s4337_s6 + $0x190] sm:$0xff] }
 0x4f7   : > { %v2748_v40 = vld [vmem:[%s4337_s6 + $0x188] sm:$0xff] }
 0x507   : > { %1783 = vrot.lane.b32.xlu1 %v920_v39, %s3123_s29  ;;  %v2752_v39 = vld [vmem:[%s4337_s6 + $0x1a8] sm:$0xff] }
 0x50b   : > { %1781 = vrot.lane.b32.xlu1 %v763_v42, %s3123_s29  ;;  %v2751_v42 = vld [vmem:[%s4337_s6 + $0x1a0] sm:$0xff] }
 0x57f   : > { %v1606_v45 = vpop.xlane.xlu1 %1605 }
 0x580   : > { %v1607_v19 = vsub.f32 %v1600_v17, %v1606_v45  ;;  %v2750_v17 = vld [vmem:[%s4337_s6 + $0x198] sm:$0xff]  ;;  %v2747_v45 = vld [vmem:[%s4337_s6 + $0x180] sm:$0xff] }
 0x582   : > { %v1608_v53 = vmul.f32 1.442695, %v1607_v19  ;;  %v3894_v19 = vld [vmem:[#allocation2] sm:$0xff] }
 0x583   : > { %v1784_v46 = vpop.permute.xlu1 %1783 }
 0x584   : > { %3100 = vpow2.f32 %v1608_v53  ;;  %v2093_v53 = vld [vmem:[%s4339_s8 + $0xf8] sm:$0xff] }
 0x585   : > { %2799 = vmatprep.subr.mxu1 %v2093_v53 }
 0x587   : > { %v1782_v47 = vpop.permute.xlu1 %1781 }
 0x591   : > { %v3101_v20 = vpop.eup %3100 }
 0x592   : > { %v1610_v21 = vsel %vm1085_vm2, %v3101_v20, 0.0 }
 0x593   : > { %1611 = vadd.xlane.f32.xlu0 %v1610_v21  ;;  %v2092_v21 = vld [vmem:[%s4339_s8 + $0xf0] sm:$0xff] }
 0x5a9   : > { %1785 = vrot.lane.b32.xlu0 %v926_v56, %s3123_s29  ;;  %v2757_v56 = vld [vmem:[%s4337_s6 + $0x1d0] sm:$0xff] }
 0x61c   : > { %v1612_v37 = vpop.xlane.xlu0 %1611 }
 0x61d   : > { %3102 = vrcp.f32 %v1612_v37  ;;  %v2084_v37 = vld [vmem:[%s4339_s8 + $0xb0] sm:$0xff] }
 0x620   : > { %v1786_v44 = vpop.permute.xlu0 %1785 }
 0x62a   : > { %v3103_v38 = vpop.eup %3102 }
 0x62b   : > { %v1614_v43 = vmul.f32 %v3103_v38, %v3101_v20  ;;  %v2077_v20 = vld [vmem:[%s4339_s8 + $0x78] sm:$0xff]  ;;  %v2068_v38 = vld [vmem:[%s4339_s8 + $0x30] sm:$0xff] }
 0x62d   : > { %2960 = vmatmul.mubr.msk.f32.vlgmr.msra.gmra.mxu0 %vm1085_vm2, %v1614_v43  ;;  %v2083_v43 = vld [vmem:[%s4339_s8 + $0xa8] sm:$0xff] }
 0x62e   : > { %2963 = vmatpush3.xpose.msk.msra.mxu0 %vm1005_vm1, %v1786_v44  ;;  %2966 = vmatprep.mubr.msk.f32.mxu0 %vm3122_vm0, %v3121_v5  ;;  %v2067_v44 = vld [vmem:[%s4339_s8 + $0x28] sm:$0xff] }
 0x62f   : > { %2964 = vmatprep.subr.mxu0 %v3121_v5 }
 0x632   : > { %2965 = vmatpush3.xpose.msk.msra.mxu0 %vm1005_vm1, %v1784_v46  ;;  %v2082_v46 = vld [vmem:[%s4339_s8 + $0xa0] sm:$0xff] }
 0x633   : > { %2969 = vmatprep.subr.mxu0 %v3121_v5 }
 0x635   : > { %2967 = vmatmul.mubr.msk.f32.vlgmr.msra.gmra.mxu0 %vm1005_vm1, %v1782_v47  ;;  %v2066_v47 = vld [vmem:[%s4339_s8 + $0x20] sm:$0xff] }
 0x636   : > { %2973 = vmatprep.mubr.msk.f32.mxu0 %vm3122_vm0, %v3121_v5 }
 0x6ed   : > { %v1684_v51 = vpop.f32.mrf.mxu0 }
 0x6ee   : > { %2742 = vmatmul.mubr.msk.f32.vlgmr.msra.gmra.mxu1 %vm1005_vm1, %v1684_v51 }
 0x6ef   : > { %v2961_v52 = vpop.f32.mrf.mxu0  ;;  %2800 = vmatpush3.msra.mxu1 %v2077_v20  ;;  %v2212_v20 = vld [vmem:[%s4341_s10 + $0x58] sm:$0xff] }
 0x6f0   : > { %2801 = vmatprep.subr.mxu1 %v2092_v21  ;;  %v2081_v52 = vld [vmem:[%s4339_s8 + $0x98] sm:$0xff]  ;;  %v2211_v21 = vld [vmem:[%s4341_s10 + $0x50] sm:$0xff] }
 0x6f1   : > { %2802 = vmatpush3.msra.mxu1 %v2076_v22  ;;  %v2210_v22 = vld [vmem:[%s4341_s10 + $0x48] sm:$0xff] }
 0x6f2   : > { %2803 = vmatprep.subr.mxu1 %v2091_v23  ;;  %v2209_v23 = vld [vmem:[%s4341_s10 + $0x40] sm:$0xff] }
 0x6f3   : > { %2804 = vmatpush3.msra.mxu1 %v2075_v24  ;;  %v2208_v24 = vld [vmem:[%s4341_s10 + $0x38] sm:$0xff] }
 0x6f4   : > { %2805 = vmatprep.subr.mxu1 %v2090_v25  ;;  %v2207_v25 = vld [vmem:[%s4341_s10 + $0x30] sm:$0xff] }
 0x6f5   : > { %v1859_v54 = vpop.f32.mrf.mxu0  ;;  %2806 = vmatpush3.msra.mxu1 %v2074_v26  ;;  %v2206_v26 = vld [vmem:[%s4341_s10 + $0x28] sm:$0xff] }
 0x6f6   : > { %v1863_v55 = vsel %vm1085_vm2, %v1859_v54, -inf  ;;  %2807 = vmatprep.subr.mxu1 %v2089_v27  ;;  %v2205_v27 = vld [vmem:[%s4341_s10 + $0x20] sm:$0xff] }
 0x6f7   : > { %1864 = vmax.xlane.f32.xlu0 %v1863_v55  ;;  %v2968_v57 = vpop.f32.mrf.mxu0  ;;  %2808 = vmatpush3.msra.mxu1 %v2073_v28  ;;  %v2080_v55 = vld [vmem:[%s4339_s8 + $0x90] sm:$0xff]  ;;  %v2204_v28 = vld [vmem:[%s4341_s10 + $0x18] sm:$0xff] }
 0x6f8   : > { %2809 = vmatprep.subr.mxu1 %v2088_v29  ;;  %v2064_v57 = vld [vmem:[%s4339_s8 + $0x10] sm:$0xff] }
 0x6f9   : > { %2810 = vmatpush3.msra.mxu1 %v2072_v30  ;;  %v2203_v29 = vld [vmem:[%s4341_s10 + $0x10] sm:$0xff]  ;;  %v2202_v30 = vld [vmem:[%s4341_s10 + $0x8] sm:$0xff] }
 0x6fa   : > { %2811 = vmatprep.subr.mxu1 %v2087_v31  ;;  %v2201_v31 = vld [vmem:[%s4341_s10] sm:$0xff] }
 0x6fb   : > { %2812 = vmatpush3.msra.mxu1 %v2071_v32 }
 0x6fc   : > { %2813 = vmatprep.subr.mxu1 %v2086_v33 }
 0x6fd   : > { %2814 = vmatpush3.msra.mxu1 %v2070_v34 }
 0x6fe   : > { %2815 = vmatprep.subr.mxu1 %v2085_v35 }
 0x6ff   : > { %2816 = vmatpush3.msra.mxu1 %v2069_v36  ;;  %v2765_v36 = vld [vmem:[%s4343_s12] ss:$0 sm:$0xff] }
 0x700   : > { %2817 = vmatprep.subr.mxu1 %v2084_v37 }
 0x701   : > { %2818 = vmatpush3.msra.mxu1 %v2068_v38  ;;  %v2766_v38 = vld [vmem:[%s4344_s13] ss:$0 sm:$0xff] }
 0x702   : > { %2819 = vmatprep.subr.mxu1 %v2083_v43 }
 0x703   : > { %2820 = vmatpush3.msra.mxu1 %v2067_v44 }
 0x704   : > { %2821 = vmatprep.subr.mxu1 %v2082_v46  ;;  %v2767_v46 = vld [vmem:[%s4342_s11] ss:$0 sm:$0xff] }
 0x705   : > { %2822 = vmatpush3.msra.mxu1 %v2066_v47 }
 0x706   : > { %2823 = vmatprep.subr.mxu1 %v2081_v52 }
 0x70d   : > { %1878 = vrot.lane.b32.xlu0 %v3735_v8, %s3123_s29 }
 0x780   : > { %v1865_v58 = vpop.xlane.xlu0 %1864 }
 0x781   : > { %v1866_v59 = vsub.f32 %v1859_v54, %v1865_v58  ;;  %v2065_v54 = vld [vmem:[%s4339_s8 + $0x18] sm:$0xff]  ;;  %v2079_v58 = vld [vmem:[%s4339_s8 + $0x88] sm:$0xff] }
 0x782   : > { %2824 = vmatpush3.msra.mxu1 %v2065_v54 }
 0x783   : > { %v1867_v60 = vmul.f32 1.442695, %v1866_v59  ;;  %2825 = vmatprep.subr.mxu1 %v2080_v55  ;;  %v2063_v59 = vld [vmem:[%s4339_s8 + $0x8] sm:$0xff] }
 0x784   : > { %v1879_v61 = vpop.permute.xlu0 %1878  ;;  %2826 = vmatpush3.msra.mxu1 %v2064_v57 }
 0x785   : > { %3104 = vpow2.f32 %v1867_v60  ;;  %2970 = vmatpush3.msra.mxu0 %v1879_v61  ;;  %2827 = vmatprep.subr.mxu1 %v2079_v58  ;;  %v2078_v60 = vld [vmem:[%s4339_s8 + $0x80] sm:$0xff] }
 0x786   : > { %2971 = vmatprep.subr.mxu0 %v3121_v5  ;;  %2828 = vmatpush3.msra.mxu1 %v2063_v59  ;;  %v2062_v61 = vld [vmem:[%s4339_s8] sm:$0xff] }
 0x787   : > { %2829 = vmatprep.subr.mxu1 %v2078_v60  ;;  %v2360_v60 = vld [vmem:[%s4347_s16 + $0xf8] sm:$0xff] }
 0x788   : > { %2830 = vmatpush3.msra.mxu1 %v2062_v61  ;;  %v2376_v61 = vld [vmem:[%s4347_s16 + $0x178] sm:$0xff] }
 0x789   : > { %2851 = vmatprep.subr.mxu1 %v2360_v60  ;;  %v2538_v60 = vld [vmem:[%s4349_s18 + $0x58] sm:$0xff] }
 0x792   : > { %v3105_v62 = vpop.eup %3104 }
 0x793   : > { %v1869_v0 = vsel %vm1085_vm2, %v3105_v62, 0.0 }
 0x794   : > { %1870 = vadd.xlane.f32.xlu1 %v1869_v0  ;;  %v1521_v0 = vadd.f32 %v3832_v49, %v3765_v63 }
 0x7a5   : > { %1876 = vrot.lane.b32.xlu1 %v3739_v10, %s3123_s29  ;;  %v2759_v10 = vld [vmem:[%s4337_s6 + $0x1e0] sm:$0xff] }
 0x81d   : > { %v1871_v1 = vpop.xlane.xlu1 %1870 }
 0x81e   : > { %3106 = vrcp.f32 %v1871_v1 }
 0x821   : > { %v1877_v6 = vpop.permute.xlu1 %1876 }
 0x822   : > { %2972 = vmatpush3.msra.mxu0 %v1877_v6  ;;  %v2048_v6 = vld [vmem:[%s4338_s7] sm:$0x3] }
 0x823   : > { %1991 = vmatprep.subr.mxu0 %v2762_v2  ;;  %v1523_v2 = vadd.f32 %v3834_v50, %v3767_v16  ;;  %v2764_v16 = vld [vmem:[%s4340_s9] ss:$0 sm:$0xff] }
 0x82b   : > { %v3107_v7 = vpop.eup %3106 }
 0x82c   : > { %v1873_v8 = vmul.f32 %v3107_v7, %v3105_v62  ;;  %v1774_v62 = vpop.f32.mrf.mxu1 }
 0x82d   : > { %v1779_v7 = vadd.f32 %v1774_v62, %v1521_v0  ;;  %v2344_v62 = vld [vmem:[%s4347_s16 + $0x78] sm:$0xff]  ;;  %v2359_v0 = vld [vmem:[%s4347_s16 + $0xf0] sm:$0xff] }
 0x82e   : > { %2974 = vmatmul.mubr.msk.f32.vlgmr.msra.gmra.mxu0 %vm1085_vm2, %v1873_v8  ;;  %v1776_v1 = vpop.f32.mrf.mxu1 }
 0x82f   : > { %1992 = vmatpush1.msra.mxu0 %v2761_v9  ;;  %2039 = vmatprep.mubr.f32.mxu0 %v3121_v5  ;;  %v2754_v5 = vld [vmem:[%s4337_s6 + $0x1b8] sm:$0xff]  ;;  %v1780_v9 = vadd.f32 %v1776_v1, %v1523_v2  ;;  %v2375_v1 = vld [vmem:[%s4347_s16 + $0x170] sm:$0xff] }
 0x830   : > { %1993 = vmatprep.subr.mxu0 %v2760_v11  ;;  %v2057_v11 = vrot.slane %v2048_v6, %v3748_v4  ;;  %v2343_v2 = vld [vmem:[%s4347_s16 + $0x70] sm:$0xff] }
 0x831   : > { %1994 = vmatpush1.msra.mxu0 %v2759_v10 }
 0x832   : > { %1995 = vmatprep.subr.mxu0 %v2758_v12  ;;  %v2053_v12 = vrot.slane %v2048_v6, %v3582_v41  ;;  %v2216_v41 = vld [vmem:[%s4341_s10 + $0x78] sm:$0xff]  ;;  %v2358_v6 = vld [vmem:[%s4347_s16 + $0xe8] sm:$0xff] }
 0x833   : > { %1996 = vmatpush1.msra.mxu0 %v2757_v56 }
 0x834   : > { %1997 = vmatprep.subr.mxu0 %v2756_v13 }
 0x835   : > { %1998 = vmatpush1.msra.mxu0 %v2755_v14 }
 0x836   : > { %1999 = vmatprep.subr.mxu0 %v2754_v5 }
 0x837   : > { %2000 = vmatpush1.msra.mxu0 %v2753_v15 }
 0x838   : > { %2001 = vmatprep.subr.mxu0 %v2752_v39 }
 0x839   : > { %2002 = vmatpush1.msra.mxu0 %v2751_v42  ;;  %v2215_v42 = vld [vmem:[%s4341_s10 + $0x70] sm:$0xff] }
 0x83a   : > { %2003 = vmatprep.subr.mxu0 %v2750_v17  ;;  %v2214_v17 = vld [vmem:[%s4341_s10 + $0x68] sm:$0xff] }
 0x83b   : > { %2004 = vmatpush1.msra.mxu0 %v2749_v18 }
 0x83c   : > { %2005 = vmatprep.subr.mxu0 %v2748_v40 }
 0x83d   : > { %2006 = vmatpush1.msra.mxu0 %v2747_v45 }
 0x83e   : > { %2976 = vmatprep.subr.mxu0 %v3894_v19 }
 0x8ee   : > { %v1951_v48 = vpop.f32.mrf.mxu0 }
 0x8ef   : > { %2763 = vmatmul.mubr.msk.f32.vlgmr.msra.gmra.mxu0 %vm1005_vm1, %v1951_v48 }
 0x8f0   : > { %v2975_v51 = vpop.f32.mrf.mxu0  ;;  %3008 = vmatprep.mubr.msk.f32.mxu0 %vm3122_vm0, %v3894_v19  ;;  %2977 = vmatpush3.msra.mxu0 %v2216_v41  ;;  %v2352_v41 = vld [vmem:[%s4347_s16 + $0xb8] sm:$0xff] }
 0x8f1   : > { %2978 = vmatprep.subr.mxu0 %v3894_v19 }
 0x8f2   : > { %2979 = vmatpush3.msra.mxu0 %v2215_v42  ;;  %v2368_v42 = vld [vmem:[%s4347_s16 + $0x138] sm:$0xff] }
 0x8f3   : > { %2980 = vmatprep.subr.mxu0 %v3894_v19 }
 0x8f4   : > { %2981 = vmatpush3.msra.mxu0 %v2214_v17  ;;  %v2336_v17 = vld [vmem:[%s4347_s16 + $0x38] sm:$0xff] }
 0x8f5   : > { %2982 = vmatprep.subr.mxu0 %v3894_v19 }
 0x9af   : > { %v2041_v8 = vpop.f32.mrf.mxu0 }
 0x9b0   : > { %v2046_v10 = vadd.f32 %v2041_v8, %v1779_v7  ;;  %v2374_v7 = vld [vmem:[%s4347_s16 + $0x168] sm:$0xff] }
 0x9b1   : > { %v2043_v56 = vpop.f32.mrf.mxu0  ;;  %v2342_v8 = vld [vmem:[%s4347_s16 + $0x68] sm:$0xff] }
 0x9b2   : > { %v2047_v13 = vadd.f32 %v2043_v56, %v1780_v9  ;;  %v2060_v63 = vadd.f32 %v2053_v12, %v2046_v10  ;;  %v2357_v9 = vld [vmem:[%s4347_s16 + $0xe0] sm:$0xff]  ;;  %v2356_v12 = vld [vmem:[%s4347_s16 + $0xd8] sm:$0xff] }
 0x9b3   : > { %v2341_v10 = vld [vmem:[%s4347_s16 + $0x60] sm:$0xff]  ;;  %v2372_v56 = vld [vmem:[%s4347_s16 + $0x158] sm:$0xff] }
 0x9b4   : > { %v2061_v14 = vadd.f32 %v2057_v11, %v2047_v13  ;;  %v2373_v11 = vld [vmem:[%s4347_s16 + $0x160] sm:$0xff]  ;;  %v2340_v13 = vld [vmem:[%s4347_s16 + $0x58] sm:$0xff] }
 0x9b6   : > { %2165 = vmatprep.mubr.f32.mxu1 %v2061_v14  ;;  %v2355_v14 = vld [vmem:[%s4347_s16 + $0xd0] sm:$0xff] }
 0x9b7   : > { %2166 = vmatmul.mubr.f32.vlgmr.msra.gmra.mxu1 %v2060_v63  ;;  %v2371_v63 = vld [vmem:[%s4347_s16 + $0x150] sm:$0xff] }
 0x9b8   : > { %2852 = vmatpush3.msra.mxu1 %v2344_v62  ;;  %v2536_v62 = vld [vmem:[%s4349_s18 + $0x48] sm:$0xff] }
 0x9b9   : > { %2853 = vmatprep.subr.mxu1 %v2359_v0  ;;  %v2535_v0 = vld [vmem:[%s4349_s18 + $0x40] sm:$0xff] }
 0x9ba   : > { %2854 = vmatpush3.msra.mxu1 %v2343_v2  ;;  %v2533_v2 = vld [vmem:[%s4349_s18 + $0x30] sm:$0xff] }
 0x9bb   : > { %2855 = vmatprep.subr.mxu1 %v2358_v6  ;;  %v2532_v6 = vld [vmem:[%s4349_s18 + $0x28] sm:$0xff] }
 0x9bc   : > { %2856 = vmatpush3.msra.mxu1 %v2342_v8  ;;  %v2530_v8 = vld [vmem:[%s4349_s18 + $0x18] sm:$0xff] }
 0x9bd   : > { %2857 = vmatprep.subr.mxu1 %v2357_v9  ;;  %v2529_v9 = vld [vmem:[%s4349_s18 + $0x10] sm:$0xff] }
 0x9be   : > { %2858 = vmatpush3.msra.mxu1 %v2341_v10  ;;  %v2527_v10 = vld [vmem:[%s4349_s18] sm:$0xff] }
 0x9bf   : > { %2859 = vmatprep.subr.mxu1 %v2356_v12 }
 0x9c0   : > { %2860 = vmatpush3.msra.mxu1 %v2340_v13 }
 0x9c1   : > { %2861 = vmatprep.subr.mxu1 %v2355_v14  ;;  %v2770_v14 = vld [vmem:[%s4348_s17] ss:$0 sm:$0xff] }
 0xa77   : > { %v2831_v49 = vpop.f32.mrf.mxu1 }
 0xa79   : > { %v2832_v50 = vpop.f32.mrf.mxu1 }
 0xa7a   : > { %v2833_v5 = vadd.f32 %v2832_v50, %v2831_v49  ;;  %v2339_v49 = vld [vmem:[%s4347_s16 + $0x50] sm:$0xff]  ;;  %v2370_v50 = vld [vmem:[%s4347_s16 + $0x148] sm:$0xff] }
 0xa7b   : > { %2862 = vmatpush3.msra.mxu1 %v2339_v49 }
 0xa7c   : > { %v2168_v15 = vadd.f32 %v2833_v5, %v2764_v16  ;;  %v2354_v16 = vld [vmem:[%s4347_s16 + $0xc8] sm:$0xff] }
 0xa7d   : > { %2863 = vmatprep.subr.mxu1 %v2354_v16  ;;  %v2338_v5 = vld [vmem:[%s4347_s16 + $0x48] sm:$0xff] }
 0xa7e   : > { %v2171_v39 = vadd.f32 %v2168_v15, %v3461_v3  ;;  %v2213_v3 = vld [vmem:[%s4341_s10 + $0x60] sm:$0xff]  ;;  %2864 = vmatpush3.msra.mxu1 %v2338_v5 }
 0xa7f   : > { %2983 = vmatpush3.msra.mxu0 %v2213_v3  ;;  %v2353_v15 = vld [vmem:[%s4347_s16 + $0xc0] sm:$0xff]  ;;  %v2351_v3 = vld [vmem:[%s4347_s16 + $0xb0] sm:$0xff] }
 0xa80   : > { %v2172_v4 = vmax.f32 %v2171_v39, 0.0  ;;  %2984 = vmatprep.subr.mxu0 %v3894_v19  ;;  %2865 = vmatprep.subr.mxu1 %v2353_v15  ;;  %v2369_v39 = vld [vmem:[%s4347_s16 + $0x140] sm:$0xff] }
 0xa81   : > { %2985 = vmatpush3.msra.mxu0 %v2212_v20  ;;  %v2334_v20 = vld [vmem:[%s4347_s16 + $0x28] sm:$0xff] }
 0xa82   : > { %2175 = vadd.xlane.f32.xlu0 %v2172_v4  ;;  %2986 = vmatprep.subr.mxu0 %v3894_v19 }
 0xa83   : > { %2987 = vmatpush3.msra.mxu0 %v2211_v21  ;;  %v2349_v21 = vld [vmem:[%s4347_s16 + $0xa0] sm:$0xff] }
 0xa84   : > { %2988 = vmatprep.subr.mxu0 %v3894_v19 }
 0xa85   : > { %2989 = vmatpush3.msra.mxu0 %v2210_v22  ;;  %v2365_v22 = vld [vmem:[%s4347_s16 + $0x120] sm:$0xff] }
 0xa86   : > { %2990 = vmatprep.subr.mxu0 %v3894_v19 }
 0xa87   : > { %2991 = vmatpush3.msra.mxu0 %v2209_v23  ;;  %v2333_v23 = vld [vmem:[%s4347_s16 + $0x20] sm:$0xff] }
 0xa88   : > { %2992 = vmatprep.subr.mxu0 %v3894_v19 }
 0xa89   : > { %2993 = vmatpush3.msra.mxu0 %v2208_v24  ;;  %v2348_v24 = vld [vmem:[%s4347_s16 + $0x98] sm:$0xff] }
 0xa8a   : > { %2994 = vmatprep.subr.mxu0 %v3894_v19 }
 0xa8b   : > { %2995 = vmatpush3.msra.mxu0 %v2207_v25  ;;  %v2364_v25 = vld [vmem:[%s4347_s16 + $0x118] sm:$0xff] }
 0xa8c   : > { %2996 = vmatprep.subr.mxu0 %v3894_v19 }
 0xa8d   : > { %2997 = vmatpush3.msra.mxu0 %v2206_v26  ;;  %v2332_v26 = vld [vmem:[%s4347_s16 + $0x18] sm:$0xff] }
 0xa8e   : > { %2998 = vmatprep.subr.mxu0 %v3894_v19 }
 0xa8f   : > { %2999 = vmatpush3.msra.mxu0 %v2205_v27  ;;  %v2347_v27 = vld [vmem:[%s4347_s16 + $0x90] sm:$0xff] }
 0xa90   : > { %3000 = vmatprep.subr.mxu0 %v3894_v19 }
 0xa91   : > { %3001 = vmatpush3.msra.mxu0 %v2204_v28  ;;  %v2363_v28 = vld [vmem:[%s4347_s16 + $0x110] sm:$0xff] }
 0xa92   : > { %3002 = vmatprep.subr.mxu0 %v3894_v19 }
 0xa93   : > { %3003 = vmatpush3.msra.mxu0 %v2203_v29  ;;  %v2331_v29 = vld [vmem:[%s4347_s16 + $0x10] sm:$0xff] }
 0xa94   : > { %3004 = vmatprep.subr.mxu0 %v3894_v19 }
 0xa95   : > { %3005 = vmatpush3.msra.mxu0 %v2202_v30  ;;  %v2346_v30 = vld [vmem:[%s4347_s16 + $0x88] sm:$0xff] }
 0xa96   : > { %3006 = vmatprep.subr.mxu0 %v3894_v19 }
 0xa97   : > { %3007 = vmatpush3.msra.mxu0 %v2201_v31  ;;  %v2362_v31 = vld [vmem:[%s4347_s16 + $0x108] sm:$0xff] }
 0xa98   : > { %3011 = vmatprep.subr.mxu0 %v3894_v19 }
 0xb0b   : > { %v2176_v18 = vpop.xlane.xlu0 %2175 }
 0xb0c   : > { %v2178_v40 = vmul.f32 0.0078125, %v2176_v18  ;;  %v2367_v18 = vld [vmem:[%s4347_s16 + $0x130] sm:$0xff] }
 0xb0e   : > { %v2179_v45 = vsub.f32 %v2172_v4, %v2178_v40  ;;  %v2337_v4 = vld [vmem:[%s4347_s16 + $0x40] sm:$0xff]  ;;  %v2335_v40 = vld [vmem:[%s4347_s16 + $0x30] sm:$0xff] }
 0xb0f   : > { %2866 = vmatpush3.msra.mxu1 %v2337_v4 }
 0xb10   : > { %v2180_v53 = vmul.f32 %v2179_v45, %v2179_v45  ;;  %2867 = vmatprep.subr.mxu1 %v2352_v41 }
 0xb11   : > { %2868 = vmatpush3.msra.mxu1 %v2336_v17 }
 0xb12   : > { %2181 = vadd.xlane.f32.xlu1 %v2180_v53  ;;  %2869 = vmatprep.subr.mxu1 %v2351_v3  ;;  %v2366_v53 = vld [vmem:[%s4347_s16 + $0x128] sm:$0xff] }
 0xb13   : > { %2870 = vmatpush3.msra.mxu1 %v2335_v40 }
 0xb9b   : > { %v2182_v32 = vpop.xlane.xlu1 %2181 }
 0xb9c   : > { %v2183_v33 = vmul.f32 0.0078125, %v2182_v32  ;;  %v2330_v32 = vld [vmem:[%s4347_s16 + $0x8] sm:$0xff] }
 0xb9e   : > { %v2184_v34 = vadd.f32 1e-06, %v2183_v33  ;;  %v2345_v33 = vld [vmem:[%s4347_s16 + $0x80] sm:$0xff] }
 0xba0   : > { %3108 = vrsqrt.f32 %v2184_v34  ;;  %v2361_v34 = vld [vmem:[%s4347_s16 + $0x100] sm:$0xff] }
 0xbad   : > { %v3109_v35 = vpop.eup %3108 }
 0xbae   : > { %v2186_v37 = vmul.f32 %v3109_v35, %v2179_v45  ;;  %v2350_v45 = vld [vmem:[%s4347_s16 + $0xa8] sm:$0xff]  ;;  %v2329_v35 = vld [vmem:[%s4347_s16] sm:$0xff] }
 0xbaf   : > { %2871 = vmatprep.subr.mxu1 %v2350_v45 }
 0xbb0   : > { %v2193_v43 = vmul.f32 %v2765_v36, %v2186_v37  ;;  %2872 = vmatpush3.msra.mxu1 %v2334_v20 }
 0xbb1   : > { %2873 = vmatprep.subr.mxu1 %v2349_v21 }
 0xbb2   : > { %v2200_v44 = vadd.f32 %v2766_v38, %v2193_v43  ;;  %2874 = vmatpush3.msra.mxu1 %v2333_v23 }
 0xbb3   : > { %2875 = vmatprep.subr.mxu1 %v2348_v24 }
 0xbb4   : > { %3009 = vmatmul.mubr.f32.vlgmr.msra.gmra.mxu0 %v2200_v44  ;;  %2876 = vmatpush3.msra.mxu1 %v2332_v26 }
 0xbb5   : > { %3043 = vmatprep.mubr.msk.f32.mxu0 %vm3122_vm0, %v3894_v19  ;;  %3012 = vmatpush3.msra.mxu0 %v2376_v61  ;;  %v2537_v61 = vld [vmem:[%s4349_s18 + $0x50] sm:$0xff] }
 0xbb6   : > { %3013 = vmatprep.subr.mxu0 %v3894_v19  ;;  %2877 = vmatprep.subr.mxu1 %v2347_v27 }
 0xbb7   : > { %3014 = vmatpush3.msra.mxu0 %v2375_v1  ;;  %2878 = vmatpush3.msra.mxu1 %v2331_v29  ;;  %v2534_v1 = vld [vmem:[%s4349_s18 + $0x38] sm:$0xff] }
 0xbb8   : > { %3015 = vmatprep.subr.mxu0 %v3894_v19  ;;  %2879 = vmatprep.subr.mxu1 %v2346_v30 }
 0xbb9   : > { %3016 = vmatpush3.msra.mxu0 %v2374_v7  ;;  %2880 = vmatpush3.msra.mxu1 %v2330_v32  ;;  %v2531_v7 = vld [vmem:[%s4349_s18 + $0x20] sm:$0xff] }
 0xbba   : > { %3017 = vmatprep.subr.mxu0 %v3894_v19  ;;  %2881 = vmatprep.subr.mxu1 %v2345_v33 }
 0xbbb   : > { %3018 = vmatpush3.msra.mxu0 %v2373_v11  ;;  %2882 = vmatpush3.msra.mxu1 %v2329_v35  ;;  %v2528_v11 = vld [vmem:[%s4349_s18 + $0x8] sm:$0xff] }
 0xbbc   : > { %3019 = vmatprep.subr.mxu0 %v3894_v19  ;;  %3046 = vmatprep.subr.mxu1 %v3894_v19 }
 0xbbd   : > { %3020 = vmatpush3.msra.mxu0 %v2372_v56 }
 0xbbe   : > { %3021 = vmatprep.subr.mxu0 %v3894_v19 }
 0xbbf   : > { %3022 = vmatpush3.msra.mxu0 %v2371_v63 }
 0xbc0   : > { %3023 = vmatprep.subr.mxu0 %v3894_v19 }
 0xbc1   : > { %3024 = vmatpush3.msra.mxu0 %v2370_v50 }
 0xbc2   : > { %3025 = vmatprep.subr.mxu0 %v3894_v19 }
 0xbc3   : > { %3026 = vmatpush3.msra.mxu0 %v2369_v39  ;;  %v2771_v39 = vld [vmem:[#allocation3] ss:$0 sm:$0xff] }
 0xbc4   : > { %3027 = vmatprep.subr.mxu0 %v3894_v19 }
 0xbc5   : > { %3028 = vmatpush3.msra.mxu0 %v2368_v42 }
 0xbc6   : > { %3029 = vmatprep.subr.mxu0 %v3894_v19 }
 0xbc7   : > { %3030 = vmatpush3.msra.mxu0 %v2367_v18 }
 0xbc8   : > { %3031 = vmatprep.subr.mxu0 %v3894_v19 }
 0xbc9   : > { %3032 = vmatpush3.msra.mxu0 %v2366_v53 }
 0xbca   : > { %3033 = vmatprep.subr.mxu0 %v3894_v19 }
 0xbcb   : > { %3034 = vmatpush3.msra.mxu0 %v2365_v22 }
 0xbcc   : > { %3035 = vmatprep.subr.mxu0 %v3894_v19 }
 0xbcd   : > { %3036 = vmatpush3.msra.mxu0 %v2364_v25 }
 0xbce   : > { %3037 = vmatprep.subr.mxu0 %v3894_v19 }
 0xbcf   : > { %3038 = vmatpush3.msra.mxu0 %v2363_v28 }
 0xbd0   : > { %3039 = vmatprep.subr.mxu0 %v3894_v19 }
 0xbd1   : > { %3040 = vmatpush3.msra.mxu0 %v2362_v31 }
 0xbd2   : > { %3041 = vmatprep.subr.mxu0 %v3894_v19 }
 0xbd3   : > { %3042 = vmatpush3.msra.mxu0 %v2361_v34 }
 0xc74   : > { %v2290_v47 = vpop.f32.mrf.mxu0 }
 0xc75   : > { %v2291_v48 = vadd.f32 %v2767_v46, %v2290_v47  ;;  %v2769_v47 = vld [vmem:[%s4346_s15] ss:$0 sm:$0xff] }
 0xc76   : > { %v3010_v51 = vpop.f32.mrf.mxu0 }
 0xc77   : > { %v2294_v52 = vadd.f32 %v2291_v48, %v2200_v44  ;;  %v2768_v44 = vld [vmem:[%s4345_s14] ss:$0 sm:$0xff] }
 0xc79   : > { %v2295_v54 = vmax.f32 %v2294_v52, 0.0  ;;  %v2542_v52 = vld [vmem:[%s4349_s18 + $0x78] sm:$0xff] }
 0xc7b   : > { %2298 = vadd.xlane.f32.xlu0 %v2295_v54 }
 0xd04   : > { %v2299_v55 = vpop.xlane.xlu0 %2298 }
 0xd05   : > { %v2300_v57 = vmul.f32 0.0078125, %v2299_v55 }
 0xd07   : > { %v4084_v58 = vsub.f32 %v2295_v54, %v2300_v57  ;;  %v2541_v57 = vld [vmem:[%s4349_s18 + $0x70] sm:$0xff] }
 0xd09   : > { %v2302_v59 = vmul.f32 %v4084_v58, %v4084_v58 }
 0xd0b   : > { %2303 = vadd.xlane.f32.xlu0 %v2302_v59  ;;  %v2539_v59 = vld [vmem:[%s4349_s18 + $0x60] sm:$0xff] }
 0xd94   : > { %v2304_v36 = vpop.xlane.xlu0 %2303 }
 0xd95   : > { %v2305_v37 = vmul.f32 0.0078125, %v2304_v36 }
 0xd97   : > { %v2306_v38 = vadd.f32 1e-06, %v2305_v37 }
 0xd99   : > { %3110 = vrsqrt.f32 %v2306_v38 }
 0xda6   : > { %v3111_v43 = vpop.eup %3110 }
 0xda7   : > { %v2308_v46 = vmul.f32 %v3111_v43, %v4084_v58  ;;  %v2540_v58 = vld [vmem:[%s4349_s18 + $0x68] sm:$0xff] }
 0xda9   : > { %v2315_v48 = vmul.f32 %v2768_v44, %v2308_v46 }
 0xdab   : > { %v2322_v51 = vadd.f32 %v2769_v47, %v2315_v48 }
 0xdad   : > { %2325 = vst [vmem:[#allocation2 + $0x1] sm:$0xff] %v2322_v51  ;;  %2448 = vmatprep.mubr.f32.mxu1 %v2322_v51 }
 0xdb4   : > { %v2328_v54 = vld [vmem:[#allocation2 + $0x2] sm:$0xff] }
 0xdb5   : > { %v2326_v55 = vld [vmem:[#allocation2] sm:$0xff]  ;;  %3044 = vmatmul.mubr.f32.vlgmr.msra.gmra.mxu0 %v2328_v54 }
 0xdb6   : > { %2449 = vmatmul.mubr.f32.vlgmr.msra.gmra.mxu1 %v2326_v55 }
 0xdb7   : > { %3047 = vmatpush3.msra.mxu1 %v2542_v52  ;;  %3078 = vmatprep.mubr.msk.f32.mxu1 %vm3122_vm0, %v3894_v19 }
 0xdb8   : > { %3048 = vmatprep.subr.mxu1 %v3894_v19 }
 0xdb9   : > { %3049 = vmatpush3.msra.mxu1 %v2541_v57 }
 0xdba   : > { %3050 = vmatprep.subr.mxu1 %v3894_v19 }
 0xdbb   : > { %3051 = vmatpush3.msra.mxu1 %v2540_v58 }
 0xdbc   : > { %3052 = vmatprep.subr.mxu1 %v3894_v19 }
 0xdbd   : > { %3053 = vmatpush3.msra.mxu1 %v2539_v59 }
 0xdbe   : > { %3054 = vmatprep.subr.mxu1 %v3894_v19 }
 0xdbf   : > { %3055 = vmatpush3.msra.mxu1 %v2538_v60 }
 0xdc0   : > { %3056 = vmatprep.subr.mxu1 %v3894_v19 }
 0xdc1   : > { %3057 = vmatpush3.msra.mxu1 %v2537_v61 }
 0xdc2   : > { %3058 = vmatprep.subr.mxu1 %v3894_v19 }
 0xdc3   : > { %3059 = vmatpush3.msra.mxu1 %v2536_v62 }
 0xdc4   : > { %3060 = vmatprep.subr.mxu1 %v3894_v19 }
 0xdc5   : > { %3061 = vmatpush3.msra.mxu1 %v2535_v0 }
 0xdc6   : > { %3062 = vmatprep.subr.mxu1 %v3894_v19 }
 0xdc7   : > { %3063 = vmatpush3.msra.mxu1 %v2534_v1 }
 0xdc8   : > { %3064 = vmatprep.subr.mxu1 %v3894_v19 }
 0xdc9   : > { %3065 = vmatpush3.msra.mxu1 %v2533_v2 }
 0xdca   : > { %3066 = vmatprep.subr.mxu1 %v3894_v19 }
 0xdcb   : > { %3067 = vmatpush3.msra.mxu1 %v2532_v6 }
 0xdcc   : > { %3068 = vmatprep.subr.mxu1 %v3894_v19 }
 0xdcd   : > { %3069 = vmatpush3.msra.mxu1 %v2531_v7 }
 0xdce   : > { %3070 = vmatprep.subr.mxu1 %v3894_v19 }
 0xdcf   : > { %3071 = vmatpush3.msra.mxu1 %v2530_v8 }
 0xdd0   : > { %3072 = vmatprep.subr.mxu1 %v3894_v19 }
 0xdd1   : > { %3073 = vmatpush3.msra.mxu1 %v2529_v9 }
 0xdd2   : > { %3074 = vmatprep.subr.mxu1 %v3894_v19 }
 0xdd3   : > { %3075 = vmatpush3.msra.mxu1 %v2528_v11 }
 0xdd4   : > { %3076 = vmatprep.subr.mxu1 %v3894_v19 }
 0xdd5   : > { %3077 = vmatpush3.msra.mxu1 %v2527_v10 }
 0xe75   : > { %v2520_v12 = vpop.f32.mrf.mxu0 }
 0xe76   : > { %v2883_v56 = vpop.f32.mrf.mxu1 }
 0xe77   : > { %v3045_v13 = vpop.f32.mrf.mxu0 }
 0xe78   : > { %v2884_v63 = vpop.f32.mrf.mxu1 }
 0xe79   : > { %v2885_v49 = vadd.f32 %v2884_v63, %v2883_v56 }
 0xe7b   : > { %v2451_v16 = vadd.f32 %v2885_v49, %v2770_v14 }
 0xe7d   : > { %v2521_v50 = vadd.f32 %v2520_v12, %v2451_v16 }
 0xe7f   : > { %vm2524_vm3 = vcmp.ge.f32.partialorder %v2521_v50, 0.0  ;;  %v2525_v5 = vmul.f32 0.01, %v2521_v50 }
 0xe81   : > { %v2526_v15 = vsel %vm2524_vm3, %v2521_v50, %v2525_v5 }
 0xe82   : > { %3079 = vmatmul.mubr.f32.vlgmr.msra.gmra.mxu1 %v2526_v15 }
 0xf42   : > { %v2616_v19 = vpop.f32.mrf.mxu1 }
 0xf43   : > { %v2617_v4 = vadd.f32 %v2771_v39, %v2616_v19 }
 0xf44   : > { %v3080_v41 = vpop.f32.mrf.mxu1 }
 0xf45   : > { %2621 = vst.msk [vmem:[%s646_s22] sm:$0xff] %vm2620_vm4, %v2617_v4 }
 0xf46 PF: > { %s4367_s19 = sld [smem:[#allocation4_spill]] }
 0xf4c   : > { %s32_s23 = sadd.s32 1, %s4367_s19  }
 0xf4d   : > { %p29_p4 = scmp.ge.s32.totalorder %s32_s23, 4  }
 0xf4f   :  { %31 = sbr.rel (!%p29_p4) target bundleno = 6 (0x6), region = 136 }

</bundles_post_ra>
